<compile_context>
chip_gen: v7x
topology: tpu7x:2x2x1
jax: 0.10.0
libtpu: 0.0.40
codegen_flags: <defaults>
</compile_context>

<pallas_src>
import functools
import math

import jax
import jax.numpy as jnp
from jax.experimental import pallas as pl
from jax.experimental.pallas import tpu as pltpu

# ----------------------- model hyper-parameters (small) ---------------------
D_MODEL = 32          # BioBERT hidden_size stand-in
NHEAD = 4             # decoder heads
ENC_NHEAD = 4         # encoder heads
DIM_FF = 64           # decoder feed-forward
ENC_FF = 64           # encoder intermediate
NUM_DEC_LAYERS = 2
NUM_ENC_LAYERS = 2
VOCAB_SIZE = 64       # decoder vocab
ENC_VOCAB = 50        # encoder vocab
PAD_TOKEN_ID = 0
MAX_LEN = 16

NEG = -1.0e30         # large finite "masked" value: exp() underflows to 0 and
                      # fully-masked rows stay finite (no NaN hazard)
LN_EPS_BERT = 1e-12
LN_EPS_DEC = 1e-5

# Canonical order of all weight refs passed to the fused kernel.
WEIGHT_ORDER = (
    # encoder embedding LayerNorm
    "emb_ln_g", "emb_ln_b",
    # encoder layers (stacked along leading [L, ...] axis)
    "e_wqkv", "e_bqkv", "e_wo", "e_bo", "e_ln1g", "e_ln1b",
    "e_ff1w", "e_ff1b", "e_ff2w", "e_ff2b", "e_ln2g", "e_ln2b",
    # decoder layers (stacked along leading [L, ...] axis)
    "d_ln1g", "d_ln1b", "d_sawqkv", "d_sabqkv", "d_sawo", "d_sabo",
    "d_ln2g", "d_ln2b", "d_cawq", "d_cabq", "d_cawkv", "d_cabkv",
    "d_cawo", "d_cabo", "d_ln3g", "d_ln3b",
    "d_ff1w", "d_ff1b", "d_ff2w", "d_ff2b",
    # final LayerNorm + fc_out
    "fin_g", "fin_b", "fc_w", "fc_b",
)


# ============================ in-kernel helpers ==============================
def _ln(x, g, b, eps):
    """Row-wise layer norm. x:[M,D], g/b:[1,D] (f32 statistics)."""
    x = x.astype(jnp.float32)
    mu = jnp.mean(x, axis=-1, keepdims=True)
    xc = x - mu
    var = jnp.mean(xc * xc, axis=-1, keepdims=True)
    return xc * jax.lax.rsqrt(var + eps) * g + b


def _mha(q, k, v, mask, wo, bo, nhead):
    """All-head attention + single fused output projection.

    q:[Tq,D] k,v:[Tk,D], mask: precomputed full [Tq,Tk] additive mask
    (NEG = masked; built once outside the head loop), wo:[D,D] pre-transposed,
    bo:[1,D].  Heads are an unrolled loop; per-head contexts are concatenated
    into one [Tq,D] buffer so the O-projection is a single MXU push.
    """
    _, D = q.shape
    dh = D // nhead
    scale = 1.0 / math.sqrt(dh)
    heads = []
    for h in range(nhead):
        lo = h * dh
        qh = q[:, lo:lo + dh] * scale
        kh = k[:, lo:lo + dh]
        vh = v[:, lo:lo + dh]
        s = jax.lax.dot_general(qh, kh, (((1,), (1,)), ((), ())),
                                preferred_element_type=jnp.float32) + mask
        m = jnp.max(s, axis=-1, keepdims=True)
        p = jnp.exp(s - m)
        denom = jnp.sum(p, axis=-1, keepdims=True)          # >= 1 (finite mask)
        heads.append(jnp.dot(p, vh, preferred_element_type=jnp.float32)
                     * pl.reciprocal(denom, approx=True))
    ctx = jnp.concatenate(heads, axis=-1)                    # [Tq, D]
    return jnp.dot(ctx, wo, preferred_element_type=jnp.float32) + bo


# ================================ fused kernel ===============================
def _fused_kernel(h0_ref, emask_ref, x0_ref, dids_ref, *rest,
                  enc_nhead, dec_nhead, n_enc, n_dec):
    """Whole encoder + decoder + final head for ONE batch element."""
    w = dict(zip(WEIGHT_ORDER, rest[:len(WEIGHT_ORDER)]))
    out_ref = rest[len(WEIGHT_ORDER)]

    D = h0_ref.shape[-1]

    # ---------------- encoder (post-norm BERT stand-in) ----------------
    h = _ln(h0_ref[0], w["emb_ln_g"][...], w["emb_ln_b"][...], LN_EPS_BERT)
    S = h.shape[0]
    # additive key-padding mask built in-kernel from raw int mask
    enc_pad = jnp.where(emask_ref[0] == 0, NEG, 0.0).astype(jnp.float32)  # [1,S]
    enc_mask_ss = jnp.broadcast_to(enc_pad, (S, S))          # hoisted broadcast

    for l in range(n_enc):
        qkv = (jnp.dot(h, w["e_wqkv"][l], preferred_element_type=jnp.float32)
               + w["e_bqkv"][l])
        attn = _mha(qkv[:, :D], qkv[:, D:2 * D], qkv[:, 2 * D:], enc_mask_ss,
                    w["e_wo"][l], w["e_bo"][l], enc_nhead)
        x = _ln(h + attn, w["e_ln1g"][l], w["e_ln1b"][l], LN_EPS_BERT)
        ff = (jnp.dot(x, w["e_ff1w"][l], preferred_element_type=jnp.float32)
              + w["e_ff1b"][l])
        # TODO(synk): BERT uses erf-GELU; tanh approximation for Mosaic-safe lowering.
        ff = jax.nn.gelu(ff, approximate=True)
        ff = (jnp.dot(ff, w["e_ff2w"][l], preferred_element_type=jnp.float32)
              + w["e_ff2b"][l])
        h = _ln(x + ff, w["e_ln2g"][l], w["e_ln2b"][l], LN_EPS_BERT)
    memory = h                                               # [S, D]

    # ---------------- decoder (pre-norm TransformerDecoder) ----------------
    x = x0_ref[0].astype(jnp.float32)                        # [T, D]
    T = x.shape[0]
    # causal + target key-padding masks, built once in-kernel
    tgt_pad = jnp.where(dids_ref[0] == PAD_TOKEN_ID, NEG, 0.0
                        ).astype(jnp.float32)                # [1, T]
    row = jax.lax.broadcasted_iota(jnp.int32, (T, T), 0)
    col = jax.lax.broadcasted_iota(jnp.int32, (T, T), 1)
    self_mask = (jnp.where(col > row, NEG, 0.0).astype(jnp.float32)
                 + jnp.broadcast_to(tgt_pad, (T, T)))
    cross_mask = jnp.broadcast_to(enc_pad, (T, S))

    for l in range(n_dec):
        # ---- self attention (norm_first) ----
        hd = _ln(x, w["d_ln1g"][l], w["d_ln1b"][l], LN_EPS_DEC)
        qkv = (jnp.dot(hd, w["d_sawqkv"][l], preferred_element_type=jnp.float32)
               + w["d_sabqkv"][l])
        x = x + _mha(qkv[:, :D], qkv[:, D:2 * D], qkv[:, 2 * D:], self_mask,
                     w["d_sawo"][l], w["d_sabo"][l], dec_nhead)
        # ---- cross attention (norm_first) ----
        hd = _ln(x, w["d_ln2g"][l], w["d_ln2b"][l], LN_EPS_DEC)
        q = (jnp.dot(hd, w["d_cawq"][l], preferred_element_type=jnp.float32)
             + w["d_cabq"][l])
        kv = (jnp.dot(memory, w["d_cawkv"][l], preferred_element_type=jnp.float32)
              + w["d_cabkv"][l])
        x = x + _mha(q, kv[:, :D], kv[:, D:], cross_mask,
                     w["d_cawo"][l], w["d_cabo"][l], dec_nhead)
        # ---- feed-forward (norm_first, relu) ----
        hd = _ln(x, w["d_ln3g"][l], w["d_ln3b"][l], LN_EPS_DEC)
        ff = (jnp.dot(hd, w["d_ff1w"][l], preferred_element_type=jnp.float32)
              + w["d_ff1b"][l])
        ff = jnp.maximum(ff, 0.0)
        x = x + (jnp.dot(ff, w["d_ff2w"][l], preferred_element_type=jnp.float32)
                 + w["d_ff2b"][l])

    # ---------------- final LayerNorm + fc_out ----------------
    y = _ln(x, w["fin_g"][...], w["fin_b"][...], LN_EPS_DEC)
    logits = (jnp.dot(y, w["fc_w"][...], preferred_element_type=jnp.float32)
              + w["fc_b"][...])
    out_ref[0] = logits.astype(out_ref.dtype)                # tiny [T,V] store


# ============================== Pallas wrapper ===============================
def _act_spec(shape):
    """Per-batch block: leading axis indexed by the grid, rest full."""
    n = len(shape)
    return pl.BlockSpec((1,) + tuple(shape[1:]),
                        lambda b, _n=n: (b,) + (0,) * (_n - 1))


def _full_spec(arr):
    """Whole-array block (weights): constant index across the batch grid."""
    n = arr.ndim
    return pl.BlockSpec(arr.shape, lambda b, _n=n: (0,) * _n)


@jax.jit
def forward(params, input_ids, attention_mask, decoder_input_ids):
    B, T = decoder_input_ids.shape
    S = input_ids.shape[1]
    D = D_MODEL

    # XLA side: only the embedding gathers + adds; all LayerNorms / matmuls /
    # softmax run inside the single fused Pallas kernel.
    h0 = (params["enc_word_emb"][input_ids]
          + params["enc_pos_emb"][None, :S, :]
          + params["enc_type_emb"][0][None, None, :])          # [B, S, D]
    x0 = (params["dec_emb"][decoder_input_ids]
          + params["dec_pos_emb"][:, :T, :])                   # [B, T, D]
    emask = attention_mask.astype(jnp.int32).reshape(B, 1, S)  # raw int mask
    dids = decoder_input_ids.astype(jnp.int32).reshape(B, 1, T)

    weights = [params[name] for name in WEIGHT_ORDER]
    kernel = functools.partial(_fused_kernel, enc_nhead=ENC_NHEAD,
                               dec_nhead=NHEAD, n_enc=NUM_ENC_LAYERS,
                               n_dec=NUM_DEC_LAYERS)

    logits = pl.pallas_call(
        kernel,
        out_shape=jax.ShapeDtypeStruct((B, T, VOCAB_SIZE), jnp.float32),
        grid=(B,),
        in_specs=([_act_spec((B, S, D)),
                   _act_spec((B, 1, S)),
                   _act_spec((B, T, D)),
                   _act_spec((B, 1, T))]
                  + [_full_spec(wgt) for wgt in weights]),
        out_specs=_act_spec((B, T, VOCAB_SIZE)),
        compiler_params=pltpu.CompilerParams(
            dimension_semantics=("parallel",)),   # 2 TCs on v7x; cheap on v5e/v6e
    )(h0, emask, x0, dids, *weights)
    return logits


# ============================ deterministic weights ==========================
def _normal(key, shape, std=0.02):
    return jax.random.normal(key, shape, jnp.float32) * std


def init_params(key):
    d = D_MODEL
    keys = jax.random.split(key, 8)
    ones_d = jnp.ones((1, d), jnp.float32)
    zeros_d = jnp.zeros((1, d), jnp.float32)

    p = {}
    # embedding tables (gathered in XLA)
    p["enc_word_emb"] = _normal(keys[0], (ENC_VOCAB, d))
    p["enc_pos_emb"] = _normal(keys[1], (MAX_LEN, d))
    p["enc_type_emb"] = _normal(keys[2], (2, d))
    emb = _normal(keys[3], (VOCAB_SIZE, d))                    # xavier-like
    p["dec_emb"] = emb.at[PAD_TOKEN_ID].set(0.0)               # padding_idx row
    p["dec_pos_emb"] = _normal(keys[4], (1, MAX_LEN, d), std=0.02)

    # encoder embedding LayerNorm
    p["emb_ln_g"], p["emb_ln_b"] = ones_d, zeros_d

    # ---- encoder layers, stacked along [L, ...] ----
    enc_names = ("e_wqkv", "e_bqkv", "e_wo", "e_bo", "e_ln1g", "e_ln1b",
                 "e_ff1w", "e_ff1b", "e_ff2w", "e_ff2b", "e_ln2g", "e_ln2b")
    acc = {k: [] for k in enc_names}
    for lk in jax.random.split(keys[5], NUM_ENC_LAYERS):
        ks = jax.random.split(lk, 4)
        acc["e_wqkv"].append(_normal(ks[0], (d, 3 * d)))       # pre-transposed
        acc["e_bqkv"].append(jnp.zeros((1, 3 * d), jnp.float32))
        acc["e_wo"].append(_normal(ks[1], (d, d)))
        acc["e_bo"].append(zeros_d)
        acc["e_ln1g"].append(ones_d)
        acc["e_ln1b"].append(zeros_d)
        acc["e_ff1w"].append(_normal(ks[2], (d, ENC_FF)))
        acc["e_ff1b"].append(jnp.zeros((1, ENC_FF), jnp.float32))
        acc["e_ff2w"].append(_normal(ks[3], (ENC_FF, d)))
        acc["e_ff2b"].append(zeros_d)
        acc["e_ln2g"].append(ones_d)
        acc["e_ln2b"].append(zeros_d)
    p.update({k: jnp.stack(v) for k, v in acc.items()})

    # ---- decoder layers, stacked along [L, ...] ----
    dec_names = ("d_ln1g", "d_ln1b", "d_sawqkv", "d_sabqkv", "d_sawo", "d_sabo",
                 "d_ln2g", "d_ln2b", "d_cawq", "d_cabq", "d_cawkv", "d_cabkv",
                 "d_cawo", "d_cabo", "d_ln3g", "d_ln3b",
                 "d_ff1w", "d_ff1b", "d_ff2w", "d_ff2b")
    acc = {k: [] for k in dec_names}
    for lk in jax.random.split(keys[6], NUM_DEC_LAYERS):
        ks = jax.random.split(lk, 7)
        acc["d_ln1g"].append(ones_d)
        acc["d_ln1b"].append(zeros_d)
        acc["d_sawqkv"].append(_normal(ks[0], (d, 3 * d)))     # fused QKV
        acc["d_sabqkv"].append(jnp.zeros((1, 3 * d), jnp.float32))
        acc["d_sawo"].append(_normal(ks[1], (d, d)))
        acc["d_sabo"].append(zeros_d)
        acc["d_ln2g"].append(ones_d)
        acc["d_ln2b"].append(zeros_d)
        acc["d_cawq"].append(_normal(ks[2], (d, d)))
        acc["d_cabq"].append(zeros_d)
        acc["d_cawkv"].append(_normal(ks[3], (d, 2 * d)))      # fused KV
        acc["d_cabkv"].append(jnp.zeros((1, 2 * d), jnp.float32))
        acc["d_cawo"].append(_normal(ks[4], (d, d)))
        acc["d_cabo"].append(zeros_d)
        acc["d_ln3g"].append(ones_d)
        acc["d_ln3b"].append(zeros_d)
        acc["d_ff1w"].append(_normal(ks[5], (d, DIM_FF)))      # pre-transposed
        acc["d_ff1b"].append(jnp.zeros((1, DIM_FF), jnp.float32))
        acc["d_ff2w"].append(_normal(ks[6], (DIM_FF, d)))
        acc["d_ff2b"].append(zeros_d)
    p.update({k: jnp.stack(v) for k, v in acc.items()})

    # ---- final LayerNorm + fc_out ----
    p["fin_g"], p["fin_b"] = ones_d, zeros_d
    p["fc_w"] = _normal(keys[7], (d, VOCAB_SIZE))              # pre-transposed
    p["fc_b"] = jnp.zeros((1, VOCAB_SIZE), jnp.float32)
    return p


# ===================================== main ==================================
if __name__ == "__main__":
    key = jax.random.PRNGKey(0)
    k_enc, k_dec = jax.random.split(key, 2)

    B, S_ENC, T_DEC = 2, 10, 8

    # encoder inputs: token ids in [1, ENC_VOCAB), padding mask per batch
    input_ids = jax.random.randint(k_enc, (B, S_ENC), 1, ENC_VOCAB,
                                   dtype=jnp.int32)
    attention_mask = jnp.array(
        [[1] * S_ENC,
         [1] * 7 + [0] * (S_ENC - 7)], dtype=jnp.int32)
    input_ids = jnp.where(attention_mask == 1, input_ids, PAD_TOKEN_ID)

    # decoder inputs: BOS (=1) first, pad tail in one row
    dec_ids = jax.random.randint(k_dec, (B, T_DEC), 1, VOCAB_SIZE,
                                 dtype=jnp.int32)
    dec_ids = dec_ids.at[:, 0].set(1)
    dec_ids = dec_ids.at[1, 6:].set(PAD_TOKEN_ID)

    params = init_params(jax.random.PRNGKey(42))

    logits = forward(params, input_ids, attention_mask, dec_ids)
    logits = jax.block_until_ready(logits)

    assert logits.shape == (B, T_DEC, VOCAB_SIZE), logits.shape
    assert bool(jnp.all(jnp.isfinite(logits)))
    print("KERNEL_OK")
</pallas_src>

<mosaic_0001>
module attributes {stable_mosaic.version = 11 : i64} {
  func.func @_fused_kernel(%arg0: i32, %arg1: memref<1x10x32xf32, #tpu.memory_space<vmem>>, %arg2: memref<1x1x10xi32, #tpu.memory_space<vmem>>, %arg3: memref<1x8x32xf32, #tpu.memory_space<vmem>>, %arg4: memref<1x1x8xi32, #tpu.memory_space<vmem>>, %arg5: memref<1x32xf32, #tpu.memory_space<vmem>>, %arg6: memref<1x32xf32, #tpu.memory_space<vmem>>, %arg7: memref<2x32x96xf32, #tpu.memory_space<vmem>>, %arg8: memref<2x1x96xf32, #tpu.memory_space<vmem>>, %arg9: memref<2x32x32xf32, #tpu.memory_space<vmem>>, %arg10: memref<2x1x32xf32, #tpu.memory_space<vmem>>, %arg11: memref<2x1x32xf32, #tpu.memory_space<vmem>>, %arg12: memref<2x1x32xf32, #tpu.memory_space<vmem>>, %arg13: memref<2x32x64xf32, #tpu.memory_space<vmem>>, %arg14: memref<2x1x64xf32, #tpu.memory_space<vmem>>, %arg15: memref<2x64x32xf32, #tpu.memory_space<vmem>>, %arg16: memref<2x1x32xf32, #tpu.memory_space<vmem>>, %arg17: memref<2x1x32xf32, #tpu.memory_space<vmem>>, %arg18: memref<2x1x32xf32, #tpu.memory_space<vmem>>, %arg19: memref<2x1x32xf32, #tpu.memory_space<vmem>>, %arg20: memref<2x1x32xf32, #tpu.memory_space<vmem>>, %arg21: memref<2x32x96xf32, #tpu.memory_space<vmem>>, %arg22: memref<2x1x96xf32, #tpu.memory_space<vmem>>, %arg23: memref<2x32x32xf32, #tpu.memory_space<vmem>>, %arg24: memref<2x1x32xf32, #tpu.memory_space<vmem>>, %arg25: memref<2x1x32xf32, #tpu.memory_space<vmem>>, %arg26: memref<2x1x32xf32, #tpu.memory_space<vmem>>, %arg27: memref<2x32x32xf32, #tpu.memory_space<vmem>>, %arg28: memref<2x1x32xf32, #tpu.memory_space<vmem>>, %arg29: memref<2x32x64xf32, #tpu.memory_space<vmem>>, %arg30: memref<2x1x64xf32, #tpu.memory_space<vmem>>, %arg31: memref<2x32x32xf32, #tpu.memory_space<vmem>>, %arg32: memref<2x1x32xf32, #tpu.memory_space<vmem>>, %arg33: memref<2x1x32xf32, #tpu.memory_space<vmem>>, %arg34: memref<2x1x32xf32, #tpu.memory_space<vmem>>, %arg35: memref<2x32x64xf32, #tpu.memory_space<vmem>>, %arg36: memref<2x1x64xf32, #tpu.memory_space<vmem>>, %arg37: memref<2x64x32xf32, #tpu.memory_space<vmem>>, %arg38: memref<2x1x32xf32, #tpu.memory_space<vmem>>, %arg39: memref<1x32xf32, #tpu.memory_space<vmem>>, %arg40: memref<1x32xf32, #tpu.memory_space<vmem>>, %arg41: memref<32x64xf32, #tpu.memory_space<vmem>>, %arg42: memref<1x64xf32, #tpu.memory_space<vmem>>, %arg43: memref<1x8x64xf32, #tpu.memory_space<vmem>>) attributes {dimension_semantics = [#tpu.dimension_semantics<parallel>], iteration_bounds = array<i64: 2>, scalar_prefetch = 0 : i64, scratch_operands = 0 : i64, tpu.core_type = #tpu.core_type<tc>, window_params = [{transform_indices = @transform_0, window_bounds = array<i64: 1, 10, 32>}, {transform_indices = @transform_1, window_bounds = array<i64: 1, 1, 10>}, {transform_indices = @transform_2, window_bounds = array<i64: 1, 8, 32>}, {transform_indices = @transform_3, window_bounds = array<i64: 1, 1, 8>}, {pipeline_mode = #tpu.pipeline_mode<synchronous>, transform_indices = @transform_4, window_bounds = array<i64: 1, 32>}, {pipeline_mode = #tpu.pipeline_mode<synchronous>, transform_indices = @transform_5, window_bounds = array<i64: 1, 32>}, {pipeline_mode = #tpu.pipeline_mode<synchronous>, transform_indices = @transform_6, window_bounds = array<i64: 2, 32, 96>}, {pipeline_mode = #tpu.pipeline_mode<synchronous>, transform_indices = @transform_7, window_bounds = array<i64: 2, 1, 96>}, {pipeline_mode = #tpu.pipeline_mode<synchronous>, transform_indices = @transform_8, window_bounds = array<i64: 2, 32, 32>}, {pipeline_mode = #tpu.pipeline_mode<synchronous>, transform_indices = @transform_9, window_bounds = array<i64: 2, 1, 32>}, {pipeline_mode = #tpu.pipeline_mode<synchronous>, transform_indices = @transform_10, window_bounds = array<i64: 2, 1, 32>}, {pipeline_mode = #tpu.pipeline_mode<synchronous>, transform_indices = @transform_11, window_bounds = array<i64: 2, 1, 32>}, {pipeline_mode = #tpu.pipeline_mode<synchronous>, transform_indices = @transform_12, window_bounds = array<i64: 2, 32, 64>}, {pipeline_mode = #tpu.pipeline_mode<synchronous>, transform_indices = @transform_13, window_bounds = array<i64: 2, 1, 64>}, {pipeline_mode = #tpu.pipeline_mode<synchronous>, transform_indices = @transform_14, window_bounds = array<i64: 2, 64, 32>}, {pipeline_mode = #tpu.pipeline_mode<synchronous>, transform_indices = @transform_15, window_bounds = array<i64: 2, 1, 32>}, {pipeline_mode = #tpu.pipeline_mode<synchronous>, transform_indices = @transform_16, window_bounds = array<i64: 2, 1, 32>}, {pipeline_mode = #tpu.pipeline_mode<synchronous>, transform_indices = @transform_17, window_bounds = array<i64: 2, 1, 32>}, {pipeline_mode = #tpu.pipeline_mode<synchronous>, transform_indices = @transform_18, window_bounds = array<i64: 2, 1, 32>}, {pipeline_mode = #tpu.pipeline_mode<synchronous>, transform_indices = @transform_19, window_bounds = array<i64: 2, 1, 32>}, {pipeline_mode = #tpu.pipeline_mode<synchronous>, transform_indices = @transform_20, window_bounds = array<i64: 2, 32, 96>}, {pipeline_mode = #tpu.pipeline_mode<synchronous>, transform_indices = @transform_21, window_bounds = array<i64: 2, 1, 96>}, {pipeline_mode = #tpu.pipeline_mode<synchronous>, transform_indices = @transform_22, window_bounds = array<i64: 2, 32, 32>}, {pipeline_mode = #tpu.pipeline_mode<synchronous>, transform_indices = @transform_23, window_bounds = array<i64: 2, 1, 32>}, {pipeline_mode = #tpu.pipeline_mode<synchronous>, transform_indices = @transform_24, window_bounds = array<i64: 2, 1, 32>}, {pipeline_mode = #tpu.pipeline_mode<synchronous>, transform_indices = @transform_25, window_bounds = array<i64: 2, 1, 32>}, {pipeline_mode = #tpu.pipeline_mode<synchronous>, transform_indices = @transform_26, window_bounds = array<i64: 2, 32, 32>}, {pipeline_mode = #tpu.pipeline_mode<synchronous>, transform_indices = @transform_27, window_bounds = array<i64: 2, 1, 32>}, {pipeline_mode = #tpu.pipeline_mode<synchronous>, transform_indices = @transform_28, window_bounds = array<i64: 2, 32, 64>}, {pipeline_mode = #tpu.pipeline_mode<synchronous>, transform_indices = @transform_29, window_bounds = array<i64: 2, 1, 64>}, {pipeline_mode = #tpu.pipeline_mode<synchronous>, transform_indices = @transform_30, window_bounds = array<i64: 2, 32, 32>}, {pipeline_mode = #tpu.pipeline_mode<synchronous>, transform_indices = @transform_31, window_bounds = array<i64: 2, 1, 32>}, {pipeline_mode = #tpu.pipeline_mode<synchronous>, transform_indices = @transform_32, window_bounds = array<i64: 2, 1, 32>}, {pipeline_mode = #tpu.pipeline_mode<synchronous>, transform_indices = @transform_33, window_bounds = array<i64: 2, 1, 32>}, {pipeline_mode = #tpu.pipeline_mode<synchronous>, transform_indices = @transform_34, window_bounds = array<i64: 2, 32, 64>}, {pipeline_mode = #tpu.pipeline_mode<synchronous>, transform_indices = @transform_35, window_bounds = array<i64: 2, 1, 64>}, {pipeline_mode = #tpu.pipeline_mode<synchronous>, transform_indices = @transform_36, window_bounds = array<i64: 2, 64, 32>}, {pipeline_mode = #tpu.pipeline_mode<synchronous>, transform_indices = @transform_37, window_bounds = array<i64: 2, 1, 32>}, {pipeline_mode = #tpu.pipeline_mode<synchronous>, transform_indices = @transform_38, window_bounds = array<i64: 1, 32>}, {pipeline_mode = #tpu.pipeline_mode<synchronous>, transform_indices = @transform_39, window_bounds = array<i64: 1, 32>}, {pipeline_mode = #tpu.pipeline_mode<synchronous>, transform_indices = @transform_40, window_bounds = array<i64: 32, 64>}, {pipeline_mode = #tpu.pipeline_mode<synchronous>, transform_indices = @transform_41, window_bounds = array<i64: 1, 64>}, {transform_indices = @transform_42, window_bounds = array<i64: 1, 8, 64>}]} {
    %c0 = arith.constant 0 : index
    %c0_0 = arith.constant 0 : index
    %c0_1 = arith.constant 0 : index
    %0 = vector.load %arg1[%c0, %c0_0, %c0_1] : memref<1x10x32xf32, #tpu.memory_space<vmem>>, vector<1x10x32xf32>
    %1 = vector.shape_cast %0 : vector<1x10x32xf32> to vector<10x32xf32>
    %c0_2 = arith.constant 0 : index
    %c0_3 = arith.constant 0 : index
    %2 = vector.load %arg5[%c0_2, %c0_3] : memref<1x32xf32, #tpu.memory_space<vmem>>, vector<1x32xf32>
    %c0_4 = arith.constant 0 : index
    %c0_5 = arith.constant 0 : index
    %3 = vector.load %arg6[%c0_4, %c0_5] : memref<1x32xf32, #tpu.memory_space<vmem>>, vector<1x32xf32>
    %cst = arith.constant dense<0.000000e+00> : vector<10xf32>
    %4 = vector.multi_reduction <add>, %1, %cst [1] : vector<10x32xf32> to vector<10xf32>
    %5 = vector.shape_cast %4 : vector<10xf32> to vector<10x1xf32>
    %cst_6 = arith.constant 3.200000e+01 : f32
    %6 = vector.broadcast %cst_6 : f32 to vector<10x1xf32>
    %7 = arith.divf %5, %6 : vector<10x1xf32>
    %8 = vector.broadcast %7 : vector<10x1xf32> to vector<10x32xf32>
    %9 = arith.subf %1, %8 : vector<10x32xf32>
    %10 = arith.mulf %9, %9 : vector<10x32xf32>
    %cst_7 = arith.constant dense<0.000000e+00> : vector<10xf32>
    %11 = vector.multi_reduction <add>, %10, %cst_7 [1] : vector<10x32xf32> to vector<10xf32>
    %12 = vector.shape_cast %11 : vector<10xf32> to vector<10x1xf32>
    %cst_8 = arith.constant 3.200000e+01 : f32
    %13 = vector.broadcast %cst_8 : f32 to vector<10x1xf32>
    %14 = arith.divf %12, %13 : vector<10x1xf32>
    %cst_9 = arith.constant 9.99999996E-13 : f32
    %15 = vector.broadcast %cst_9 : f32 to vector<10x1xf32>
    %16 = arith.addf %14, %15 : vector<10x1xf32>
    %17 = math.rsqrt %16 : vector<10x1xf32>
    %18 = vector.broadcast %17 : vector<10x1xf32> to vector<10x32xf32>
    %19 = arith.mulf %9, %18 : vector<10x32xf32>
    %20 = vector.broadcast %2 : vector<1x32xf32> to vector<10x32xf32>
    %21 = arith.mulf %19, %20 : vector<10x32xf32>
    %22 = vector.broadcast %3 : vector<1x32xf32> to vector<10x32xf32>
    %23 = arith.addf %21, %22 : vector<10x32xf32>
    %c0_10 = arith.constant 0 : index
    %c0_11 = arith.constant 0 : index
    %c0_12 = arith.constant 0 : index
    %24 = vector.load %arg2[%c0_10, %c0_11, %c0_12] : memref<1x1x10xi32, #tpu.memory_space<vmem>>, vector<1x1x10xi32>
    %25 = vector.shape_cast %24 : vector<1x1x10xi32> to vector<1x10xi32>
    %c0_i32 = arith.constant 0 : i32
    %26 = vector.broadcast %c0_i32 : i32 to vector<1x10xi32>
    %27 = arith.cmpi eq, %25, %26 : vector<1x10xi32>
    %cst_13 = arith.constant -1.000000e+30 : f32
    %cst_14 = arith.constant 0.000000e+00 : f32
    %28 = vector.broadcast %cst_13 : f32 to vector<1x10xf32>
    %29 = vector.broadcast %cst_14 : f32 to vector<1x10xf32>
    %30 = arith.select %27, %28, %29 : vector<1x10xi1>, vector<1x10xf32>
    %31 = vector.shape_cast %30 : vector<1x10xf32> to vector<1x10xf32>
    %32 = vector.broadcast %31 : vector<1x10xf32> to vector<10x10xf32>
    %c0_15 = arith.constant 0 : index
    %c0_16 = arith.constant 0 : index
    %c0_17 = arith.constant 0 : index
    %33 = vector.load %arg7[%c0_15, %c0_16, %c0_17] : memref<2x32x96xf32, #tpu.memory_space<vmem>>, vector<1x32x96xf32>
    %34 = vector.shape_cast %33 : vector<1x32x96xf32> to vector<32x96xf32>
    %cst_18 = arith.constant dense<0.000000e+00> : vector<10x96xf32>
    %35 = tpu.matmul %23, %34, %cst_18 {dimension_numbers = #tpu.dot_dimension_numbers<[1], [0], [0], [1], [0, 0, 1, 1], [], []>} : vector<10x32xf32>, vector<32x96xf32>, vector<10x96xf32> -> vector<10x96xf32>
    %c0_19 = arith.constant 0 : index
    %c0_20 = arith.constant 0 : index
    %c0_21 = arith.constant 0 : index
    %36 = vector.load %arg8[%c0_19, %c0_20, %c0_21] : memref<2x1x96xf32, #tpu.memory_space<vmem>>, vector<1x1x96xf32>
    %37 = vector.shape_cast %36 : vector<1x1x96xf32> to vector<1x96xf32>
    %38 = vector.broadcast %37 : vector<1x96xf32> to vector<10x96xf32>
    %39 = arith.addf %35, %38 : vector<10x96xf32>
    %40 = vector.extract_strided_slice %39 {offsets = [0, 0], sizes = [10, 32], strides = [1, 1]} : vector<10x96xf32> to vector<10x32xf32>
    %41 = vector.extract_strided_slice %39 {offsets = [0, 32], sizes = [10, 32], strides = [1, 1]} : vector<10x96xf32> to vector<10x32xf32>
    %42 = vector.extract_strided_slice %39 {offsets = [0, 64], sizes = [10, 32], strides = [1, 1]} : vector<10x96xf32> to vector<10x32xf32>
    %c0_22 = arith.constant 0 : index
    %c0_23 = arith.constant 0 : index
    %c0_24 = arith.constant 0 : index
    %43 = vector.load %arg9[%c0_22, %c0_23, %c0_24] : memref<2x32x32xf32, #tpu.memory_space<vmem>>, vector<1x32x32xf32>
    %44 = vector.shape_cast %43 : vector<1x32x32xf32> to vector<32x32xf32>
    %c0_25 = arith.constant 0 : index
    %c0_26 = arith.constant 0 : index
    %c0_27 = arith.constant 0 : index
    %45 = vector.load %arg10[%c0_25, %c0_26, %c0_27] : memref<2x1x32xf32, #tpu.memory_space<vmem>>, vector<1x1x32xf32>
    %46 = vector.shape_cast %45 : vector<1x1x32xf32> to vector<1x32xf32>
    %47 = vector.extract_strided_slice %40 {offsets = [0, 0], sizes = [10, 8], strides = [1, 1]} : vector<10x32xf32> to vector<10x8xf32>
    %cst_28 = arith.constant 0.353553385 : f32
    %48 = vector.broadcast %cst_28 : f32 to vector<10x8xf32>
    %49 = arith.mulf %47, %48 : vector<10x8xf32>
    %50 = vector.extract_strided_slice %41 {offsets = [0, 0], sizes = [10, 8], strides = [1, 1]} : vector<10x32xf32> to vector<10x8xf32>
    %51 = vector.extract_strided_slice %42 {offsets = [0, 0], sizes = [10, 8], strides = [1, 1]} : vector<10x32xf32> to vector<10x8xf32>
    %cst_29 = arith.constant dense<0.000000e+00> : vector<10x10xf32>
    %52 = tpu.matmul %49, %50, %cst_29 {dimension_numbers = #tpu.dot_dimension_numbers<[1], [1], [0], [0], [0, 0, 1, 0], [], []>} : vector<10x8xf32>, vector<10x8xf32>, vector<10x10xf32> -> vector<10x10xf32>
    %53 = arith.addf %52, %32 : vector<10x10xf32>
    %cst_30 = arith.constant dense<0xFF800000> : vector<10xf32>
    %54 = vector.multi_reduction <maximumf>, %53, %cst_30 [1] : vector<10x10xf32> to vector<10xf32>
    %55 = vector.shape_cast %54 : vector<10xf32> to vector<10x1xf32>
    %56 = vector.broadcast %55 : vector<10x1xf32> to vector<10x10xf32>
    %57 = arith.subf %53, %56 : vector<10x10xf32>
    %58 = math.exp %57 : vector<10x10xf32>
    %cst_31 = arith.constant dense<0.000000e+00> : vector<10xf32>
    %59 = vector.multi_reduction <add>, %58, %cst_31 [1] : vector<10x10xf32> to vector<10xf32>
    %60 = vector.shape_cast %59 : vector<10xf32> to vector<10x1xf32>
    %cst_32 = arith.constant dense<0.000000e+00> : vector<10x8xf32>
    %61 = tpu.matmul %58, %51, %cst_32 {dimension_numbers = #tpu.dot_dimension_numbers<[1], [0], [0], [1], [0, 0, 1, 1], [], []>} : vector<10x10xf32>, vector<10x8xf32>, vector<10x8xf32> -> vector<10x8xf32>
    %62 = tpu.reciprocal %60 {approx = true} : vector<10x1xf32> -> vector<10x1xf32>
    %63 = vector.broadcast %62 : vector<10x1xf32> to vector<10x8xf32>
    %64 = arith.mulf %61, %63 : vector<10x8xf32>
    %65 = vector.extract_strided_slice %40 {offsets = [0, 8], sizes = [10, 8], strides = [1, 1]} : vector<10x32xf32> to vector<10x8xf32>
    %cst_33 = arith.constant 0.353553385 : f32
    %66 = vector.broadcast %cst_33 : f32 to vector<10x8xf32>
    %67 = arith.mulf %65, %66 : vector<10x8xf32>
    %68 = vector.extract_strided_slice %41 {offsets = [0, 8], sizes = [10, 8], strides = [1, 1]} : vector<10x32xf32> to vector<10x8xf32>
    %69 = vector.extract_strided_slice %42 {offsets = [0, 8], sizes = [10, 8], strides = [1, 1]} : vector<10x32xf32> to vector<10x8xf32>
    %cst_34 = arith.constant dense<0.000000e+00> : vector<10x10xf32>
    %70 = tpu.matmul %67, %68, %cst_34 {dimension_numbers = #tpu.dot_dimension_numbers<[1], [1], [0], [0], [0, 0, 1, 0], [], []>} : vector<10x8xf32>, vector<10x8xf32>, vector<10x10xf32> -> vector<10x10xf32>
    %71 = arith.addf %70, %32 : vector<10x10xf32>
    %cst_35 = arith.constant dense<0xFF800000> : vector<10xf32>
    %72 = vector.multi_reduction <maximumf>, %71, %cst_35 [1] : vector<10x10xf32> to vector<10xf32>
    %73 = vector.shape_cast %72 : vector<10xf32> to vector<10x1xf32>
    %74 = vector.broadcast %73 : vector<10x1xf32> to vector<10x10xf32>
    %75 = arith.subf %71, %74 : vector<10x10xf32>
    %76 = math.exp %75 : vector<10x10xf32>
    %cst_36 = arith.constant dense<0.000000e+00> : vector<10xf32>
    %77 = vector.multi_reduction <add>, %76, %cst_36 [1] : vector<10x10xf32> to vector<10xf32>
    %78 = vector.shape_cast %77 : vector<10xf32> to vector<10x1xf32>
    %cst_37 = arith.constant dense<0.000000e+00> : vector<10x8xf32>
    %79 = tpu.matmul %76, %69, %cst_37 {dimension_numbers = #tpu.dot_dimension_numbers<[1], [0], [0], [1], [0, 0, 1, 1], [], []>} : vector<10x10xf32>, vector<10x8xf32>, vector<10x8xf32> -> vector<10x8xf32>
    %80 = tpu.reciprocal %78 {approx = true} : vector<10x1xf32> -> vector<10x1xf32>
    %81 = vector.broadcast %80 : vector<10x1xf32> to vector<10x8xf32>
    %82 = arith.mulf %79, %81 : vector<10x8xf32>
    %83 = vector.extract_strided_slice %40 {offsets = [0, 16], sizes = [10, 8], strides = [1, 1]} : vector<10x32xf32> to vector<10x8xf32>
    %cst_38 = arith.constant 0.353553385 : f32
    %84 = vector.broadcast %cst_38 : f32 to vector<10x8xf32>
    %85 = arith.mulf %83, %84 : vector<10x8xf32>
    %86 = vector.extract_strided_slice %41 {offsets = [0, 16], sizes = [10, 8], strides = [1, 1]} : vector<10x32xf32> to vector<10x8xf32>
    %87 = vector.extract_strided_slice %42 {offsets = [0, 16], sizes = [10, 8], strides = [1, 1]} : vector<10x32xf32> to vector<10x8xf32>
    %cst_39 = arith.constant dense<0.000000e+00> : vector<10x10xf32>
    %88 = tpu.matmul %85, %86, %cst_39 {dimension_numbers = #tpu.dot_dimension_numbers<[1], [1], [0], [0], [0, 0, 1, 0], [], []>} : vector<10x8xf32>, vector<10x8xf32>, vector<10x10xf32> -> vector<10x10xf32>
    %89 = arith.addf %88, %32 : vector<10x10xf32>
    %cst_40 = arith.constant dense<0xFF800000> : vector<10xf32>
    %90 = vector.multi_reduction <maximumf>, %89, %cst_40 [1] : vector<10x10xf32> to vector<10xf32>
    %91 = vector.shape_cast %90 : vector<10xf32> to vector<10x1xf32>
    %92 = vector.broadcast %91 : vector<10x1xf32> to vector<10x10xf32>
    %93 = arith.subf %89, %92 : vector<10x10xf32>
    %94 = math.exp %93 : vector<10x10xf32>
    %cst_41 = arith.constant dense<0.000000e+00> : vector<10xf32>
    %95 = vector.multi_reduction <add>, %94, %cst_41 [1] : vector<10x10xf32> to vector<10xf32>
    %96 = vector.shape_cast %95 : vector<10xf32> to vector<10x1xf32>
    %cst_42 = arith.constant dense<0.000000e+00> : vector<10x8xf32>
    %97 = tpu.matmul %94, %87, %cst_42 {dimension_numbers = #tpu.dot_dimension_numbers<[1], [0], [0], [1], [0, 0, 1, 1], [], []>} : vector<10x10xf32>, vector<10x8xf32>, vector<10x8xf32> -> vector<10x8xf32>
    %98 = tpu.reciprocal %96 {approx = true} : vector<10x1xf32> -> vector<10x1xf32>
    %99 = vector.broadcast %98 : vector<10x1xf32> to vector<10x8xf32>
    %100 = arith.mulf %97, %99 : vector<10x8xf32>
    %101 = vector.extract_strided_slice %40 {offsets = [0, 24], sizes = [10, 8], strides = [1, 1]} : vector<10x32xf32> to vector<10x8xf32>
    %cst_43 = arith.constant 0.353553385 : f32
    %102 = vector.broadcast %cst_43 : f32 to vector<10x8xf32>
    %103 = arith.mulf %101, %102 : vector<10x8xf32>
    %104 = vector.extract_strided_slice %41 {offsets = [0, 24], sizes = [10, 8], strides = [1, 1]} : vector<10x32xf32> to vector<10x8xf32>
    %105 = vector.extract_strided_slice %42 {offsets = [0, 24], sizes = [10, 8], strides = [1, 1]} : vector<10x32xf32> to vector<10x8xf32>
    %cst_44 = arith.constant dense<0.000000e+00> : vector<10x10xf32>
    %106 = tpu.matmul %103, %104, %cst_44 {dimension_numbers = #tpu.dot_dimension_numbers<[1], [1], [0], [0], [0, 0, 1, 0], [], []>} : vector<10x8xf32>, vector<10x8xf32>, vector<10x10xf32> -> vector<10x10xf32>
    %107 = arith.addf %106, %32 : vector<10x10xf32>
    %cst_45 = arith.constant dense<0xFF800000> : vector<10xf32>
    %108 = vector.multi_reduction <maximumf>, %107, %cst_45 [1] : vector<10x10xf32> to vector<10xf32>
    %109 = vector.shape_cast %108 : vector<10xf32> to vector<10x1xf32>
    %110 = vector.broadcast %109 : vector<10x1xf32> to vector<10x10xf32>
    %111 = arith.subf %107, %110 : vector<10x10xf32>
    %112 = math.exp %111 : vector<10x10xf32>
    %cst_46 = arith.constant dense<0.000000e+00> : vector<10xf32>
    %113 = vector.multi_reduction <add>, %112, %cst_46 [1] : vector<10x10xf32> to vector<10xf32>
    %114 = vector.shape_cast %113 : vector<10xf32> to vector<10x1xf32>
    %cst_47 = arith.constant dense<0.000000e+00> : vector<10x8xf32>
    %115 = tpu.matmul %112, %105, %cst_47 {dimension_numbers = #tpu.dot_dimension_numbers<[1], [0], [0], [1], [0, 0, 1, 1], [], []>} : vector<10x10xf32>, vector<10x8xf32>, vector<10x8xf32> -> vector<10x8xf32>
    %116 = tpu.reciprocal %114 {approx = true} : vector<10x1xf32> -> vector<10x1xf32>
    %117 = vector.broadcast %116 : vector<10x1xf32> to vector<10x8xf32>
    %118 = arith.mulf %115, %117 : vector<10x8xf32>
    %119 = tpu.concatenate %64, %82, %100, %118 in 1 : vector<10x8xf32>, vector<10x8xf32>, vector<10x8xf32>, vector<10x8xf32> -> vector<10x32xf32>
    %cst_48 = arith.constant dense<0.000000e+00> : vector<10x32xf32>
    %120 = tpu.matmul %119, %44, %cst_48 {dimension_numbers = #tpu.dot_dimension_numbers<[1], [0], [0], [1], [0, 0, 1, 1], [], []>} : vector<10x32xf32>, vector<32x32xf32>, vector<10x32xf32> -> vector<10x32xf32>
    %121 = vector.broadcast %46 : vector<1x32xf32> to vector<10x32xf32>
    %122 = arith.addf %120, %121 : vector<10x32xf32>
    %123 = arith.addf %23, %122 : vector<10x32xf32>
    %c0_49 = arith.constant 0 : index
    %c0_50 = arith.constant 0 : index
    %c0_51 = arith.constant 0 : index
    %124 = vector.load %arg11[%c0_49, %c0_50, %c0_51] : memref<2x1x32xf32, #tpu.memory_space<vmem>>, vector<1x1x32xf32>
    %125 = vector.shape_cast %124 : vector<1x1x32xf32> to vector<1x32xf32>
    %c0_52 = arith.constant 0 : index
    %c0_53 = arith.constant 0 : index
    %c0_54 = arith.constant 0 : index
    %126 = vector.load %arg12[%c0_52, %c0_53, %c0_54] : memref<2x1x32xf32, #tpu.memory_space<vmem>>, vector<1x1x32xf32>
    %127 = vector.shape_cast %126 : vector<1x1x32xf32> to vector<1x32xf32>
    %cst_55 = arith.constant dense<0.000000e+00> : vector<10xf32>
    %128 = vector.multi_reduction <add>, %123, %cst_55 [1] : vector<10x32xf32> to vector<10xf32>
    %129 = vector.shape_cast %128 : vector<10xf32> to vector<10x1xf32>
    %cst_56 = arith.constant 3.200000e+01 : f32
    %130 = vector.broadcast %cst_56 : f32 to vector<10x1xf32>
    %131 = arith.divf %129, %130 : vector<10x1xf32>
    %132 = vector.broadcast %131 : vector<10x1xf32> to vector<10x32xf32>
    %133 = arith.subf %123, %132 : vector<10x32xf32>
    %134 = arith.mulf %133, %133 : vector<10x32xf32>
    %cst_57 = arith.constant dense<0.000000e+00> : vector<10xf32>
    %135 = vector.multi_reduction <add>, %134, %cst_57 [1] : vector<10x32xf32> to vector<10xf32>
    %136 = vector.shape_cast %135 : vector<10xf32> to vector<10x1xf32>
    %cst_58 = arith.constant 3.200000e+01 : f32
    %137 = vector.broadcast %cst_58 : f32 to vector<10x1xf32>
    %138 = arith.divf %136, %137 : vector<10x1xf32>
    %cst_59 = arith.constant 9.99999996E-13 : f32
    %139 = vector.broadcast %cst_59 : f32 to vector<10x1xf32>
    %140 = arith.addf %138, %139 : vector<10x1xf32>
    %141 = math.rsqrt %140 : vector<10x1xf32>
    %142 = vector.broadcast %141 : vector<10x1xf32> to vector<10x32xf32>
    %143 = arith.mulf %133, %142 : vector<10x32xf32>
    %144 = vector.broadcast %125 : vector<1x32xf32> to vector<10x32xf32>
    %145 = arith.mulf %143, %144 : vector<10x32xf32>
    %146 = vector.broadcast %127 : vector<1x32xf32> to vector<10x32xf32>
    %147 = arith.addf %145, %146 : vector<10x32xf32>
    %c0_60 = arith.constant 0 : index
    %c0_61 = arith.constant 0 : index
    %c0_62 = arith.constant 0 : index
    %148 = vector.load %arg13[%c0_60, %c0_61, %c0_62] : memref<2x32x64xf32, #tpu.memory_space<vmem>>, vector<1x32x64xf32>
    %149 = vector.shape_cast %148 : vector<1x32x64xf32> to vector<32x64xf32>
    %cst_63 = arith.constant dense<0.000000e+00> : vector<10x64xf32>
    %150 = tpu.matmul %147, %149, %cst_63 {dimension_numbers = #tpu.dot_dimension_numbers<[1], [0], [0], [1], [0, 0, 1, 1], [], []>} : vector<10x32xf32>, vector<32x64xf32>, vector<10x64xf32> -> vector<10x64xf32>
    %c0_64 = arith.constant 0 : index
    %c0_65 = arith.constant 0 : index
    %c0_66 = arith.constant 0 : index
    %151 = vector.load %arg14[%c0_64, %c0_65, %c0_66] : memref<2x1x64xf32, #tpu.memory_space<vmem>>, vector<1x1x64xf32>
    %152 = vector.shape_cast %151 : vector<1x1x64xf32> to vector<1x64xf32>
    %153 = vector.broadcast %152 : vector<1x64xf32> to vector<10x64xf32>
    %154 = arith.addf %150, %153 : vector<10x64xf32>
    %155 = arith.mulf %154, %154 : vector<10x64xf32>
    %156 = arith.mulf %154, %155 : vector<10x64xf32>
    %cst_67 = arith.constant 4.471500e-02 : f32
    %157 = vector.broadcast %cst_67 : f32 to vector<10x64xf32>
    %158 = arith.mulf %157, %156 : vector<10x64xf32>
    %159 = arith.addf %154, %158 : vector<10x64xf32>
    %cst_68 = arith.constant 0.797884583 : f32
    %160 = vector.broadcast %cst_68 : f32 to vector<10x64xf32>
    %161 = arith.mulf %160, %159 : vector<10x64xf32>
    %162 = math.tanh %161 : vector<10x64xf32>
    %cst_69 = arith.constant 1.000000e+00 : f32
    %163 = vector.broadcast %cst_69 : f32 to vector<10x64xf32>
    %164 = arith.addf %163, %162 : vector<10x64xf32>
    %cst_70 = arith.constant 5.000000e-01 : f32
    %165 = vector.broadcast %cst_70 : f32 to vector<10x64xf32>
    %166 = arith.mulf %165, %164 : vector<10x64xf32>
    %167 = arith.mulf %154, %166 : vector<10x64xf32>
    %c0_71 = arith.constant 0 : index
    %c0_72 = arith.constant 0 : index
    %c0_73 = arith.constant 0 : index
    %168 = vector.load %arg15[%c0_71, %c0_72, %c0_73] : memref<2x64x32xf32, #tpu.memory_space<vmem>>, vector<1x64x32xf32>
    %169 = vector.shape_cast %168 : vector<1x64x32xf32> to vector<64x32xf32>
    %cst_74 = arith.constant dense<0.000000e+00> : vector<10x32xf32>
    %170 = tpu.matmul %167, %169, %cst_74 {dimension_numbers = #tpu.dot_dimension_numbers<[1], [0], [0], [1], [0, 0, 1, 1], [], []>} : vector<10x64xf32>, vector<64x32xf32>, vector<10x32xf32> -> vector<10x32xf32>
    %c0_75 = arith.constant 0 : index
    %c0_76 = arith.constant 0 : index
    %c0_77 = arith.constant 0 : index
    %171 = vector.load %arg16[%c0_75, %c0_76, %c0_77] : memref<2x1x32xf32, #tpu.memory_space<vmem>>, vector<1x1x32xf32>
    %172 = vector.shape_cast %171 : vector<1x1x32xf32> to vector<1x32xf32>
    %173 = vector.broadcast %172 : vector<1x32xf32> to vector<10x32xf32>
    %174 = arith.addf %170, %173 : vector<10x32xf32>
    %175 = arith.addf %147, %174 : vector<10x32xf32>
    %c0_78 = arith.constant 0 : index
    %c0_79 = arith.constant 0 : index
    %c0_80 = arith.constant 0 : index
    %176 = vector.load %arg17[%c0_78, %c0_79, %c0_80] : memref<2x1x32xf32, #tpu.memory_space<vmem>>, vector<1x1x32xf32>
    %177 = vector.shape_cast %176 : vector<1x1x32xf32> to vector<1x32xf32>
    %c0_81 = arith.constant 0 : index
    %c0_82 = arith.constant 0 : index
    %c0_83 = arith.constant 0 : index
    %178 = vector.load %arg18[%c0_81, %c0_82, %c0_83] : memref<2x1x32xf32, #tpu.memory_space<vmem>>, vector<1x1x32xf32>
    %179 = vector.shape_cast %178 : vector<1x1x32xf32> to vector<1x32xf32>
    %cst_84 = arith.constant dense<0.000000e+00> : vector<10xf32>
    %180 = vector.multi_reduction <add>, %175, %cst_84 [1] : vector<10x32xf32> to vector<10xf32>
    %181 = vector.shape_cast %180 : vector<10xf32> to vector<10x1xf32>
    %cst_85 = arith.constant 3.200000e+01 : f32
    %182 = vector.broadcast %cst_85 : f32 to vector<10x1xf32>
    %183 = arith.divf %181, %182 : vector<10x1xf32>
    %184 = vector.broadcast %183 : vector<10x1xf32> to vector<10x32xf32>
    %185 = arith.subf %175, %184 : vector<10x32xf32>
    %186 = arith.mulf %185, %185 : vector<10x32xf32>
    %cst_86 = arith.constant dense<0.000000e+00> : vector<10xf32>
    %187 = vector.multi_reduction <add>, %186, %cst_86 [1] : vector<10x32xf32> to vector<10xf32>
    %188 = vector.shape_cast %187 : vector<10xf32> to vector<10x1xf32>
    %cst_87 = arith.constant 3.200000e+01 : f32
    %189 = vector.broadcast %cst_87 : f32 to vector<10x1xf32>
    %190 = arith.divf %188, %189 : vector<10x1xf32>
    %cst_88 = arith.constant 9.99999996E-13 : f32
    %191 = vector.broadcast %cst_88 : f32 to vector<10x1xf32>
    %192 = arith.addf %190, %191 : vector<10x1xf32>
    %193 = math.rsqrt %192 : vector<10x1xf32>
    %194 = vector.broadcast %193 : vector<10x1xf32> to vector<10x32xf32>
    %195 = arith.mulf %185, %194 : vector<10x32xf32>
    %196 = vector.broadcast %177 : vector<1x32xf32> to vector<10x32xf32>
    %197 = arith.mulf %195, %196 : vector<10x32xf32>
    %198 = vector.broadcast %179 : vector<1x32xf32> to vector<10x32xf32>
    %199 = arith.addf %197, %198 : vector<10x32xf32>
    %c1 = arith.constant 1 : index
    %c0_89 = arith.constant 0 : index
    %c0_90 = arith.constant 0 : index
    %200 = vector.load %arg7[%c1, %c0_89, %c0_90] : memref<2x32x96xf32, #tpu.memory_space<vmem>>, vector<1x32x96xf32>
    %201 = vector.shape_cast %200 : vector<1x32x96xf32> to vector<32x96xf32>
    %cst_91 = arith.constant dense<0.000000e+00> : vector<10x96xf32>
    %202 = tpu.matmul %199, %201, %cst_91 {dimension_numbers = #tpu.dot_dimension_numbers<[1], [0], [0], [1], [0, 0, 1, 1], [], []>} : vector<10x32xf32>, vector<32x96xf32>, vector<10x96xf32> -> vector<10x96xf32>
    %c1_92 = arith.constant 1 : index
    %c0_93 = arith.constant 0 : index
    %c0_94 = arith.constant 0 : index
    %203 = vector.load %arg8[%c1_92, %c0_93, %c0_94] : memref<2x1x96xf32, #tpu.memory_space<vmem>>, vector<1x1x96xf32>
    %204 = vector.shape_cast %203 : vector<1x1x96xf32> to vector<1x96xf32>
    %205 = vector.broadcast %204 : vector<1x96xf32> to vector<10x96xf32>
    %206 = arith.addf %202, %205 : vector<10x96xf32>
    %207 = vector.extract_strided_slice %206 {offsets = [0, 0], sizes = [10, 32], strides = [1, 1]} : vector<10x96xf32> to vector<10x32xf32>
    %208 = vector.extract_strided_slice %206 {offsets = [0, 32], sizes = [10, 32], strides = [1, 1]} : vector<10x96xf32> to vector<10x32xf32>
    %209 = vector.extract_strided_slice %206 {offsets = [0, 64], sizes = [10, 32], strides = [1, 1]} : vector<10x96xf32> to vector<10x32xf32>
    %c1_95 = arith.constant 1 : index
    %c0_96 = arith.constant 0 : index
    %c0_97 = arith.constant 0 : index
    %210 = vector.load %arg9[%c1_95, %c0_96, %c0_97] : memref<2x32x32xf32, #tpu.memory_space<vmem>>, vector<1x32x32xf32>
    %211 = vector.shape_cast %210 : vector<1x32x32xf32> to vector<32x32xf32>
    %c1_98 = arith.constant 1 : index
    %c0_99 = arith.constant 0 : index
    %c0_100 = arith.constant 0 : index
    %212 = vector.load %arg10[%c1_98, %c0_99, %c0_100] : memref<2x1x32xf32, #tpu.memory_space<vmem>>, vector<1x1x32xf32>
    %213 = vector.shape_cast %212 : vector<1x1x32xf32> to vector<1x32xf32>
    %214 = vector.extract_strided_slice %207 {offsets = [0, 0], sizes = [10, 8], strides = [1, 1]} : vector<10x32xf32> to vector<10x8xf32>
    %cst_101 = arith.constant 0.353553385 : f32
    %215 = vector.broadcast %cst_101 : f32 to vector<10x8xf32>
    %216 = arith.mulf %214, %215 : vector<10x8xf32>
    %217 = vector.extract_strided_slice %208 {offsets = [0, 0], sizes = [10, 8], strides = [1, 1]} : vector<10x32xf32> to vector<10x8xf32>
    %218 = vector.extract_strided_slice %209 {offsets = [0, 0], sizes = [10, 8], strides = [1, 1]} : vector<10x32xf32> to vector<10x8xf32>
    %cst_102 = arith.constant dense<0.000000e+00> : vector<10x10xf32>
    %219 = tpu.matmul %216, %217, %cst_102 {dimension_numbers = #tpu.dot_dimension_numbers<[1], [1], [0], [0], [0, 0, 1, 0], [], []>} : vector<10x8xf32>, vector<10x8xf32>, vector<10x10xf32> -> vector<10x10xf32>
    %220 = arith.addf %219, %32 : vector<10x10xf32>
    %cst_103 = arith.constant dense<0xFF800000> : vector<10xf32>
    %221 = vector.multi_reduction <maximumf>, %220, %cst_103 [1] : vector<10x10xf32> to vector<10xf32>
    %222 = vector.shape_cast %221 : vector<10xf32> to vector<10x1xf32>
    %223 = vector.broadcast %222 : vector<10x1xf32> to vector<10x10xf32>
    %224 = arith.subf %220, %223 : vector<10x10xf32>
    %225 = math.exp %224 : vector<10x10xf32>
    %cst_104 = arith.constant dense<0.000000e+00> : vector<10xf32>
    %226 = vector.multi_reduction <add>, %225, %cst_104 [1] : vector<10x10xf32> to vector<10xf32>
    %227 = vector.shape_cast %226 : vector<10xf32> to vector<10x1xf32>
    %cst_105 = arith.constant dense<0.000000e+00> : vector<10x8xf32>
    %228 = tpu.matmul %225, %218, %cst_105 {dimension_numbers = #tpu.dot_dimension_numbers<[1], [0], [0], [1], [0, 0, 1, 1], [], []>} : vector<10x10xf32>, vector<10x8xf32>, vector<10x8xf32> -> vector<10x8xf32>
    %229 = tpu.reciprocal %227 {approx = true} : vector<10x1xf32> -> vector<10x1xf32>
    %230 = vector.broadcast %229 : vector<10x1xf32> to vector<10x8xf32>
    %231 = arith.mulf %228, %230 : vector<10x8xf32>
    %232 = vector.extract_strided_slice %207 {offsets = [0, 8], sizes = [10, 8], strides = [1, 1]} : vector<10x32xf32> to vector<10x8xf32>
    %cst_106 = arith.constant 0.353553385 : f32
    %233 = vector.broadcast %cst_106 : f32 to vector<10x8xf32>
    %234 = arith.mulf %232, %233 : vector<10x8xf32>
    %235 = vector.extract_strided_slice %208 {offsets = [0, 8], sizes = [10, 8], strides = [1, 1]} : vector<10x32xf32> to vector<10x8xf32>
    %236 = vector.extract_strided_slice %209 {offsets = [0, 8], sizes = [10, 8], strides = [1, 1]} : vector<10x32xf32> to vector<10x8xf32>
    %cst_107 = arith.constant dense<0.000000e+00> : vector<10x10xf32>
    %237 = tpu.matmul %234, %235, %cst_107 {dimension_numbers = #tpu.dot_dimension_numbers<[1], [1], [0], [0], [0, 0, 1, 0], [], []>} : vector<10x8xf32>, vector<10x8xf32>, vector<10x10xf32> -> vector<10x10xf32>
    %238 = arith.addf %237, %32 : vector<10x10xf32>
    %cst_108 = arith.constant dense<0xFF800000> : vector<10xf32>
    %239 = vector.multi_reduction <maximumf>, %238, %cst_108 [1] : vector<10x10xf32> to vector<10xf32>
    %240 = vector.shape_cast %239 : vector<10xf32> to vector<10x1xf32>
    %241 = vector.broadcast %240 : vector<10x1xf32> to vector<10x10xf32>
    %242 = arith.subf %238, %241 : vector<10x10xf32>
    %243 = math.exp %242 : vector<10x10xf32>
    %cst_109 = arith.constant dense<0.000000e+00> : vector<10xf32>
    %244 = vector.multi_reduction <add>, %243, %cst_109 [1] : vector<10x10xf32> to vector<10xf32>
    %245 = vector.shape_cast %244 : vector<10xf32> to vector<10x1xf32>
    %cst_110 = arith.constant dense<0.000000e+00> : vector<10x8xf32>
    %246 = tpu.matmul %243, %236, %cst_110 {dimension_numbers = #tpu.dot_dimension_numbers<[1], [0], [0], [1], [0, 0, 1, 1], [], []>} : vector<10x10xf32>, vector<10x8xf32>, vector<10x8xf32> -> vector<10x8xf32>
    %247 = tpu.reciprocal %245 {approx = true} : vector<10x1xf32> -> vector<10x1xf32>
    %248 = vector.broadcast %247 : vector<10x1xf32> to vector<10x8xf32>
    %249 = arith.mulf %246, %248 : vector<10x8xf32>
    %250 = vector.extract_strided_slice %207 {offsets = [0, 16], sizes = [10, 8], strides = [1, 1]} : vector<10x32xf32> to vector<10x8xf32>
    %cst_111 = arith.constant 0.353553385 : f32
    %251 = vector.broadcast %cst_111 : f32 to vector<10x8xf32>
    %252 = arith.mulf %250, %251 : vector<10x8xf32>
    %253 = vector.extract_strided_slice %208 {offsets = [0, 16], sizes = [10, 8], strides = [1, 1]} : vector<10x32xf32> to vector<10x8xf32>
    %254 = vector.extract_strided_slice %209 {offsets = [0, 16], sizes = [10, 8], strides = [1, 1]} : vector<10x32xf32> to vector<10x8xf32>
    %cst_112 = arith.constant dense<0.000000e+00> : vector<10x10xf32>
    %255 = tpu.matmul %252, %253, %cst_112 {dimension_numbers = #tpu.dot_dimension_numbers<[1], [1], [0], [0], [0, 0, 1, 0], [], []>} : vector<10x8xf32>, vector<10x8xf32>, vector<10x10xf32> -> vector<10x10xf32>
    %256 = arith.addf %255, %32 : vector<10x10xf32>
    %cst_113 = arith.constant dense<0xFF800000> : vector<10xf32>
    %257 = vector.multi_reduction <maximumf>, %256, %cst_113 [1] : vector<10x10xf32> to vector<10xf32>
    %258 = vector.shape_cast %257 : vector<10xf32> to vector<10x1xf32>
    %259 = vector.broadcast %258 : vector<10x1xf32> to vector<10x10xf32>
    %260 = arith.subf %256, %259 : vector<10x10xf32>
    %261 = math.exp %260 : vector<10x10xf32>
    %cst_114 = arith.constant dense<0.000000e+00> : vector<10xf32>
    %262 = vector.multi_reduction <add>, %261, %cst_114 [1] : vector<10x10xf32> to vector<10xf32>
    %263 = vector.shape_cast %262 : vector<10xf32> to vector<10x1xf32>
    %cst_115 = arith.constant dense<0.000000e+00> : vector<10x8xf32>
    %264 = tpu.matmul %261, %254, %cst_115 {dimension_numbers = #tpu.dot_dimension_numbers<[1], [0], [0], [1], [0, 0, 1, 1], [], []>} : vector<10x10xf32>, vector<10x8xf32>, vector<10x8xf32> -> vector<10x8xf32>
    %265 = tpu.reciprocal %263 {approx = true} : vector<10x1xf32> -> vector<10x1xf32>
    %266 = vector.broadcast %265 : vector<10x1xf32> to vector<10x8xf32>
    %267 = arith.mulf %264, %266 : vector<10x8xf32>
    %268 = vector.extract_strided_slice %207 {offsets = [0, 24], sizes = [10, 8], strides = [1, 1]} : vector<10x32xf32> to vector<10x8xf32>
    %cst_116 = arith.constant 0.353553385 : f32
    %269 = vector.broadcast %cst_116 : f32 to vector<10x8xf32>
    %270 = arith.mulf %268, %269 : vector<10x8xf32>
    %271 = vector.extract_strided_slice %208 {offsets = [0, 24], sizes = [10, 8], strides = [1, 1]} : vector<10x32xf32> to vector<10x8xf32>
    %272 = vector.extract_strided_slice %209 {offsets = [0, 24], sizes = [10, 8], strides = [1, 1]} : vector<10x32xf32> to vector<10x8xf32>
    %cst_117 = arith.constant dense<0.000000e+00> : vector<10x10xf32>
    %273 = tpu.matmul %270, %271, %cst_117 {dimension_numbers = #tpu.dot_dimension_numbers<[1], [1], [0], [0], [0, 0, 1, 0], [], []>} : vector<10x8xf32>, vector<10x8xf32>, vector<10x10xf32> -> vector<10x10xf32>
    %274 = arith.addf %273, %32 : vector<10x10xf32>
    %cst_118 = arith.constant dense<0xFF800000> : vector<10xf32>
    %275 = vector.multi_reduction <maximumf>, %274, %cst_118 [1] : vector<10x10xf32> to vector<10xf32>
    %276 = vector.shape_cast %275 : vector<10xf32> to vector<10x1xf32>
    %277 = vector.broadcast %276 : vector<10x1xf32> to vector<10x10xf32>
    %278 = arith.subf %274, %277 : vector<10x10xf32>
    %279 = math.exp %278 : vector<10x10xf32>
    %cst_119 = arith.constant dense<0.000000e+00> : vector<10xf32>
    %280 = vector.multi_reduction <add>, %279, %cst_119 [1] : vector<10x10xf32> to vector<10xf32>
    %281 = vector.shape_cast %280 : vector<10xf32> to vector<10x1xf32>
    %cst_120 = arith.constant dense<0.000000e+00> : vector<10x8xf32>
    %282 = tpu.matmul %279, %272, %cst_120 {dimension_numbers = #tpu.dot_dimension_numbers<[1], [0], [0], [1], [0, 0, 1, 1], [], []>} : vector<10x10xf32>, vector<10x8xf32>, vector<10x8xf32> -> vector<10x8xf32>
    %283 = tpu.reciprocal %281 {approx = true} : vector<10x1xf32> -> vector<10x1xf32>
    %284 = vector.broadcast %283 : vector<10x1xf32> to vector<10x8xf32>
    %285 = arith.mulf %282, %284 : vector<10x8xf32>
    %286 = tpu.concatenate %231, %249, %267, %285 in 1 : vector<10x8xf32>, vector<10x8xf32>, vector<10x8xf32>, vector<10x8xf32> -> vector<10x32xf32>
    %cst_121 = arith.constant dense<0.000000e+00> : vector<10x32xf32>
    %287 = tpu.matmul %286, %211, %cst_121 {dimension_numbers = #tpu.dot_dimension_numbers<[1], [0], [0], [1], [0, 0, 1, 1], [], []>} : vector<10x32xf32>, vector<32x32xf32>, vector<10x32xf32> -> vector<10x32xf32>
    %288 = vector.broadcast %213 : vector<1x32xf32> to vector<10x32xf32>
    %289 = arith.addf %287, %288 : vector<10x32xf32>
    %290 = arith.addf %199, %289 : vector<10x32xf32>
    %c1_122 = arith.constant 1 : index
    %c0_123 = arith.constant 0 : index
    %c0_124 = arith.constant 0 : index
    %291 = vector.load %arg11[%c1_122, %c0_123, %c0_124] : memref<2x1x32xf32, #tpu.memory_space<vmem>>, vector<1x1x32xf32>
    %292 = vector.shape_cast %291 : vector<1x1x32xf32> to vector<1x32xf32>
    %c1_125 = arith.constant 1 : index
    %c0_126 = arith.constant 0 : index
    %c0_127 = arith.constant 0 : index
    %293 = vector.load %arg12[%c1_125, %c0_126, %c0_127] : memref<2x1x32xf32, #tpu.memory_space<vmem>>, vector<1x1x32xf32>
    %294 = vector.shape_cast %293 : vector<1x1x32xf32> to vector<1x32xf32>
    %cst_128 = arith.constant dense<0.000000e+00> : vector<10xf32>
    %295 = vector.multi_reduction <add>, %290, %cst_128 [1] : vector<10x32xf32> to vector<10xf32>
    %296 = vector.shape_cast %295 : vector<10xf32> to vector<10x1xf32>
    %cst_129 = arith.constant 3.200000e+01 : f32
    %297 = vector.broadcast %cst_129 : f32 to vector<10x1xf32>
    %298 = arith.divf %296, %297 : vector<10x1xf32>
    %299 = vector.broadcast %298 : vector<10x1xf32> to vector<10x32xf32>
    %300 = arith.subf %290, %299 : vector<10x32xf32>
    %301 = arith.mulf %300, %300 : vector<10x32xf32>
    %cst_130 = arith.constant dense<0.000000e+00> : vector<10xf32>
    %302 = vector.multi_reduction <add>, %301, %cst_130 [1] : vector<10x32xf32> to vector<10xf32>
    %303 = vector.shape_cast %302 : vector<10xf32> to vector<10x1xf32>
    %cst_131 = arith.constant 3.200000e+01 : f32
    %304 = vector.broadcast %cst_131 : f32 to vector<10x1xf32>
    %305 = arith.divf %303, %304 : vector<10x1xf32>
    %cst_132 = arith.constant 9.99999996E-13 : f32
    %306 = vector.broadcast %cst_132 : f32 to vector<10x1xf32>
    %307 = arith.addf %305, %306 : vector<10x1xf32>
    %308 = math.rsqrt %307 : vector<10x1xf32>
    %309 = vector.broadcast %308 : vector<10x1xf32> to vector<10x32xf32>
    %310 = arith.mulf %300, %309 : vector<10x32xf32>
    %311 = vector.broadcast %292 : vector<1x32xf32> to vector<10x32xf32>
    %312 = arith.mulf %310, %311 : vector<10x32xf32>
    %313 = vector.broadcast %294 : vector<1x32xf32> to vector<10x32xf32>
    %314 = arith.addf %312, %313 : vector<10x32xf32>
    %c1_133 = arith.constant 1 : index
    %c0_134 = arith.constant 0 : index
    %c0_135 = arith.constant 0 : index
    %315 = vector.load %arg13[%c1_133, %c0_134, %c0_135] : memref<2x32x64xf32, #tpu.memory_space<vmem>>, vector<1x32x64xf32>
    %316 = vector.shape_cast %315 : vector<1x32x64xf32> to vector<32x64xf32>
    %cst_136 = arith.constant dense<0.000000e+00> : vector<10x64xf32>
    %317 = tpu.matmul %314, %316, %cst_136 {dimension_numbers = #tpu.dot_dimension_numbers<[1], [0], [0], [1], [0, 0, 1, 1], [], []>} : vector<10x32xf32>, vector<32x64xf32>, vector<10x64xf32> -> vector<10x64xf32>
    %c1_137 = arith.constant 1 : index
    %c0_138 = arith.constant 0 : index
    %c0_139 = arith.constant 0 : index
    %318 = vector.load %arg14[%c1_137, %c0_138, %c0_139] : memref<2x1x64xf32, #tpu.memory_space<vmem>>, vector<1x1x64xf32>
    %319 = vector.shape_cast %318 : vector<1x1x64xf32> to vector<1x64xf32>
    %320 = vector.broadcast %319 : vector<1x64xf32> to vector<10x64xf32>
    %321 = arith.addf %317, %320 : vector<10x64xf32>
    %322 = arith.mulf %321, %321 : vector<10x64xf32>
    %323 = arith.mulf %321, %322 : vector<10x64xf32>
    %cst_140 = arith.constant 4.471500e-02 : f32
    %324 = vector.broadcast %cst_140 : f32 to vector<10x64xf32>
    %325 = arith.mulf %324, %323 : vector<10x64xf32>
    %326 = arith.addf %321, %325 : vector<10x64xf32>
    %cst_141 = arith.constant 0.797884583 : f32
    %327 = vector.broadcast %cst_141 : f32 to vector<10x64xf32>
    %328 = arith.mulf %327, %326 : vector<10x64xf32>
    %329 = math.tanh %328 : vector<10x64xf32>
    %cst_142 = arith.constant 1.000000e+00 : f32
    %330 = vector.broadcast %cst_142 : f32 to vector<10x64xf32>
    %331 = arith.addf %330, %329 : vector<10x64xf32>
    %cst_143 = arith.constant 5.000000e-01 : f32
    %332 = vector.broadcast %cst_143 : f32 to vector<10x64xf32>
    %333 = arith.mulf %332, %331 : vector<10x64xf32>
    %334 = arith.mulf %321, %333 : vector<10x64xf32>
    %c1_144 = arith.constant 1 : index
    %c0_145 = arith.constant 0 : index
    %c0_146 = arith.constant 0 : index
    %335 = vector.load %arg15[%c1_144, %c0_145, %c0_146] : memref<2x64x32xf32, #tpu.memory_space<vmem>>, vector<1x64x32xf32>
    %336 = vector.shape_cast %335 : vector<1x64x32xf32> to vector<64x32xf32>
    %cst_147 = arith.constant dense<0.000000e+00> : vector<10x32xf32>
    %337 = tpu.matmul %334, %336, %cst_147 {dimension_numbers = #tpu.dot_dimension_numbers<[1], [0], [0], [1], [0, 0, 1, 1], [], []>} : vector<10x64xf32>, vector<64x32xf32>, vector<10x32xf32> -> vector<10x32xf32>
    %c1_148 = arith.constant 1 : index
    %c0_149 = arith.constant 0 : index
    %c0_150 = arith.constant 0 : index
    %338 = vector.load %arg16[%c1_148, %c0_149, %c0_150] : memref<2x1x32xf32, #tpu.memory_space<vmem>>, vector<1x1x32xf32>
    %339 = vector.shape_cast %338 : vector<1x1x32xf32> to vector<1x32xf32>
    %340 = vector.broadcast %339 : vector<1x32xf32> to vector<10x32xf32>
    %341 = arith.addf %337, %340 : vector<10x32xf32>
    %342 = arith.addf %314, %341 : vector<10x32xf32>
    %c1_151 = arith.constant 1 : index
    %c0_152 = arith.constant 0 : index
    %c0_153 = arith.constant 0 : index
    %343 = vector.load %arg17[%c1_151, %c0_152, %c0_153] : memref<2x1x32xf32, #tpu.memory_space<vmem>>, vector<1x1x32xf32>
    %344 = vector.shape_cast %343 : vector<1x1x32xf32> to vector<1x32xf32>
    %c1_154 = arith.constant 1 : index
    %c0_155 = arith.constant 0 : index
    %c0_156 = arith.constant 0 : index
    %345 = vector.load %arg18[%c1_154, %c0_155, %c0_156] : memref<2x1x32xf32, #tpu.memory_space<vmem>>, vector<1x1x32xf32>
    %346 = vector.shape_cast %345 : vector<1x1x32xf32> to vector<1x32xf32>
    %cst_157 = arith.constant dense<0.000000e+00> : vector<10xf32>
    %347 = vector.multi_reduction <add>, %342, %cst_157 [1] : vector<10x32xf32> to vector<10xf32>
    %348 = vector.shape_cast %347 : vector<10xf32> to vector<10x1xf32>
    %cst_158 = arith.constant 3.200000e+01 : f32
    %349 = vector.broadcast %cst_158 : f32 to vector<10x1xf32>
    %350 = arith.divf %348, %349 : vector<10x1xf32>
    %351 = vector.broadcast %350 : vector<10x1xf32> to vector<10x32xf32>
    %352 = arith.subf %342, %351 : vector<10x32xf32>
    %353 = arith.mulf %352, %352 : vector<10x32xf32>
    %cst_159 = arith.constant dense<0.000000e+00> : vector<10xf32>
    %354 = vector.multi_reduction <add>, %353, %cst_159 [1] : vector<10x32xf32> to vector<10xf32>
    %355 = vector.shape_cast %354 : vector<10xf32> to vector<10x1xf32>
    %cst_160 = arith.constant 3.200000e+01 : f32
    %356 = vector.broadcast %cst_160 : f32 to vector<10x1xf32>
    %357 = arith.divf %355, %356 : vector<10x1xf32>
    %cst_161 = arith.constant 9.99999996E-13 : f32
    %358 = vector.broadcast %cst_161 : f32 to vector<10x1xf32>
    %359 = arith.addf %357, %358 : vector<10x1xf32>
    %360 = math.rsqrt %359 : vector<10x1xf32>
    %361 = vector.broadcast %360 : vector<10x1xf32> to vector<10x32xf32>
    %362 = arith.mulf %352, %361 : vector<10x32xf32>
    %363 = vector.broadcast %344 : vector<1x32xf32> to vector<10x32xf32>
    %364 = arith.mulf %362, %363 : vector<10x32xf32>
    %365 = vector.broadcast %346 : vector<1x32xf32> to vector<10x32xf32>
    %366 = arith.addf %364, %365 : vector<10x32xf32>
    %c0_162 = arith.constant 0 : index
    %c0_163 = arith.constant 0 : index
    %c0_164 = arith.constant 0 : index
    %367 = vector.load %arg3[%c0_162, %c0_163, %c0_164] : memref<1x8x32xf32, #tpu.memory_space<vmem>>, vector<1x8x32xf32>
    %368 = vector.shape_cast %367 : vector<1x8x32xf32> to vector<8x32xf32>
    %c0_165 = arith.constant 0 : index
    %c0_166 = arith.constant 0 : index
    %c0_167 = arith.constant 0 : index
    %369 = vector.load %arg4[%c0_165, %c0_166, %c0_167] : memref<1x1x8xi32, #tpu.memory_space<vmem>>, vector<1x1x8xi32>
    %370 = vector.shape_cast %369 : vector<1x1x8xi32> to vector<1x8xi32>
    %c0_i32_168 = arith.constant 0 : i32
    %371 = vector.broadcast %c0_i32_168 : i32 to vector<1x8xi32>
    %372 = arith.cmpi eq, %370, %371 : vector<1x8xi32>
    %cst_169 = arith.constant -1.000000e+30 : f32
    %cst_170 = arith.constant 0.000000e+00 : f32
    %373 = vector.broadcast %cst_169 : f32 to vector<1x8xf32>
    %374 = vector.broadcast %cst_170 : f32 to vector<1x8xf32>
    %375 = arith.select %372, %373, %374 : vector<1x8xi1>, vector<1x8xf32>
    %376 = tpu.iota {dimensions = array<i32: 0>} : vector<8x8xi32>
    %377 = tpu.iota {dimensions = array<i32: 1>} : vector<8x8xi32>
    %378 = arith.cmpi sgt, %377, %376 : vector<8x8xi32>
    %cst_171 = arith.constant -1.000000e+30 : f32
    %cst_172 = arith.constant 0.000000e+00 : f32
    %379 = vector.broadcast %cst_171 : f32 to vector<8x8xf32>
    %380 = vector.broadcast %cst_172 : f32 to vector<8x8xf32>
    %381 = arith.select %378, %379, %380 : vector<8x8xi1>, vector<8x8xf32>
    %382 = vector.shape_cast %375 : vector<1x8xf32> to vector<1x8xf32>
    %383 = vector.broadcast %382 : vector<1x8xf32> to vector<8x8xf32>
    %384 = arith.addf %381, %383 : vector<8x8xf32>
    %385 = vector.shape_cast %30 : vector<1x10xf32> to vector<1x10xf32>
    %386 = vector.broadcast %385 : vector<1x10xf32> to vector<8x10xf32>
    %c0_173 = arith.constant 0 : index
    %c0_174 = arith.constant 0 : index
    %c0_175 = arith.constant 0 : index
    %387 = vector.load %arg19[%c0_173, %c0_174, %c0_175] : memref<2x1x32xf32, #tpu.memory_space<vmem>>, vector<1x1x32xf32>
    %388 = vector.shape_cast %387 : vector<1x1x32xf32> to vector<1x32xf32>
    %c0_176 = arith.constant 0 : index
    %c0_177 = arith.constant 0 : index
    %c0_178 = arith.constant 0 : index
    %389 = vector.load %arg20[%c0_176, %c0_177, %c0_178] : memref<2x1x32xf32, #tpu.memory_space<vmem>>, vector<1x1x32xf32>
    %390 = vector.shape_cast %389 : vector<1x1x32xf32> to vector<1x32xf32>
    %cst_179 = arith.constant dense<0.000000e+00> : vector<8xf32>
    %391 = vector.multi_reduction <add>, %368, %cst_179 [1] : vector<8x32xf32> to vector<8xf32>
    %392 = vector.shape_cast %391 : vector<8xf32> to vector<8x1xf32>
    %cst_180 = arith.constant 3.200000e+01 : f32
    %393 = vector.broadcast %cst_180 : f32 to vector<8x1xf32>
    %394 = arith.divf %392, %393 : vector<8x1xf32>
    %395 = vector.broadcast %394 : vector<8x1xf32> to vector<8x32xf32>
    %396 = arith.subf %368, %395 : vector<8x32xf32>
    %397 = arith.mulf %396, %396 : vector<8x32xf32>
    %cst_181 = arith.constant dense<0.000000e+00> : vector<8xf32>
    %398 = vector.multi_reduction <add>, %397, %cst_181 [1] : vector<8x32xf32> to vector<8xf32>
    %399 = vector.shape_cast %398 : vector<8xf32> to vector<8x1xf32>
    %cst_182 = arith.constant 3.200000e+01 : f32
    %400 = vector.broadcast %cst_182 : f32 to vector<8x1xf32>
    %401 = arith.divf %399, %400 : vector<8x1xf32>
    %cst_183 = arith.constant 9.99999974E-6 : f32
    %402 = vector.broadcast %cst_183 : f32 to vector<8x1xf32>
    %403 = arith.addf %401, %402 : vector<8x1xf32>
    %404 = math.rsqrt %403 : vector<8x1xf32>
    %405 = vector.broadcast %404 : vector<8x1xf32> to vector<8x32xf32>
    %406 = arith.mulf %396, %405 : vector<8x32xf32>
    %407 = vector.broadcast %388 : vector<1x32xf32> to vector<8x32xf32>
    %408 = arith.mulf %406, %407 : vector<8x32xf32>
    %409 = vector.broadcast %390 : vector<1x32xf32> to vector<8x32xf32>
    %410 = arith.addf %408, %409 : vector<8x32xf32>
    %c0_184 = arith.constant 0 : index
    %c0_185 = arith.constant 0 : index
    %c0_186 = arith.constant 0 : index
    %411 = vector.load %arg21[%c0_184, %c0_185, %c0_186] : memref<2x32x96xf32, #tpu.memory_space<vmem>>, vector<1x32x96xf32>
    %412 = vector.shape_cast %411 : vector<1x32x96xf32> to vector<32x96xf32>
    %cst_187 = arith.constant dense<0.000000e+00> : vector<8x96xf32>
    %413 = tpu.matmul %410, %412, %cst_187 {dimension_numbers = #tpu.dot_dimension_numbers<[1], [0], [0], [1], [0, 0, 1, 1], [], []>} : vector<8x32xf32>, vector<32x96xf32>, vector<8x96xf32> -> vector<8x96xf32>
    %c0_188 = arith.constant 0 : index
    %c0_189 = arith.constant 0 : index
    %c0_190 = arith.constant 0 : index
    %414 = vector.load %arg22[%c0_188, %c0_189, %c0_190] : memref<2x1x96xf32, #tpu.memory_space<vmem>>, vector<1x1x96xf32>
    %415 = vector.shape_cast %414 : vector<1x1x96xf32> to vector<1x96xf32>
    %416 = vector.broadcast %415 : vector<1x96xf32> to vector<8x96xf32>
    %417 = arith.addf %413, %416 : vector<8x96xf32>
    %418 = vector.extract_strided_slice %417 {offsets = [0, 0], sizes = [8, 32], strides = [1, 1]} : vector<8x96xf32> to vector<8x32xf32>
    %419 = vector.extract_strided_slice %417 {offsets = [0, 32], sizes = [8, 32], strides = [1, 1]} : vector<8x96xf32> to vector<8x32xf32>
    %420 = vector.extract_strided_slice %417 {offsets = [0, 64], sizes = [8, 32], strides = [1, 1]} : vector<8x96xf32> to vector<8x32xf32>
    %c0_191 = arith.constant 0 : index
    %c0_192 = arith.constant 0 : index
    %c0_193 = arith.constant 0 : index
    %421 = vector.load %arg23[%c0_191, %c0_192, %c0_193] : memref<2x32x32xf32, #tpu.memory_space<vmem>>, vector<1x32x32xf32>
    %422 = vector.shape_cast %421 : vector<1x32x32xf32> to vector<32x32xf32>
    %c0_194 = arith.constant 0 : index
    %c0_195 = arith.constant 0 : index
    %c0_196 = arith.constant 0 : index
    %423 = vector.load %arg24[%c0_194, %c0_195, %c0_196] : memref<2x1x32xf32, #tpu.memory_space<vmem>>, vector<1x1x32xf32>
    %424 = vector.shape_cast %423 : vector<1x1x32xf32> to vector<1x32xf32>
    %425 = vector.extract_strided_slice %418 {offsets = [0, 0], sizes = [8, 8], strides = [1, 1]} : vector<8x32xf32> to vector<8x8xf32>
    %cst_197 = arith.constant 0.353553385 : f32
    %426 = vector.broadcast %cst_197 : f32 to vector<8x8xf32>
    %427 = arith.mulf %425, %426 : vector<8x8xf32>
    %428 = vector.extract_strided_slice %419 {offsets = [0, 0], sizes = [8, 8], strides = [1, 1]} : vector<8x32xf32> to vector<8x8xf32>
    %429 = vector.extract_strided_slice %420 {offsets = [0, 0], sizes = [8, 8], strides = [1, 1]} : vector<8x32xf32> to vector<8x8xf32>
    %cst_198 = arith.constant dense<0.000000e+00> : vector<8x8xf32>
    %430 = tpu.matmul %427, %428, %cst_198 {dimension_numbers = #tpu.dot_dimension_numbers<[1], [1], [0], [0], [0, 0, 1, 0], [], []>} : vector<8x8xf32>, vector<8x8xf32>, vector<8x8xf32> -> vector<8x8xf32>
    %431 = arith.addf %430, %384 : vector<8x8xf32>
    %cst_199 = arith.constant dense<0xFF800000> : vector<8xf32>
    %432 = vector.multi_reduction <maximumf>, %431, %cst_199 [1] : vector<8x8xf32> to vector<8xf32>
    %433 = vector.shape_cast %432 : vector<8xf32> to vector<8x1xf32>
    %434 = vector.broadcast %433 : vector<8x1xf32> to vector<8x8xf32>
    %435 = arith.subf %431, %434 : vector<8x8xf32>
    %436 = math.exp %435 : vector<8x8xf32>
    %cst_200 = arith.constant dense<0.000000e+00> : vector<8xf32>
    %437 = vector.multi_reduction <add>, %436, %cst_200 [1] : vector<8x8xf32> to vector<8xf32>
    %438 = vector.shape_cast %437 : vector<8xf32> to vector<8x1xf32>
    %cst_201 = arith.constant dense<0.000000e+00> : vector<8x8xf32>
    %439 = tpu.matmul %436, %429, %cst_201 {dimension_numbers = #tpu.dot_dimension_numbers<[1], [0], [0], [1], [0, 0, 1, 1], [], []>} : vector<8x8xf32>, vector<8x8xf32>, vector<8x8xf32> -> vector<8x8xf32>
    %440 = tpu.reciprocal %438 {approx = true} : vector<8x1xf32> -> vector<8x1xf32>
    %441 = vector.broadcast %440 : vector<8x1xf32> to vector<8x8xf32>
    %442 = arith.mulf %439, %441 : vector<8x8xf32>
    %443 = vector.extract_strided_slice %418 {offsets = [0, 8], sizes = [8, 8], strides = [1, 1]} : vector<8x32xf32> to vector<8x8xf32>
    %cst_202 = arith.constant 0.353553385 : f32
    %444 = vector.broadcast %cst_202 : f32 to vector<8x8xf32>
    %445 = arith.mulf %443, %444 : vector<8x8xf32>
    %446 = vector.extract_strided_slice %419 {offsets = [0, 8], sizes = [8, 8], strides = [1, 1]} : vector<8x32xf32> to vector<8x8xf32>
    %447 = vector.extract_strided_slice %420 {offsets = [0, 8], sizes = [8, 8], strides = [1, 1]} : vector<8x32xf32> to vector<8x8xf32>
    %cst_203 = arith.constant dense<0.000000e+00> : vector<8x8xf32>
    %448 = tpu.matmul %445, %446, %cst_203 {dimension_numbers = #tpu.dot_dimension_numbers<[1], [1], [0], [0], [0, 0, 1, 0], [], []>} : vector<8x8xf32>, vector<8x8xf32>, vector<8x8xf32> -> vector<8x8xf32>
    %449 = arith.addf %448, %384 : vector<8x8xf32>
    %cst_204 = arith.constant dense<0xFF800000> : vector<8xf32>
    %450 = vector.multi_reduction <maximumf>, %449, %cst_204 [1] : vector<8x8xf32> to vector<8xf32>
    %451 = vector.shape_cast %450 : vector<8xf32> to vector<8x1xf32>
    %452 = vector.broadcast %451 : vector<8x1xf32> to vector<8x8xf32>
    %453 = arith.subf %449, %452 : vector<8x8xf32>
    %454 = math.exp %453 : vector<8x8xf32>
    %cst_205 = arith.constant dense<0.000000e+00> : vector<8xf32>
    %455 = vector.multi_reduction <add>, %454, %cst_205 [1] : vector<8x8xf32> to vector<8xf32>
    %456 = vector.shape_cast %455 : vector<8xf32> to vector<8x1xf32>
    %cst_206 = arith.constant dense<0.000000e+00> : vector<8x8xf32>
    %457 = tpu.matmul %454, %447, %cst_206 {dimension_numbers = #tpu.dot_dimension_numbers<[1], [0], [0], [1], [0, 0, 1, 1], [], []>} : vector<8x8xf32>, vector<8x8xf32>, vector<8x8xf32> -> vector<8x8xf32>
    %458 = tpu.reciprocal %456 {approx = true} : vector<8x1xf32> -> vector<8x1xf32>
    %459 = vector.broadcast %458 : vector<8x1xf32> to vector<8x8xf32>
    %460 = arith.mulf %457, %459 : vector<8x8xf32>
    %461 = vector.extract_strided_slice %418 {offsets = [0, 16], sizes = [8, 8], strides = [1, 1]} : vector<8x32xf32> to vector<8x8xf32>
    %cst_207 = arith.constant 0.353553385 : f32
    %462 = vector.broadcast %cst_207 : f32 to vector<8x8xf32>
    %463 = arith.mulf %461, %462 : vector<8x8xf32>
    %464 = vector.extract_strided_slice %419 {offsets = [0, 16], sizes = [8, 8], strides = [1, 1]} : vector<8x32xf32> to vector<8x8xf32>
    %465 = vector.extract_strided_slice %420 {offsets = [0, 16], sizes = [8, 8], strides = [1, 1]} : vector<8x32xf32> to vector<8x8xf32>
    %cst_208 = arith.constant dense<0.000000e+00> : vector<8x8xf32>
    %466 = tpu.matmul %463, %464, %cst_208 {dimension_numbers = #tpu.dot_dimension_numbers<[1], [1], [0], [0], [0, 0, 1, 0], [], []>} : vector<8x8xf32>, vector<8x8xf32>, vector<8x8xf32> -> vector<8x8xf32>
    %467 = arith.addf %466, %384 : vector<8x8xf32>
    %cst_209 = arith.constant dense<0xFF800000> : vector<8xf32>
    %468 = vector.multi_reduction <maximumf>, %467, %cst_209 [1] : vector<8x8xf32> to vector<8xf32>
    %469 = vector.shape_cast %468 : vector<8xf32> to vector<8x1xf32>
    %470 = vector.broadcast %469 : vector<8x1xf32> to vector<8x8xf32>
    %471 = arith.subf %467, %470 : vector<8x8xf32>
    %472 = math.exp %471 : vector<8x8xf32>
    %cst_210 = arith.constant dense<0.000000e+00> : vector<8xf32>
    %473 = vector.multi_reduction <add>, %472, %cst_210 [1] : vector<8x8xf32> to vector<8xf32>
    %474 = vector.shape_cast %473 : vector<8xf32> to vector<8x1xf32>
    %cst_211 = arith.constant dense<0.000000e+00> : vector<8x8xf32>
    %475 = tpu.matmul %472, %465, %cst_211 {dimension_numbers = #tpu.dot_dimension_numbers<[1], [0], [0], [1], [0, 0, 1, 1], [], []>} : vector<8x8xf32>, vector<8x8xf32>, vector<8x8xf32> -> vector<8x8xf32>
    %476 = tpu.reciprocal %474 {approx = true} : vector<8x1xf32> -> vector<8x1xf32>
    %477 = vector.broadcast %476 : vector<8x1xf32> to vector<8x8xf32>
    %478 = arith.mulf %475, %477 : vector<8x8xf32>
    %479 = vector.extract_strided_slice %418 {offsets = [0, 24], sizes = [8, 8], strides = [1, 1]} : vector<8x32xf32> to vector<8x8xf32>
    %cst_212 = arith.constant 0.353553385 : f32
    %480 = vector.broadcast %cst_212 : f32 to vector<8x8xf32>
    %481 = arith.mulf %479, %480 : vector<8x8xf32>
    %482 = vector.extract_strided_slice %419 {offsets = [0, 24], sizes = [8, 8], strides = [1, 1]} : vector<8x32xf32> to vector<8x8xf32>
    %483 = vector.extract_strided_slice %420 {offsets = [0, 24], sizes = [8, 8], strides = [1, 1]} : vector<8x32xf32> to vector<8x8xf32>
    %cst_213 = arith.constant dense<0.000000e+00> : vector<8x8xf32>
    %484 = tpu.matmul %481, %482, %cst_213 {dimension_numbers = #tpu.dot_dimension_numbers<[1], [1], [0], [0], [0, 0, 1, 0], [], []>} : vector<8x8xf32>, vector<8x8xf32>, vector<8x8xf32> -> vector<8x8xf32>
    %485 = arith.addf %484, %384 : vector<8x8xf32>
    %cst_214 = arith.constant dense<0xFF800000> : vector<8xf32>
    %486 = vector.multi_reduction <maximumf>, %485, %cst_214 [1] : vector<8x8xf32> to vector<8xf32>
    %487 = vector.shape_cast %486 : vector<8xf32> to vector<8x1xf32>
    %488 = vector.broadcast %487 : vector<8x1xf32> to vector<8x8xf32>
    %489 = arith.subf %485, %488 : vector<8x8xf32>
    %490 = math.exp %489 : vector<8x8xf32>
    %cst_215 = arith.constant dense<0.000000e+00> : vector<8xf32>
    %491 = vector.multi_reduction <add>, %490, %cst_215 [1] : vector<8x8xf32> to vector<8xf32>
    %492 = vector.shape_cast %491 : vector<8xf32> to vector<8x1xf32>
    %cst_216 = arith.constant dense<0.000000e+00> : vector<8x8xf32>
    %493 = tpu.matmul %490, %483, %cst_216 {dimension_numbers = #tpu.dot_dimension_numbers<[1], [0], [0], [1], [0, 0, 1, 1], [], []>} : vector<8x8xf32>, vector<8x8xf32>, vector<8x8xf32> -> vector<8x8xf32>
    %494 = tpu.reciprocal %492 {approx = true} : vector<8x1xf32> -> vector<8x1xf32>
    %495 = vector.broadcast %494 : vector<8x1xf32> to vector<8x8xf32>
    %496 = arith.mulf %493, %495 : vector<8x8xf32>
    %497 = tpu.concatenate %442, %460, %478, %496 in 1 : vector<8x8xf32>, vector<8x8xf32>, vector<8x8xf32>, vector<8x8xf32> -> vector<8x32xf32>
    %cst_217 = arith.constant dense<0.000000e+00> : vector<8x32xf32>
    %498 = tpu.matmul %497, %422, %cst_217 {dimension_numbers = #tpu.dot_dimension_numbers<[1], [0], [0], [1], [0, 0, 1, 1], [], []>} : vector<8x32xf32>, vector<32x32xf32>, vector<8x32xf32> -> vector<8x32xf32>
    %499 = vector.broadcast %424 : vector<1x32xf32> to vector<8x32xf32>
    %500 = arith.addf %498, %499 : vector<8x32xf32>
    %501 = arith.addf %368, %500 : vector<8x32xf32>
    %c0_218 = arith.constant 0 : index
    %c0_219 = arith.constant 0 : index
    %c0_220 = arith.constant 0 : index
    %502 = vector.load %arg25[%c0_218, %c0_219, %c0_220] : memref<2x1x32xf32, #tpu.memory_space<vmem>>, vector<1x1x32xf32>
    %503 = vector.shape_cast %502 : vector<1x1x32xf32> to vector<1x32xf32>
    %c0_221 = arith.constant 0 : index
    %c0_222 = arith.constant 0 : index
    %c0_223 = arith.constant 0 : index
    %504 = vector.load %arg26[%c0_221, %c0_222, %c0_223] : memref<2x1x32xf32, #tpu.memory_space<vmem>>, vector<1x1x32xf32>
    %505 = vector.shape_cast %504 : vector<1x1x32xf32> to vector<1x32xf32>
    %cst_224 = arith.constant dense<0.000000e+00> : vector<8xf32>
    %506 = vector.multi_reduction <add>, %501, %cst_224 [1] : vector<8x32xf32> to vector<8xf32>
    %507 = vector.shape_cast %506 : vector<8xf32> to vector<8x1xf32>
    %cst_225 = arith.constant 3.200000e+01 : f32
    %508 = vector.broadcast %cst_225 : f32 to vector<8x1xf32>
    %509 = arith.divf %507, %508 : vector<8x1xf32>
    %510 = vector.broadcast %509 : vector<8x1xf32> to vector<8x32xf32>
    %511 = arith.subf %501, %510 : vector<8x32xf32>
    %512 = arith.mulf %511, %511 : vector<8x32xf32>
    %cst_226 = arith.constant dense<0.000000e+00> : vector<8xf32>
    %513 = vector.multi_reduction <add>, %512, %cst_226 [1] : vector<8x32xf32> to vector<8xf32>
    %514 = vector.shape_cast %513 : vector<8xf32> to vector<8x1xf32>
    %cst_227 = arith.constant 3.200000e+01 : f32
    %515 = vector.broadcast %cst_227 : f32 to vector<8x1xf32>
    %516 = arith.divf %514, %515 : vector<8x1xf32>
    %cst_228 = arith.constant 9.99999974E-6 : f32
    %517 = vector.broadcast %cst_228 : f32 to vector<8x1xf32>
    %518 = arith.addf %516, %517 : vector<8x1xf32>
    %519 = math.rsqrt %518 : vector<8x1xf32>
    %520 = vector.broadcast %519 : vector<8x1xf32> to vector<8x32xf32>
    %521 = arith.mulf %511, %520 : vector<8x32xf32>
    %522 = vector.broadcast %503 : vector<1x32xf32> to vector<8x32xf32>
    %523 = arith.mulf %521, %522 : vector<8x32xf32>
    %524 = vector.broadcast %505 : vector<1x32xf32> to vector<8x32xf32>
    %525 = arith.addf %523, %524 : vector<8x32xf32>
    %c0_229 = arith.constant 0 : index
    %c0_230 = arith.constant 0 : index
    %c0_231 = arith.constant 0 : index
    %526 = vector.load %arg27[%c0_229, %c0_230, %c0_231] : memref<2x32x32xf32, #tpu.memory_space<vmem>>, vector<1x32x32xf32>
    %527 = vector.shape_cast %526 : vector<1x32x32xf32> to vector<32x32xf32>
    %cst_232 = arith.constant dense<0.000000e+00> : vector<8x32xf32>
    %528 = tpu.matmul %525, %527, %cst_232 {dimension_numbers = #tpu.dot_dimension_numbers<[1], [0], [0], [1], [0, 0, 1, 1], [], []>} : vector<8x32xf32>, vector<32x32xf32>, vector<8x32xf32> -> vector<8x32xf32>
    %c0_233 = arith.constant 0 : index
    %c0_234 = arith.constant 0 : index
    %c0_235 = arith.constant 0 : index
    %529 = vector.load %arg28[%c0_233, %c0_234, %c0_235] : memref<2x1x32xf32, #tpu.memory_space<vmem>>, vector<1x1x32xf32>
    %530 = vector.shape_cast %529 : vector<1x1x32xf32> to vector<1x32xf32>
    %531 = vector.broadcast %530 : vector<1x32xf32> to vector<8x32xf32>
    %532 = arith.addf %528, %531 : vector<8x32xf32>
    %c0_236 = arith.constant 0 : index
    %c0_237 = arith.constant 0 : index
    %c0_238 = arith.constant 0 : index
    %533 = vector.load %arg29[%c0_236, %c0_237, %c0_238] : memref<2x32x64xf32, #tpu.memory_space<vmem>>, vector<1x32x64xf32>
    %534 = vector.shape_cast %533 : vector<1x32x64xf32> to vector<32x64xf32>
    %cst_239 = arith.constant dense<0.000000e+00> : vector<10x64xf32>
    %535 = tpu.matmul %366, %534, %cst_239 {dimension_numbers = #tpu.dot_dimension_numbers<[1], [0], [0], [1], [0, 0, 1, 1], [], []>} : vector<10x32xf32>, vector<32x64xf32>, vector<10x64xf32> -> vector<10x64xf32>
    %c0_240 = arith.constant 0 : index
    %c0_241 = arith.constant 0 : index
    %c0_242 = arith.constant 0 : index
    %536 = vector.load %arg30[%c0_240, %c0_241, %c0_242] : memref<2x1x64xf32, #tpu.memory_space<vmem>>, vector<1x1x64xf32>
    %537 = vector.shape_cast %536 : vector<1x1x64xf32> to vector<1x64xf32>
    %538 = vector.broadcast %537 : vector<1x64xf32> to vector<10x64xf32>
    %539 = arith.addf %535, %538 : vector<10x64xf32>
    %540 = vector.extract_strided_slice %539 {offsets = [0, 0], sizes = [10, 32], strides = [1, 1]} : vector<10x64xf32> to vector<10x32xf32>
    %541 = vector.extract_strided_slice %539 {offsets = [0, 32], sizes = [10, 32], strides = [1, 1]} : vector<10x64xf32> to vector<10x32xf32>
    %c0_243 = arith.constant 0 : index
    %c0_244 = arith.constant 0 : index
    %c0_245 = arith.constant 0 : index
    %542 = vector.load %arg31[%c0_243, %c0_244, %c0_245] : memref<2x32x32xf32, #tpu.memory_space<vmem>>, vector<1x32x32xf32>
    %543 = vector.shape_cast %542 : vector<1x32x32xf32> to vector<32x32xf32>
    %c0_246 = arith.constant 0 : index
    %c0_247 = arith.constant 0 : index
    %c0_248 = arith.constant 0 : index
    %544 = vector.load %arg32[%c0_246, %c0_247, %c0_248] : memref<2x1x32xf32, #tpu.memory_space<vmem>>, vector<1x1x32xf32>
    %545 = vector.shape_cast %544 : vector<1x1x32xf32> to vector<1x32xf32>
    %546 = vector.extract_strided_slice %532 {offsets = [0, 0], sizes = [8, 8], strides = [1, 1]} : vector<8x32xf32> to vector<8x8xf32>
    %cst_249 = arith.constant 0.353553385 : f32
    %547 = vector.broadcast %cst_249 : f32 to vector<8x8xf32>
    %548 = arith.mulf %546, %547 : vector<8x8xf32>
    %549 = vector.extract_strided_slice %540 {offsets = [0, 0], sizes = [10, 8], strides = [1, 1]} : vector<10x32xf32> to vector<10x8xf32>
    %550 = vector.extract_strided_slice %541 {offsets = [0, 0], sizes = [10, 8], strides = [1, 1]} : vector<10x32xf32> to vector<10x8xf32>
    %cst_250 = arith.constant dense<0.000000e+00> : vector<8x10xf32>
    %551 = tpu.matmul %548, %549, %cst_250 {dimension_numbers = #tpu.dot_dimension_numbers<[1], [1], [0], [0], [0, 0, 1, 0], [], []>} : vector<8x8xf32>, vector<10x8xf32>, vector<8x10xf32> -> vector<8x10xf32>
    %552 = arith.addf %551, %386 : vector<8x10xf32>
    %cst_251 = arith.constant dense<0xFF800000> : vector<8xf32>
    %553 = vector.multi_reduction <maximumf>, %552, %cst_251 [1] : vector<8x10xf32> to vector<8xf32>
    %554 = vector.shape_cast %553 : vector<8xf32> to vector<8x1xf32>
    %555 = vector.broadcast %554 : vector<8x1xf32> to vector<8x10xf32>
    %556 = arith.subf %552, %555 : vector<8x10xf32>
    %557 = math.exp %556 : vector<8x10xf32>
    %cst_252 = arith.constant dense<0.000000e+00> : vector<8xf32>
    %558 = vector.multi_reduction <add>, %557, %cst_252 [1] : vector<8x10xf32> to vector<8xf32>
    %559 = vector.shape_cast %558 : vector<8xf32> to vector<8x1xf32>
    %cst_253 = arith.constant dense<0.000000e+00> : vector<8x8xf32>
    %560 = tpu.matmul %557, %550, %cst_253 {dimension_numbers = #tpu.dot_dimension_numbers<[1], [0], [0], [1], [0, 0, 1, 1], [], []>} : vector<8x10xf32>, vector<10x8xf32>, vector<8x8xf32> -> vector<8x8xf32>
    %561 = tpu.reciprocal %559 {approx = true} : vector<8x1xf32> -> vector<8x1xf32>
    %562 = vector.broadcast %561 : vector<8x1xf32> to vector<8x8xf32>
    %563 = arith.mulf %560, %562 : vector<8x8xf32>
    %564 = vector.extract_strided_slice %532 {offsets = [0, 8], sizes = [8, 8], strides = [1, 1]} : vector<8x32xf32> to vector<8x8xf32>
    %cst_254 = arith.constant 0.353553385 : f32
    %565 = vector.broadcast %cst_254 : f32 to vector<8x8xf32>
    %566 = arith.mulf %564, %565 : vector<8x8xf32>
    %567 = vector.extract_strided_slice %540 {offsets = [0, 8], sizes = [10, 8], strides = [1, 1]} : vector<10x32xf32> to vector<10x8xf32>
    %568 = vector.extract_strided_slice %541 {offsets = [0, 8], sizes = [10, 8], strides = [1, 1]} : vector<10x32xf32> to vector<10x8xf32>
    %cst_255 = arith.constant dense<0.000000e+00> : vector<8x10xf32>
    %569 = tpu.matmul %566, %567, %cst_255 {dimension_numbers = #tpu.dot_dimension_numbers<[1], [1], [0], [0], [0, 0, 1, 0], [], []>} : vector<8x8xf32>, vector<10x8xf32>, vector<8x10xf32> -> vector<8x10xf32>
    %570 = arith.addf %569, %386 : vector<8x10xf32>
    %cst_256 = arith.constant dense<0xFF800000> : vector<8xf32>
    %571 = vector.multi_reduction <maximumf>, %570, %cst_256 [1] : vector<8x10xf32> to vector<8xf32>
    %572 = vector.shape_cast %571 : vector<8xf32> to vector<8x1xf32>
    %573 = vector.broadcast %572 : vector<8x1xf32> to vector<8x10xf32>
    %574 = arith.subf %570, %573 : vector<8x10xf32>
    %575 = math.exp %574 : vector<8x10xf32>
    %cst_257 = arith.constant dense<0.000000e+00> : vector<8xf32>
    %576 = vector.multi_reduction <add>, %575, %cst_257 [1] : vector<8x10xf32> to vector<8xf32>
    %577 = vector.shape_cast %576 : vector<8xf32> to vector<8x1xf32>
    %cst_258 = arith.constant dense<0.000000e+00> : vector<8x8xf32>
    %578 = tpu.matmul %575, %568, %cst_258 {dimension_numbers = #tpu.dot_dimension_numbers<[1], [0], [0], [1], [0, 0, 1, 1], [], []>} : vector<8x10xf32>, vector<10x8xf32>, vector<8x8xf32> -> vector<8x8xf32>
    %579 = tpu.reciprocal %577 {approx = true} : vector<8x1xf32> -> vector<8x1xf32>
    %580 = vector.broadcast %579 : vector<8x1xf32> to vector<8x8xf32>
    %581 = arith.mulf %578, %580 : vector<8x8xf32>
    %582 = vector.extract_strided_slice %532 {offsets = [0, 16], sizes = [8, 8], strides = [1, 1]} : vector<8x32xf32> to vector<8x8xf32>
    %cst_259 = arith.constant 0.353553385 : f32
    %583 = vector.broadcast %cst_259 : f32 to vector<8x8xf32>
    %584 = arith.mulf %582, %583 : vector<8x8xf32>
    %585 = vector.extract_strided_slice %540 {offsets = [0, 16], sizes = [10, 8], strides = [1, 1]} : vector<10x32xf32> to vector<10x8xf32>
    %586 = vector.extract_strided_slice %541 {offsets = [0, 16], sizes = [10, 8], strides = [1, 1]} : vector<10x32xf32> to vector<10x8xf32>
    %cst_260 = arith.constant dense<0.000000e+00> : vector<8x10xf32>
    %587 = tpu.matmul %584, %585, %cst_260 {dimension_numbers = #tpu.dot_dimension_numbers<[1], [1], [0], [0], [0, 0, 1, 0], [], []>} : vector<8x8xf32>, vector<10x8xf32>, vector<8x10xf32> -> vector<8x10xf32>
    %588 = arith.addf %587, %386 : vector<8x10xf32>
    %cst_261 = arith.constant dense<0xFF800000> : vector<8xf32>
    %589 = vector.multi_reduction <maximumf>, %588, %cst_261 [1] : vector<8x10xf32> to vector<8xf32>
    %590 = vector.shape_cast %589 : vector<8xf32> to vector<8x1xf32>
    %591 = vector.broadcast %590 : vector<8x1xf32> to vector<8x10xf32>
    %592 = arith.subf %588, %591 : vector<8x10xf32>
    %593 = math.exp %592 : vector<8x10xf32>
    %cst_262 = arith.constant dense<0.000000e+00> : vector<8xf32>
    %594 = vector.multi_reduction <add>, %593, %cst_262 [1] : vector<8x10xf32> to vector<8xf32>
    %595 = vector.shape_cast %594 : vector<8xf32> to vector<8x1xf32>
    %cst_263 = arith.constant dense<0.000000e+00> : vector<8x8xf32>
    %596 = tpu.matmul %593, %586, %cst_263 {dimension_numbers = #tpu.dot_dimension_numbers<[1], [0], [0], [1], [0, 0, 1, 1], [], []>} : vector<8x10xf32>, vector<10x8xf32>, vector<8x8xf32> -> vector<8x8xf32>
    %597 = tpu.reciprocal %595 {approx = true} : vector<8x1xf32> -> vector<8x1xf32>
    %598 = vector.broadcast %597 : vector<8x1xf32> to vector<8x8xf32>
    %599 = arith.mulf %596, %598 : vector<8x8xf32>
    %600 = vector.extract_strided_slice %532 {offsets = [0, 24], sizes = [8, 8], strides = [1, 1]} : vector<8x32xf32> to vector<8x8xf32>
    %cst_264 = arith.constant 0.353553385 : f32
    %601 = vector.broadcast %cst_264 : f32 to vector<8x8xf32>
    %602 = arith.mulf %600, %601 : vector<8x8xf32>
    %603 = vector.extract_strided_slice %540 {offsets = [0, 24], sizes = [10, 8], strides = [1, 1]} : vector<10x32xf32> to vector<10x8xf32>
    %604 = vector.extract_strided_slice %541 {offsets = [0, 24], sizes = [10, 8], strides = [1, 1]} : vector<10x32xf32> to vector<10x8xf32>
    %cst_265 = arith.constant dense<0.000000e+00> : vector<8x10xf32>
    %605 = tpu.matmul %602, %603, %cst_265 {dimension_numbers = #tpu.dot_dimension_numbers<[1], [1], [0], [0], [0, 0, 1, 0], [], []>} : vector<8x8xf32>, vector<10x8xf32>, vector<8x10xf32> -> vector<8x10xf32>
    %606 = arith.addf %605, %386 : vector<8x10xf32>
    %cst_266 = arith.constant dense<0xFF800000> : vector<8xf32>
    %607 = vector.multi_reduction <maximumf>, %606, %cst_266 [1] : vector<8x10xf32> to vector<8xf32>
    %608 = vector.shape_cast %607 : vector<8xf32> to vector<8x1xf32>
    %609 = vector.broadcast %608 : vector<8x1xf32> to vector<8x10xf32>
    %610 = arith.subf %606, %609 : vector<8x10xf32>
    %611 = math.exp %610 : vector<8x10xf32>
    %cst_267 = arith.constant dense<0.000000e+00> : vector<8xf32>
    %612 = vector.multi_reduction <add>, %611, %cst_267 [1] : vector<8x10xf32> to vector<8xf32>
    %613 = vector.shape_cast %612 : vector<8xf32> to vector<8x1xf32>
    %cst_268 = arith.constant dense<0.000000e+00> : vector<8x8xf32>
    %614 = tpu.matmul %611, %604, %cst_268 {dimension_numbers = #tpu.dot_dimension_numbers<[1], [0], [0], [1], [0, 0, 1, 1], [], []>} : vector<8x10xf32>, vector<10x8xf32>, vector<8x8xf32> -> vector<8x8xf32>
    %615 = tpu.reciprocal %613 {approx = true} : vector<8x1xf32> -> vector<8x1xf32>
    %616 = vector.broadcast %615 : vector<8x1xf32> to vector<8x8xf32>
    %617 = arith.mulf %614, %616 : vector<8x8xf32>
    %618 = tpu.concatenate %563, %581, %599, %617 in 1 : vector<8x8xf32>, vector<8x8xf32>, vector<8x8xf32>, vector<8x8xf32> -> vector<8x32xf32>
    %cst_269 = arith.constant dense<0.000000e+00> : vector<8x32xf32>
    %619 = tpu.matmul %618, %543, %cst_269 {dimension_numbers = #tpu.dot_dimension_numbers<[1], [0], [0], [1], [0, 0, 1, 1], [], []>} : vector<8x32xf32>, vector<32x32xf32>, vector<8x32xf32> -> vector<8x32xf32>
    %620 = vector.broadcast %545 : vector<1x32xf32> to vector<8x32xf32>
    %621 = arith.addf %619, %620 : vector<8x32xf32>
    %622 = arith.addf %501, %621 : vector<8x32xf32>
    %c0_270 = arith.constant 0 : index
    %c0_271 = arith.constant 0 : index
    %c0_272 = arith.constant 0 : index
    %623 = vector.load %arg33[%c0_270, %c0_271, %c0_272] : memref<2x1x32xf32, #tpu.memory_space<vmem>>, vector<1x1x32xf32>
    %624 = vector.shape_cast %623 : vector<1x1x32xf32> to vector<1x32xf32>
    %c0_273 = arith.constant 0 : index
    %c0_274 = arith.constant 0 : index
    %c0_275 = arith.constant 0 : index
    %625 = vector.load %arg34[%c0_273, %c0_274, %c0_275] : memref<2x1x32xf32, #tpu.memory_space<vmem>>, vector<1x1x32xf32>
    %626 = vector.shape_cast %625 : vector<1x1x32xf32> to vector<1x32xf32>
    %cst_276 = arith.constant dense<0.000000e+00> : vector<8xf32>
    %627 = vector.multi_reduction <add>, %622, %cst_276 [1] : vector<8x32xf32> to vector<8xf32>
    %628 = vector.shape_cast %627 : vector<8xf32> to vector<8x1xf32>
    %cst_277 = arith.constant 3.200000e+01 : f32
    %629 = vector.broadcast %cst_277 : f32 to vector<8x1xf32>
    %630 = arith.divf %628, %629 : vector<8x1xf32>
    %631 = vector.broadcast %630 : vector<8x1xf32> to vector<8x32xf32>
    %632 = arith.subf %622, %631 : vector<8x32xf32>
    %633 = arith.mulf %632, %632 : vector<8x32xf32>
    %cst_278 = arith.constant dense<0.000000e+00> : vector<8xf32>
    %634 = vector.multi_reduction <add>, %633, %cst_278 [1] : vector<8x32xf32> to vector<8xf32>
    %635 = vector.shape_cast %634 : vector<8xf32> to vector<8x1xf32>
    %cst_279 = arith.constant 3.200000e+01 : f32
    %636 = vector.broadcast %cst_279 : f32 to vector<8x1xf32>
    %637 = arith.divf %635, %636 : vector<8x1xf32>
    %cst_280 = arith.constant 9.99999974E-6 : f32
    %638 = vector.broadcast %cst_280 : f32 to vector<8x1xf32>
    %639 = arith.addf %637, %638 : vector<8x1xf32>
    %640 = math.rsqrt %639 : vector<8x1xf32>
    %641 = vector.broadcast %640 : vector<8x1xf32> to vector<8x32xf32>
    %642 = arith.mulf %632, %641 : vector<8x32xf32>
    %643 = vector.broadcast %624 : vector<1x32xf32> to vector<8x32xf32>
    %644 = arith.mulf %642, %643 : vector<8x32xf32>
    %645 = vector.broadcast %626 : vector<1x32xf32> to vector<8x32xf32>
    %646 = arith.addf %644, %645 : vector<8x32xf32>
    %c0_281 = arith.constant 0 : index
    %c0_282 = arith.constant 0 : index
    %c0_283 = arith.constant 0 : index
    %647 = vector.load %arg35[%c0_281, %c0_282, %c0_283] : memref<2x32x64xf32, #tpu.memory_space<vmem>>, vector<1x32x64xf32>
    %648 = vector.shape_cast %647 : vector<1x32x64xf32> to vector<32x64xf32>
    %cst_284 = arith.constant dense<0.000000e+00> : vector<8x64xf32>
    %649 = tpu.matmul %646, %648, %cst_284 {dimension_numbers = #tpu.dot_dimension_numbers<[1], [0], [0], [1], [0, 0, 1, 1], [], []>} : vector<8x32xf32>, vector<32x64xf32>, vector<8x64xf32> -> vector<8x64xf32>
    %c0_285 = arith.constant 0 : index
    %c0_286 = arith.constant 0 : index
    %c0_287 = arith.constant 0 : index
    %650 = vector.load %arg36[%c0_285, %c0_286, %c0_287] : memref<2x1x64xf32, #tpu.memory_space<vmem>>, vector<1x1x64xf32>
    %651 = vector.shape_cast %650 : vector<1x1x64xf32> to vector<1x64xf32>
    %652 = vector.broadcast %651 : vector<1x64xf32> to vector<8x64xf32>
    %653 = arith.addf %649, %652 : vector<8x64xf32>
    %cst_288 = arith.constant 0.000000e+00 : f32
    %654 = vector.broadcast %cst_288 : f32 to vector<8x64xf32>
    %655 = arith.maximumf %653, %654 : vector<8x64xf32>
    %c0_289 = arith.constant 0 : index
    %c0_290 = arith.constant 0 : index
    %c0_291 = arith.constant 0 : index
    %656 = vector.load %arg37[%c0_289, %c0_290, %c0_291] : memref<2x64x32xf32, #tpu.memory_space<vmem>>, vector<1x64x32xf32>
    %657 = vector.shape_cast %656 : vector<1x64x32xf32> to vector<64x32xf32>
    %cst_292 = arith.constant dense<0.000000e+00> : vector<8x32xf32>
    %658 = tpu.matmul %655, %657, %cst_292 {dimension_numbers = #tpu.dot_dimension_numbers<[1], [0], [0], [1], [0, 0, 1, 1], [], []>} : vector<8x64xf32>, vector<64x32xf32>, vector<8x32xf32> -> vector<8x32xf32>
    %c0_293 = arith.constant 0 : index
    %c0_294 = arith.constant 0 : index
    %c0_295 = arith.constant 0 : index
    %659 = vector.load %arg38[%c0_293, %c0_294, %c0_295] : memref<2x1x32xf32, #tpu.memory_space<vmem>>, vector<1x1x32xf32>
    %660 = vector.shape_cast %659 : vector<1x1x32xf32> to vector<1x32xf32>
    %661 = vector.broadcast %660 : vector<1x32xf32> to vector<8x32xf32>
    %662 = arith.addf %658, %661 : vector<8x32xf32>
    %663 = arith.addf %622, %662 : vector<8x32xf32>
    %c1_296 = arith.constant 1 : index
    %c0_297 = arith.constant 0 : index
    %c0_298 = arith.constant 0 : index
    %664 = vector.load %arg19[%c1_296, %c0_297, %c0_298] : memref<2x1x32xf32, #tpu.memory_space<vmem>>, vector<1x1x32xf32>
    %665 = vector.shape_cast %664 : vector<1x1x32xf32> to vector<1x32xf32>
    %c1_299 = arith.constant 1 : index
    %c0_300 = arith.constant 0 : index
    %c0_301 = arith.constant 0 : index
    %666 = vector.load %arg20[%c1_299, %c0_300, %c0_301] : memref<2x1x32xf32, #tpu.memory_space<vmem>>, vector<1x1x32xf32>
    %667 = vector.shape_cast %666 : vector<1x1x32xf32> to vector<1x32xf32>
    %cst_302 = arith.constant dense<0.000000e+00> : vector<8xf32>
    %668 = vector.multi_reduction <add>, %663, %cst_302 [1] : vector<8x32xf32> to vector<8xf32>
    %669 = vector.shape_cast %668 : vector<8xf32> to vector<8x1xf32>
    %cst_303 = arith.constant 3.200000e+01 : f32
    %670 = vector.broadcast %cst_303 : f32 to vector<8x1xf32>
    %671 = arith.divf %669, %670 : vector<8x1xf32>
    %672 = vector.broadcast %671 : vector<8x1xf32> to vector<8x32xf32>
    %673 = arith.subf %663, %672 : vector<8x32xf32>
    %674 = arith.mulf %673, %673 : vector<8x32xf32>
    %cst_304 = arith.constant dense<0.000000e+00> : vector<8xf32>
    %675 = vector.multi_reduction <add>, %674, %cst_304 [1] : vector<8x32xf32> to vector<8xf32>
    %676 = vector.shape_cast %675 : vector<8xf32> to vector<8x1xf32>
    %cst_305 = arith.constant 3.200000e+01 : f32
    %677 = vector.broadcast %cst_305 : f32 to vector<8x1xf32>
    %678 = arith.divf %676, %677 : vector<8x1xf32>
    %cst_306 = arith.constant 9.99999974E-6 : f32
    %679 = vector.broadcast %cst_306 : f32 to vector<8x1xf32>
    %680 = arith.addf %678, %679 : vector<8x1xf32>
    %681 = math.rsqrt %680 : vector<8x1xf32>
    %682 = vector.broadcast %681 : vector<8x1xf32> to vector<8x32xf32>
    %683 = arith.mulf %673, %682 : vector<8x32xf32>
    %684 = vector.broadcast %665 : vector<1x32xf32> to vector<8x32xf32>
    %685 = arith.mulf %683, %684 : vector<8x32xf32>
    %686 = vector.broadcast %667 : vector<1x32xf32> to vector<8x32xf32>
    %687 = arith.addf %685, %686 : vector<8x32xf32>
    %c1_307 = arith.constant 1 : index
    %c0_308 = arith.constant 0 : index
    %c0_309 = arith.constant 0 : index
    %688 = vector.load %arg21[%c1_307, %c0_308, %c0_309] : memref<2x32x96xf32, #tpu.memory_space<vmem>>, vector<1x32x96xf32>
    %689 = vector.shape_cast %688 : vector<1x32x96xf32> to vector<32x96xf32>
    %cst_310 = arith.constant dense<0.000000e+00> : vector<8x96xf32>
    %690 = tpu.matmul %687, %689, %cst_310 {dimension_numbers = #tpu.dot_dimension_numbers<[1], [0], [0], [1], [0, 0, 1, 1], [], []>} : vector<8x32xf32>, vector<32x96xf32>, vector<8x96xf32> -> vector<8x96xf32>
    %c1_311 = arith.constant 1 : index
    %c0_312 = arith.constant 0 : index
    %c0_313 = arith.constant 0 : index
    %691 = vector.load %arg22[%c1_311, %c0_312, %c0_313] : memref<2x1x96xf32, #tpu.memory_space<vmem>>, vector<1x1x96xf32>
    %692 = vector.shape_cast %691 : vector<1x1x96xf32> to vector<1x96xf32>
    %693 = vector.broadcast %692 : vector<1x96xf32> to vector<8x96xf32>
    %694 = arith.addf %690, %693 : vector<8x96xf32>
    %695 = vector.extract_strided_slice %694 {offsets = [0, 0], sizes = [8, 32], strides = [1, 1]} : vector<8x96xf32> to vector<8x32xf32>
    %696 = vector.extract_strided_slice %694 {offsets = [0, 32], sizes = [8, 32], strides = [1, 1]} : vector<8x96xf32> to vector<8x32xf32>
    %697 = vector.extract_strided_slice %694 {offsets = [0, 64], sizes = [8, 32], strides = [1, 1]} : vector<8x96xf32> to vector<8x32xf32>
    %c1_314 = arith.constant 1 : index
    %c0_315 = arith.constant 0 : index
    %c0_316 = arith.constant 0 : index
    %698 = vector.load %arg23[%c1_314, %c0_315, %c0_316] : memref<2x32x32xf32, #tpu.memory_space<vmem>>, vector<1x32x32xf32>
    %699 = vector.shape_cast %698 : vector<1x32x32xf32> to vector<32x32xf32>
    %c1_317 = arith.constant 1 : index
    %c0_318 = arith.constant 0 : index
    %c0_319 = arith.constant 0 : index
    %700 = vector.load %arg24[%c1_317, %c0_318, %c0_319] : memref<2x1x32xf32, #tpu.memory_space<vmem>>, vector<1x1x32xf32>
    %701 = vector.shape_cast %700 : vector<1x1x32xf32> to vector<1x32xf32>
    %702 = vector.extract_strided_slice %695 {offsets = [0, 0], sizes = [8, 8], strides = [1, 1]} : vector<8x32xf32> to vector<8x8xf32>
    %cst_320 = arith.constant 0.353553385 : f32
    %703 = vector.broadcast %cst_320 : f32 to vector<8x8xf32>
    %704 = arith.mulf %702, %703 : vector<8x8xf32>
    %705 = vector.extract_strided_slice %696 {offsets = [0, 0], sizes = [8, 8], strides = [1, 1]} : vector<8x32xf32> to vector<8x8xf32>
    %706 = vector.extract_strided_slice %697 {offsets = [0, 0], sizes = [8, 8], strides = [1, 1]} : vector<8x32xf32> to vector<8x8xf32>
    %cst_321 = arith.constant dense<0.000000e+00> : vector<8x8xf32>
    %707 = tpu.matmul %704, %705, %cst_321 {dimension_numbers = #tpu.dot_dimension_numbers<[1], [1], [0], [0], [0, 0, 1, 0], [], []>} : vector<8x8xf32>, vector<8x8xf32>, vector<8x8xf32> -> vector<8x8xf32>
    %708 = arith.addf %707, %384 : vector<8x8xf32>
    %cst_322 = arith.constant dense<0xFF800000> : vector<8xf32>
    %709 = vector.multi_reduction <maximumf>, %708, %cst_322 [1] : vector<8x8xf32> to vector<8xf32>
    %710 = vector.shape_cast %709 : vector<8xf32> to vector<8x1xf32>
    %711 = vector.broadcast %710 : vector<8x1xf32> to vector<8x8xf32>
    %712 = arith.subf %708, %711 : vector<8x8xf32>
    %713 = math.exp %712 : vector<8x8xf32>
    %cst_323 = arith.constant dense<0.000000e+00> : vector<8xf32>
    %714 = vector.multi_reduction <add>, %713, %cst_323 [1] : vector<8x8xf32> to vector<8xf32>
    %715 = vector.shape_cast %714 : vector<8xf32> to vector<8x1xf32>
    %cst_324 = arith.constant dense<0.000000e+00> : vector<8x8xf32>
    %716 = tpu.matmul %713, %706, %cst_324 {dimension_numbers = #tpu.dot_dimension_numbers<[1], [0], [0], [1], [0, 0, 1, 1], [], []>} : vector<8x8xf32>, vector<8x8xf32>, vector<8x8xf32> -> vector<8x8xf32>
    %717 = tpu.reciprocal %715 {approx = true} : vector<8x1xf32> -> vector<8x1xf32>
    %718 = vector.broadcast %717 : vector<8x1xf32> to vector<8x8xf32>
    %719 = arith.mulf %716, %718 : vector<8x8xf32>
    %720 = vector.extract_strided_slice %695 {offsets = [0, 8], sizes = [8, 8], strides = [1, 1]} : vector<8x32xf32> to vector<8x8xf32>
    %cst_325 = arith.constant 0.353553385 : f32
    %721 = vector.broadcast %cst_325 : f32 to vector<8x8xf32>
    %722 = arith.mulf %720, %721 : vector<8x8xf32>
    %723 = vector.extract_strided_slice %696 {offsets = [0, 8], sizes = [8, 8], strides = [1, 1]} : vector<8x32xf32> to vector<8x8xf32>
    %724 = vector.extract_strided_slice %697 {offsets = [0, 8], sizes = [8, 8], strides = [1, 1]} : vector<8x32xf32> to vector<8x8xf32>
    %cst_326 = arith.constant dense<0.000000e+00> : vector<8x8xf32>
    %725 = tpu.matmul %722, %723, %cst_326 {dimension_numbers = #tpu.dot_dimension_numbers<[1], [1], [0], [0], [0, 0, 1, 0], [], []>} : vector<8x8xf32>, vector<8x8xf32>, vector<8x8xf32> -> vector<8x8xf32>
    %726 = arith.addf %725, %384 : vector<8x8xf32>
    %cst_327 = arith.constant dense<0xFF800000> : vector<8xf32>
    %727 = vector.multi_reduction <maximumf>, %726, %cst_327 [1] : vector<8x8xf32> to vector<8xf32>
    %728 = vector.shape_cast %727 : vector<8xf32> to vector<8x1xf32>
    %729 = vector.broadcast %728 : vector<8x1xf32> to vector<8x8xf32>
    %730 = arith.subf %726, %729 : vector<8x8xf32>
    %731 = math.exp %730 : vector<8x8xf32>
    %cst_328 = arith.constant dense<0.000000e+00> : vector<8xf32>
    %732 = vector.multi_reduction <add>, %731, %cst_328 [1] : vector<8x8xf32> to vector<8xf32>
    %733 = vector.shape_cast %732 : vector<8xf32> to vector<8x1xf32>
    %cst_329 = arith.constant dense<0.000000e+00> : vector<8x8xf32>
    %734 = tpu.matmul %731, %724, %cst_329 {dimension_numbers = #tpu.dot_dimension_numbers<[1], [0], [0], [1], [0, 0, 1, 1], [], []>} : vector<8x8xf32>, vector<8x8xf32>, vector<8x8xf32> -> vector<8x8xf32>
    %735 = tpu.reciprocal %733 {approx = true} : vector<8x1xf32> -> vector<8x1xf32>
    %736 = vector.broadcast %735 : vector<8x1xf32> to vector<8x8xf32>
    %737 = arith.mulf %734, %736 : vector<8x8xf32>
    %738 = vector.extract_strided_slice %695 {offsets = [0, 16], sizes = [8, 8], strides = [1, 1]} : vector<8x32xf32> to vector<8x8xf32>
    %cst_330 = arith.constant 0.353553385 : f32
    %739 = vector.broadcast %cst_330 : f32 to vector<8x8xf32>
    %740 = arith.mulf %738, %739 : vector<8x8xf32>
    %741 = vector.extract_strided_slice %696 {offsets = [0, 16], sizes = [8, 8], strides = [1, 1]} : vector<8x32xf32> to vector<8x8xf32>
    %742 = vector.extract_strided_slice %697 {offsets = [0, 16], sizes = [8, 8], strides = [1, 1]} : vector<8x32xf32> to vector<8x8xf32>
    %cst_331 = arith.constant dense<0.000000e+00> : vector<8x8xf32>
    %743 = tpu.matmul %740, %741, %cst_331 {dimension_numbers = #tpu.dot_dimension_numbers<[1], [1], [0], [0], [0, 0, 1, 0], [], []>} : vector<8x8xf32>, vector<8x8xf32>, vector<8x8xf32> -> vector<8x8xf32>
    %744 = arith.addf %743, %384 : vector<8x8xf32>
    %cst_332 = arith.constant dense<0xFF800000> : vector<8xf32>
    %745 = vector.multi_reduction <maximumf>, %744, %cst_332 [1] : vector<8x8xf32> to vector<8xf32>
    %746 = vector.shape_cast %745 : vector<8xf32> to vector<8x1xf32>
    %747 = vector.broadcast %746 : vector<8x1xf32> to vector<8x8xf32>
    %748 = arith.subf %744, %747 : vector<8x8xf32>
    %749 = math.exp %748 : vector<8x8xf32>
    %cst_333 = arith.constant dense<0.000000e+00> : vector<8xf32>
    %750 = vector.multi_reduction <add>, %749, %cst_333 [1] : vector<8x8xf32> to vector<8xf32>
    %751 = vector.shape_cast %750 : vector<8xf32> to vector<8x1xf32>
    %cst_334 = arith.constant dense<0.000000e+00> : vector<8x8xf32>
    %752 = tpu.matmul %749, %742, %cst_334 {dimension_numbers = #tpu.dot_dimension_numbers<[1], [0], [0], [1], [0, 0, 1, 1], [], []>} : vector<8x8xf32>, vector<8x8xf32>, vector<8x8xf32> -> vector<8x8xf32>
    %753 = tpu.reciprocal %751 {approx = true} : vector<8x1xf32> -> vector<8x1xf32>
    %754 = vector.broadcast %753 : vector<8x1xf32> to vector<8x8xf32>
    %755 = arith.mulf %752, %754 : vector<8x8xf32>
    %756 = vector.extract_strided_slice %695 {offsets = [0, 24], sizes = [8, 8], strides = [1, 1]} : vector<8x32xf32> to vector<8x8xf32>
    %cst_335 = arith.constant 0.353553385 : f32
    %757 = vector.broadcast %cst_335 : f32 to vector<8x8xf32>
    %758 = arith.mulf %756, %757 : vector<8x8xf32>
    %759 = vector.extract_strided_slice %696 {offsets = [0, 24], sizes = [8, 8], strides = [1, 1]} : vector<8x32xf32> to vector<8x8xf32>
    %760 = vector.extract_strided_slice %697 {offsets = [0, 24], sizes = [8, 8], strides = [1, 1]} : vector<8x32xf32> to vector<8x8xf32>
    %cst_336 = arith.constant dense<0.000000e+00> : vector<8x8xf32>
    %761 = tpu.matmul %758, %759, %cst_336 {dimension_numbers = #tpu.dot_dimension_numbers<[1], [1], [0], [0], [0, 0, 1, 0], [], []>} : vector<8x8xf32>, vector<8x8xf32>, vector<8x8xf32> -> vector<8x8xf32>
    %762 = arith.addf %761, %384 : vector<8x8xf32>
    %cst_337 = arith.constant dense<0xFF800000> : vector<8xf32>
    %763 = vector.multi_reduction <maximumf>, %762, %cst_337 [1] : vector<8x8xf32> to vector<8xf32>
    %764 = vector.shape_cast %763 : vector<8xf32> to vector<8x1xf32>
    %765 = vector.broadcast %764 : vector<8x1xf32> to vector<8x8xf32>
    %766 = arith.subf %762, %765 : vector<8x8xf32>
    %767 = math.exp %766 : vector<8x8xf32>
    %cst_338 = arith.constant dense<0.000000e+00> : vector<8xf32>
    %768 = vector.multi_reduction <add>, %767, %cst_338 [1] : vector<8x8xf32> to vector<8xf32>
    %769 = vector.shape_cast %768 : vector<8xf32> to vector<8x1xf32>
    %cst_339 = arith.constant dense<0.000000e+00> : vector<8x8xf32>
    %770 = tpu.matmul %767, %760, %cst_339 {dimension_numbers = #tpu.dot_dimension_numbers<[1], [0], [0], [1], [0, 0, 1, 1], [], []>} : vector<8x8xf32>, vector<8x8xf32>, vector<8x8xf32> -> vector<8x8xf32>
    %771 = tpu.reciprocal %769 {approx = true} : vector<8x1xf32> -> vector<8x1xf32>
    %772 = vector.broadcast %771 : vector<8x1xf32> to vector<8x8xf32>
    %773 = arith.mulf %770, %772 : vector<8x8xf32>
    %774 = tpu.concatenate %719, %737, %755, %773 in 1 : vector<8x8xf32>, vector<8x8xf32>, vector<8x8xf32>, vector<8x8xf32> -> vector<8x32xf32>
    %cst_340 = arith.constant dense<0.000000e+00> : vector<8x32xf32>
    %775 = tpu.matmul %774, %699, %cst_340 {dimension_numbers = #tpu.dot_dimension_numbers<[1], [0], [0], [1], [0, 0, 1, 1], [], []>} : vector<8x32xf32>, vector<32x32xf32>, vector<8x32xf32> -> vector<8x32xf32>
    %776 = vector.broadcast %701 : vector<1x32xf32> to vector<8x32xf32>
    %777 = arith.addf %775, %776 : vector<8x32xf32>
    %778 = arith.addf %663, %777 : vector<8x32xf32>
    %c1_341 = arith.constant 1 : index
    %c0_342 = arith.constant 0 : index
    %c0_343 = arith.constant 0 : index
    %779 = vector.load %arg25[%c1_341, %c0_342, %c0_343] : memref<2x1x32xf32, #tpu.memory_space<vmem>>, vector<1x1x32xf32>
    %780 = vector.shape_cast %779 : vector<1x1x32xf32> to vector<1x32xf32>
    %c1_344 = arith.constant 1 : index
    %c0_345 = arith.constant 0 : index
    %c0_346 = arith.constant 0 : index
    %781 = vector.load %arg26[%c1_344, %c0_345, %c0_346] : memref<2x1x32xf32, #tpu.memory_space<vmem>>, vector<1x1x32xf32>
    %782 = vector.shape_cast %781 : vector<1x1x32xf32> to vector<1x32xf32>
    %cst_347 = arith.constant dense<0.000000e+00> : vector<8xf32>
    %783 = vector.multi_reduction <add>, %778, %cst_347 [1] : vector<8x32xf32> to vector<8xf32>
    %784 = vector.shape_cast %783 : vector<8xf32> to vector<8x1xf32>
    %cst_348 = arith.constant 3.200000e+01 : f32
    %785 = vector.broadcast %cst_348 : f32 to vector<8x1xf32>
    %786 = arith.divf %784, %785 : vector<8x1xf32>
    %787 = vector.broadcast %786 : vector<8x1xf32> to vector<8x32xf32>
    %788 = arith.subf %778, %787 : vector<8x32xf32>
    %789 = arith.mulf %788, %788 : vector<8x32xf32>
    %cst_349 = arith.constant dense<0.000000e+00> : vector<8xf32>
    %790 = vector.multi_reduction <add>, %789, %cst_349 [1] : vector<8x32xf32> to vector<8xf32>
    %791 = vector.shape_cast %790 : vector<8xf32> to vector<8x1xf32>
    %cst_350 = arith.constant 3.200000e+01 : f32
    %792 = vector.broadcast %cst_350 : f32 to vector<8x1xf32>
    %793 = arith.divf %791, %792 : vector<8x1xf32>
    %cst_351 = arith.constant 9.99999974E-6 : f32
    %794 = vector.broadcast %cst_351 : f32 to vector<8x1xf32>
    %795 = arith.addf %793, %794 : vector<8x1xf32>
    %796 = math.rsqrt %795 : vector<8x1xf32>
    %797 = vector.broadcast %796 : vector<8x1xf32> to vector<8x32xf32>
    %798 = arith.mulf %788, %797 : vector<8x32xf32>
    %799 = vector.broadcast %780 : vector<1x32xf32> to vector<8x32xf32>
    %800 = arith.mulf %798, %799 : vector<8x32xf32>
    %801 = vector.broadcast %782 : vector<1x32xf32> to vector<8x32xf32>
    %802 = arith.addf %800, %801 : vector<8x32xf32>
    %c1_352 = arith.constant 1 : index
    %c0_353 = arith.constant 0 : index
    %c0_354 = arith.constant 0 : index
    %803 = vector.load %arg27[%c1_352, %c0_353, %c0_354] : memref<2x32x32xf32, #tpu.memory_space<vmem>>, vector<1x32x32xf32>
    %804 = vector.shape_cast %803 : vector<1x32x32xf32> to vector<32x32xf32>
    %cst_355 = arith.constant dense<0.000000e+00> : vector<8x32xf32>
    %805 = tpu.matmul %802, %804, %cst_355 {dimension_numbers = #tpu.dot_dimension_numbers<[1], [0], [0], [1], [0, 0, 1, 1], [], []>} : vector<8x32xf32>, vector<32x32xf32>, vector<8x32xf32> -> vector<8x32xf32>
    %c1_356 = arith.constant 1 : index
    %c0_357 = arith.constant 0 : index
    %c0_358 = arith.constant 0 : index
    %806 = vector.load %arg28[%c1_356, %c0_357, %c0_358] : memref<2x1x32xf32, #tpu.memory_space<vmem>>, vector<1x1x32xf32>
    %807 = vector.shape_cast %806 : vector<1x1x32xf32> to vector<1x32xf32>
    %808 = vector.broadcast %807 : vector<1x32xf32> to vector<8x32xf32>
    %809 = arith.addf %805, %808 : vector<8x32xf32>
    %c1_359 = arith.constant 1 : index
    %c0_360 = arith.constant 0 : index
    %c0_361 = arith.constant 0 : index
    %810 = vector.load %arg29[%c1_359, %c0_360, %c0_361] : memref<2x32x64xf32, #tpu.memory_space<vmem>>, vector<1x32x64xf32>
    %811 = vector.shape_cast %810 : vector<1x32x64xf32> to vector<32x64xf32>
    %cst_362 = arith.constant dense<0.000000e+00> : vector<10x64xf32>
    %812 = tpu.matmul %366, %811, %cst_362 {dimension_numbers = #tpu.dot_dimension_numbers<[1], [0], [0], [1], [0, 0, 1, 1], [], []>} : vector<10x32xf32>, vector<32x64xf32>, vector<10x64xf32> -> vector<10x64xf32>
    %c1_363 = arith.constant 1 : index
    %c0_364 = arith.constant 0 : index
    %c0_365 = arith.constant 0 : index
    %813 = vector.load %arg30[%c1_363, %c0_364, %c0_365] : memref<2x1x64xf32, #tpu.memory_space<vmem>>, vector<1x1x64xf32>
    %814 = vector.shape_cast %813 : vector<1x1x64xf32> to vector<1x64xf32>
    %815 = vector.broadcast %814 : vector<1x64xf32> to vector<10x64xf32>
    %816 = arith.addf %812, %815 : vector<10x64xf32>
    %817 = vector.extract_strided_slice %816 {offsets = [0, 0], sizes = [10, 32], strides = [1, 1]} : vector<10x64xf32> to vector<10x32xf32>
    %818 = vector.extract_strided_slice %816 {offsets = [0, 32], sizes = [10, 32], strides = [1, 1]} : vector<10x64xf32> to vector<10x32xf32>
    %c1_366 = arith.constant 1 : index
    %c0_367 = arith.constant 0 : index
    %c0_368 = arith.constant 0 : index
    %819 = vector.load %arg31[%c1_366, %c0_367, %c0_368] : memref<2x32x32xf32, #tpu.memory_space<vmem>>, vector<1x32x32xf32>
    %820 = vector.shape_cast %819 : vector<1x32x32xf32> to vector<32x32xf32>
    %c1_369 = arith.constant 1 : index
    %c0_370 = arith.constant 0 : index
    %c0_371 = arith.constant 0 : index
    %821 = vector.load %arg32[%c1_369, %c0_370, %c0_371] : memref<2x1x32xf32, #tpu.memory_space<vmem>>, vector<1x1x32xf32>
    %822 = vector.shape_cast %821 : vector<1x1x32xf32> to vector<1x32xf32>
    %823 = vector.extract_strided_slice %809 {offsets = [0, 0], sizes = [8, 8], strides = [1, 1]} : vector<8x32xf32> to vector<8x8xf32>
    %cst_372 = arith.constant 0.353553385 : f32
    %824 = vector.broadcast %cst_372 : f32 to vector<8x8xf32>
    %825 = arith.mulf %823, %824 : vector<8x8xf32>
    %826 = vector.extract_strided_slice %817 {offsets = [0, 0], sizes = [10, 8], strides = [1, 1]} : vector<10x32xf32> to vector<10x8xf32>
    %827 = vector.extract_strided_slice %818 {offsets = [0, 0], sizes = [10, 8], strides = [1, 1]} : vector<10x32xf32> to vector<10x8xf32>
    %cst_373 = arith.constant dense<0.000000e+00> : vector<8x10xf32>
    %828 = tpu.matmul %825, %826, %cst_373 {dimension_numbers = #tpu.dot_dimension_numbers<[1], [1], [0], [0], [0, 0, 1, 0], [], []>} : vector<8x8xf32>, vector<10x8xf32>, vector<8x10xf32> -> vector<8x10xf32>
    %829 = arith.addf %828, %386 : vector<8x10xf32>
    %cst_374 = arith.constant dense<0xFF800000> : vector<8xf32>
    %830 = vector.multi_reduction <maximumf>, %829, %cst_374 [1] : vector<8x10xf32> to vector<8xf32>
    %831 = vector.shape_cast %830 : vector<8xf32> to vector<8x1xf32>
    %832 = vector.broadcast %831 : vector<8x1xf32> to vector<8x10xf32>
    %833 = arith.subf %829, %832 : vector<8x10xf32>
    %834 = math.exp %833 : vector<8x10xf32>
    %cst_375 = arith.constant dense<0.000000e+00> : vector<8xf32>
    %835 = vector.multi_reduction <add>, %834, %cst_375 [1] : vector<8x10xf32> to vector<8xf32>
    %836 = vector.shape_cast %835 : vector<8xf32> to vector<8x1xf32>
    %cst_376 = arith.constant dense<0.000000e+00> : vector<8x8xf32>
    %837 = tpu.matmul %834, %827, %cst_376 {dimension_numbers = #tpu.dot_dimension_numbers<[1], [0], [0], [1], [0, 0, 1, 1], [], []>} : vector<8x10xf32>, vector<10x8xf32>, vector<8x8xf32> -> vector<8x8xf32>
    %838 = tpu.reciprocal %836 {approx = true} : vector<8x1xf32> -> vector<8x1xf32>
    %839 = vector.broadcast %838 : vector<8x1xf32> to vector<8x8xf32>
    %840 = arith.mulf %837, %839 : vector<8x8xf32>
    %841 = vector.extract_strided_slice %809 {offsets = [0, 8], sizes = [8, 8], strides = [1, 1]} : vector<8x32xf32> to vector<8x8xf32>
    %cst_377 = arith.constant 0.353553385 : f32
    %842 = vector.broadcast %cst_377 : f32 to vector<8x8xf32>
    %843 = arith.mulf %841, %842 : vector<8x8xf32>
    %844 = vector.extract_strided_slice %817 {offsets = [0, 8], sizes = [10, 8], strides = [1, 1]} : vector<10x32xf32> to vector<10x8xf32>
    %845 = vector.extract_strided_slice %818 {offsets = [0, 8], sizes = [10, 8], strides = [1, 1]} : vector<10x32xf32> to vector<10x8xf32>
    %cst_378 = arith.constant dense<0.000000e+00> : vector<8x10xf32>
    %846 = tpu.matmul %843, %844, %cst_378 {dimension_numbers = #tpu.dot_dimension_numbers<[1], [1], [0], [0], [0, 0, 1, 0], [], []>} : vector<8x8xf32>, vector<10x8xf32>, vector<8x10xf32> -> vector<8x10xf32>
    %847 = arith.addf %846, %386 : vector<8x10xf32>
    %cst_379 = arith.constant dense<0xFF800000> : vector<8xf32>
    %848 = vector.multi_reduction <maximumf>, %847, %cst_379 [1] : vector<8x10xf32> to vector<8xf32>
    %849 = vector.shape_cast %848 : vector<8xf32> to vector<8x1xf32>
    %850 = vector.broadcast %849 : vector<8x1xf32> to vector<8x10xf32>
    %851 = arith.subf %847, %850 : vector<8x10xf32>
    %852 = math.exp %851 : vector<8x10xf32>
    %cst_380 = arith.constant dense<0.000000e+00> : vector<8xf32>
    %853 = vector.multi_reduction <add>, %852, %cst_380 [1] : vector<8x10xf32> to vector<8xf32>
    %854 = vector.shape_cast %853 : vector<8xf32> to vector<8x1xf32>
    %cst_381 = arith.constant dense<0.000000e+00> : vector<8x8xf32>
    %855 = tpu.matmul %852, %845, %cst_381 {dimension_numbers = #tpu.dot_dimension_numbers<[1], [0], [0], [1], [0, 0, 1, 1], [], []>} : vector<8x10xf32>, vector<10x8xf32>, vector<8x8xf32> -> vector<8x8xf32>
    %856 = tpu.reciprocal %854 {approx = true} : vector<8x1xf32> -> vector<8x1xf32>
    %857 = vector.broadcast %856 : vector<8x1xf32> to vector<8x8xf32>
    %858 = arith.mulf %855, %857 : vector<8x8xf32>
    %859 = vector.extract_strided_slice %809 {offsets = [0, 16], sizes = [8, 8], strides = [1, 1]} : vector<8x32xf32> to vector<8x8xf32>
    %cst_382 = arith.constant 0.353553385 : f32
    %860 = vector.broadcast %cst_382 : f32 to vector<8x8xf32>
    %861 = arith.mulf %859, %860 : vector<8x8xf32>
    %862 = vector.extract_strided_slice %817 {offsets = [0, 16], sizes = [10, 8], strides = [1, 1]} : vector<10x32xf32> to vector<10x8xf32>
    %863 = vector.extract_strided_slice %818 {offsets = [0, 16], sizes = [10, 8], strides = [1, 1]} : vector<10x32xf32> to vector<10x8xf32>
    %cst_383 = arith.constant dense<0.000000e+00> : vector<8x10xf32>
    %864 = tpu.matmul %861, %862, %cst_383 {dimension_numbers = #tpu.dot_dimension_numbers<[1], [1], [0], [0], [0, 0, 1, 0], [], []>} : vector<8x8xf32>, vector<10x8xf32>, vector<8x10xf32> -> vector<8x10xf32>
    %865 = arith.addf %864, %386 : vector<8x10xf32>
    %cst_384 = arith.constant dense<0xFF800000> : vector<8xf32>
    %866 = vector.multi_reduction <maximumf>, %865, %cst_384 [1] : vector<8x10xf32> to vector<8xf32>
    %867 = vector.shape_cast %866 : vector<8xf32> to vector<8x1xf32>
    %868 = vector.broadcast %867 : vector<8x1xf32> to vector<8x10xf32>
    %869 = arith.subf %865, %868 : vector<8x10xf32>
    %870 = math.exp %869 : vector<8x10xf32>
    %cst_385 = arith.constant dense<0.000000e+00> : vector<8xf32>
    %871 = vector.multi_reduction <add>, %870, %cst_385 [1] : vector<8x10xf32> to vector<8xf32>
    %872 = vector.shape_cast %871 : vector<8xf32> to vector<8x1xf32>
    %cst_386 = arith.constant dense<0.000000e+00> : vector<8x8xf32>
    %873 = tpu.matmul %870, %863, %cst_386 {dimension_numbers = #tpu.dot_dimension_numbers<[1], [0], [0], [1], [0, 0, 1, 1], [], []>} : vector<8x10xf32>, vector<10x8xf32>, vector<8x8xf32> -> vector<8x8xf32>
    %874 = tpu.reciprocal %872 {approx = true} : vector<8x1xf32> -> vector<8x1xf32>
    %875 = vector.broadcast %874 : vector<8x1xf32> to vector<8x8xf32>
    %876 = arith.mulf %873, %875 : vector<8x8xf32>
    %877 = vector.extract_strided_slice %809 {offsets = [0, 24], sizes = [8, 8], strides = [1, 1]} : vector<8x32xf32> to vector<8x8xf32>
    %cst_387 = arith.constant 0.353553385 : f32
    %878 = vector.broadcast %cst_387 : f32 to vector<8x8xf32>
    %879 = arith.mulf %877, %878 : vector<8x8xf32>
    %880 = vector.extract_strided_slice %817 {offsets = [0, 24], sizes = [10, 8], strides = [1, 1]} : vector<10x32xf32> to vector<10x8xf32>
    %881 = vector.extract_strided_slice %818 {offsets = [0, 24], sizes = [10, 8], strides = [1, 1]} : vector<10x32xf32> to vector<10x8xf32>
    %cst_388 = arith.constant dense<0.000000e+00> : vector<8x10xf32>
    %882 = tpu.matmul %879, %880, %cst_388 {dimension_numbers = #tpu.dot_dimension_numbers<[1], [1], [0], [0], [0, 0, 1, 0], [], []>} : vector<8x8xf32>, vector<10x8xf32>, vector<8x10xf32> -> vector<8x10xf32>
    %883 = arith.addf %882, %386 : vector<8x10xf32>
    %cst_389 = arith.constant dense<0xFF800000> : vector<8xf32>
    %884 = vector.multi_reduction <maximumf>, %883, %cst_389 [1] : vector<8x10xf32> to vector<8xf32>
    %885 = vector.shape_cast %884 : vector<8xf32> to vector<8x1xf32>
    %886 = vector.broadcast %885 : vector<8x1xf32> to vector<8x10xf32>
    %887 = arith.subf %883, %886 : vector<8x10xf32>
    %888 = math.exp %887 : vector<8x10xf32>
    %cst_390 = arith.constant dense<0.000000e+00> : vector<8xf32>
    %889 = vector.multi_reduction <add>, %888, %cst_390 [1] : vector<8x10xf32> to vector<8xf32>
    %890 = vector.shape_cast %889 : vector<8xf32> to vector<8x1xf32>
    %cst_391 = arith.constant dense<0.000000e+00> : vector<8x8xf32>
    %891 = tpu.matmul %888, %881, %cst_391 {dimension_numbers = #tpu.dot_dimension_numbers<[1], [0], [0], [1], [0, 0, 1, 1], [], []>} : vector<8x10xf32>, vector<10x8xf32>, vector<8x8xf32> -> vector<8x8xf32>
    %892 = tpu.reciprocal %890 {approx = true} : vector<8x1xf32> -> vector<8x1xf32>
    %893 = vector.broadcast %892 : vector<8x1xf32> to vector<8x8xf32>
    %894 = arith.mulf %891, %893 : vector<8x8xf32>
    %895 = tpu.concatenate %840, %858, %876, %894 in 1 : vector<8x8xf32>, vector<8x8xf32>, vector<8x8xf32>, vector<8x8xf32> -> vector<8x32xf32>
    %cst_392 = arith.constant dense<0.000000e+00> : vector<8x32xf32>
    %896 = tpu.matmul %895, %820, %cst_392 {dimension_numbers = #tpu.dot_dimension_numbers<[1], [0], [0], [1], [0, 0, 1, 1], [], []>} : vector<8x32xf32>, vector<32x32xf32>, vector<8x32xf32> -> vector<8x32xf32>
    %897 = vector.broadcast %822 : vector<1x32xf32> to vector<8x32xf32>
    %898 = arith.addf %896, %897 : vector<8x32xf32>
    %899 = arith.addf %778, %898 : vector<8x32xf32>
    %c1_393 = arith.constant 1 : index
    %c0_394 = arith.constant 0 : index
    %c0_395 = arith.constant 0 : index
    %900 = vector.load %arg33[%c1_393, %c0_394, %c0_395] : memref<2x1x32xf32, #tpu.memory_space<vmem>>, vector<1x1x32xf32>
    %901 = vector.shape_cast %900 : vector<1x1x32xf32> to vector<1x32xf32>
    %c1_396 = arith.constant 1 : index
    %c0_397 = arith.constant 0 : index
    %c0_398 = arith.constant 0 : index
    %902 = vector.load %arg34[%c1_396, %c0_397, %c0_398] : memref<2x1x32xf32, #tpu.memory_space<vmem>>, vector<1x1x32xf32>
    %903 = vector.shape_cast %902 : vector<1x1x32xf32> to vector<1x32xf32>
    %cst_399 = arith.constant dense<0.000000e+00> : vector<8xf32>
    %904 = vector.multi_reduction <add>, %899, %cst_399 [1] : vector<8x32xf32> to vector<8xf32>
    %905 = vector.shape_cast %904 : vector<8xf32> to vector<8x1xf32>
    %cst_400 = arith.constant 3.200000e+01 : f32
    %906 = vector.broadcast %cst_400 : f32 to vector<8x1xf32>
    %907 = arith.divf %905, %906 : vector<8x1xf32>
    %908 = vector.broadcast %907 : vector<8x1xf32> to vector<8x32xf32>
    %909 = arith.subf %899, %908 : vector<8x32xf32>
    %910 = arith.mulf %909, %909 : vector<8x32xf32>
    %cst_401 = arith.constant dense<0.000000e+00> : vector<8xf32>
    %911 = vector.multi_reduction <add>, %910, %cst_401 [1] : vector<8x32xf32> to vector<8xf32>
    %912 = vector.shape_cast %911 : vector<8xf32> to vector<8x1xf32>
    %cst_402 = arith.constant 3.200000e+01 : f32
    %913 = vector.broadcast %cst_402 : f32 to vector<8x1xf32>
    %914 = arith.divf %912, %913 : vector<8x1xf32>
    %cst_403 = arith.constant 9.99999974E-6 : f32
    %915 = vector.broadcast %cst_403 : f32 to vector<8x1xf32>
    %916 = arith.addf %914, %915 : vector<8x1xf32>
    %917 = math.rsqrt %916 : vector<8x1xf32>
    %918 = vector.broadcast %917 : vector<8x1xf32> to vector<8x32xf32>
    %919 = arith.mulf %909, %918 : vector<8x32xf32>
    %920 = vector.broadcast %901 : vector<1x32xf32> to vector<8x32xf32>
    %921 = arith.mulf %919, %920 : vector<8x32xf32>
    %922 = vector.broadcast %903 : vector<1x32xf32> to vector<8x32xf32>
    %923 = arith.addf %921, %922 : vector<8x32xf32>
    %c1_404 = arith.constant 1 : index
    %c0_405 = arith.constant 0 : index
    %c0_406 = arith.constant 0 : index
    %924 = vector.load %arg35[%c1_404, %c0_405, %c0_406] : memref<2x32x64xf32, #tpu.memory_space<vmem>>, vector<1x32x64xf32>
    %925 = vector.shape_cast %924 : vector<1x32x64xf32> to vector<32x64xf32>
    %cst_407 = arith.constant dense<0.000000e+00> : vector<8x64xf32>
    %926 = tpu.matmul %923, %925, %cst_407 {dimension_numbers = #tpu.dot_dimension_numbers<[1], [0], [0], [1], [0, 0, 1, 1], [], []>} : vector<8x32xf32>, vector<32x64xf32>, vector<8x64xf32> -> vector<8x64xf32>
    %c1_408 = arith.constant 1 : index
    %c0_409 = arith.constant 0 : index
    %c0_410 = arith.constant 0 : index
    %927 = vector.load %arg36[%c1_408, %c0_409, %c0_410] : memref<2x1x64xf32, #tpu.memory_space<vmem>>, vector<1x1x64xf32>
    %928 = vector.shape_cast %927 : vector<1x1x64xf32> to vector<1x64xf32>
    %929 = vector.broadcast %928 : vector<1x64xf32> to vector<8x64xf32>
    %930 = arith.addf %926, %929 : vector<8x64xf32>
    %cst_411 = arith.constant 0.000000e+00 : f32
    %931 = vector.broadcast %cst_411 : f32 to vector<8x64xf32>
    %932 = arith.maximumf %930, %931 : vector<8x64xf32>
    %c1_412 = arith.constant 1 : index
    %c0_413 = arith.constant 0 : index
    %c0_414 = arith.constant 0 : index
    %933 = vector.load %arg37[%c1_412, %c0_413, %c0_414] : memref<2x64x32xf32, #tpu.memory_space<vmem>>, vector<1x64x32xf32>
    %934 = vector.shape_cast %933 : vector<1x64x32xf32> to vector<64x32xf32>
    %cst_415 = arith.constant dense<0.000000e+00> : vector<8x32xf32>
    %935 = tpu.matmul %932, %934, %cst_415 {dimension_numbers = #tpu.dot_dimension_numbers<[1], [0], [0], [1], [0, 0, 1, 1], [], []>} : vector<8x64xf32>, vector<64x32xf32>, vector<8x32xf32> -> vector<8x32xf32>
    %c1_416 = arith.constant 1 : index
    %c0_417 = arith.constant 0 : index
    %c0_418 = arith.constant 0 : index
    %936 = vector.load %arg38[%c1_416, %c0_417, %c0_418] : memref<2x1x32xf32, #tpu.memory_space<vmem>>, vector<1x1x32xf32>
    %937 = vector.shape_cast %936 : vector<1x1x32xf32> to vector<1x32xf32>
    %938 = vector.broadcast %937 : vector<1x32xf32> to vector<8x32xf32>
    %939 = arith.addf %935, %938 : vector<8x32xf32>
    %940 = arith.addf %899, %939 : vector<8x32xf32>
    %c0_419 = arith.constant 0 : index
    %c0_420 = arith.constant 0 : index
    %941 = vector.load %arg39[%c0_419, %c0_420] : memref<1x32xf32, #tpu.memory_space<vmem>>, vector<1x32xf32>
    %c0_421 = arith.constant 0 : index
    %c0_422 = arith.constant 0 : index
    %942 = vector.load %arg40[%c0_421, %c0_422] : memref<1x32xf32, #tpu.memory_space<vmem>>, vector<1x32xf32>
    %cst_423 = arith.constant dense<0.000000e+00> : vector<8xf32>
    %943 = vector.multi_reduction <add>, %940, %cst_423 [1] : vector<8x32xf32> to vector<8xf32>
    %944 = vector.shape_cast %943 : vector<8xf32> to vector<8x1xf32>
    %cst_424 = arith.constant 3.200000e+01 : f32
    %945 = vector.broadcast %cst_424 : f32 to vector<8x1xf32>
    %946 = arith.divf %944, %945 : vector<8x1xf32>
    %947 = vector.broadcast %946 : vector<8x1xf32> to vector<8x32xf32>
    %948 = arith.subf %940, %947 : vector<8x32xf32>
    %949 = arith.mulf %948, %948 : vector<8x32xf32>
    %cst_425 = arith.constant dense<0.000000e+00> : vector<8xf32>
    %950 = vector.multi_reduction <add>, %949, %cst_425 [1] : vector<8x32xf32> to vector<8xf32>
    %951 = vector.shape_cast %950 : vector<8xf32> to vector<8x1xf32>
    %cst_426 = arith.constant 3.200000e+01 : f32
    %952 = vector.broadcast %cst_426 : f32 to vector<8x1xf32>
    %953 = arith.divf %951, %952 : vector<8x1xf32>
    %cst_427 = arith.constant 9.99999974E-6 : f32
    %954 = vector.broadcast %cst_427 : f32 to vector<8x1xf32>
    %955 = arith.addf %953, %954 : vector<8x1xf32>
    %956 = math.rsqrt %955 : vector<8x1xf32>
    %957 = vector.broadcast %956 : vector<8x1xf32> to vector<8x32xf32>
    %958 = arith.mulf %948, %957 : vector<8x32xf32>
    %959 = vector.broadcast %941 : vector<1x32xf32> to vector<8x32xf32>
    %960 = arith.mulf %958, %959 : vector<8x32xf32>
    %961 = vector.broadcast %942 : vector<1x32xf32> to vector<8x32xf32>
    %962 = arith.addf %960, %961 : vector<8x32xf32>
    %c0_428 = arith.constant 0 : index
    %c0_429 = arith.constant 0 : index
    %963 = vector.load %arg41[%c0_428, %c0_429] : memref<32x64xf32, #tpu.memory_space<vmem>>, vector<32x64xf32>
    %cst_430 = arith.constant dense<0.000000e+00> : vector<8x64xf32>
    %964 = tpu.matmul %962, %963, %cst_430 {dimension_numbers = #tpu.dot_dimension_numbers<[1], [0], [0], [1], [0, 0, 1, 1], [], []>} : vector<8x32xf32>, vector<32x64xf32>, vector<8x64xf32> -> vector<8x64xf32>
    %c0_431 = arith.constant 0 : index
    %c0_432 = arith.constant 0 : index
    %965 = vector.load %arg42[%c0_431, %c0_432] : memref<1x64xf32, #tpu.memory_space<vmem>>, vector<1x64xf32>
    %966 = vector.broadcast %965 : vector<1x64xf32> to vector<8x64xf32>
    %967 = arith.addf %964, %966 : vector<8x64xf32>
    %c0_433 = arith.constant 0 : index
    %c0_434 = arith.constant 0 : index
    %c0_435 = arith.constant 0 : index
    %968 = vector.load %arg43[%c0_433, %c0_434, %c0_435] : memref<1x8x64xf32, #tpu.memory_space<vmem>>, vector<1x8x64xf32>
    %969 = vector.shape_cast %968 : vector<1x8x64xf32> to vector<8x64xf32>
    %970 = vector.shape_cast %967 : vector<8x64xf32> to vector<1x8x64xf32>
    tpu.vector_store %arg43[%c0_433, %c0_434, %c0_435], %970 {strides = array<i32>} : memref<1x8x64xf32, #tpu.memory_space<vmem>>, vector<1x8x64xf32>,
    return
  }
  func.func @transform_0(%arg0: i32) -> (i32, i32, i32) {
    %c0_i32 = arith.constant 0 : i32
    %c0_i32_0 = arith.constant 0 : i32
    %c0_i32_1 = arith.constant 0 : i32
    return %arg0, %c0_i32, %c0_i32_0 : i32, i32, i32
  }
  func.func @transform_1(%arg0: i32) -> (i32, i32, i32) {
    %c0_i32 = arith.constant 0 : i32
    %c0_i32_0 = arith.constant 0 : i32
    %c0_i32_1 = arith.constant 0 : i32
    return %arg0, %c0_i32, %c0_i32_0 : i32, i32, i32
  }
  func.func @transform_2(%arg0: i32) -> (i32, i32, i32) {
    %c0_i32 = arith.constant 0 : i32
    %c0_i32_0 = arith.constant 0 : i32
    %c0_i32_1 = arith.constant 0 : i32
    return %arg0, %c0_i32, %c0_i32_0 : i32, i32, i32
  }
  func.func @transform_3(%arg0: i32) -> (i32, i32, i32) {
    %c0_i32 = arith.constant 0 : i32
    %c0_i32_0 = arith.constant 0 : i32
    %c0_i32_1 = arith.constant 0 : i32
    return %arg0, %c0_i32, %c0_i32_0 : i32, i32, i32
  }
  func.func @transform_4(%arg0: i32) -> (i32, i32) {
    %c0_i32 = arith.constant 0 : i32
    %c0_i32_0 = arith.constant 0 : i32
    %c0_i32_1 = arith.constant 0 : i32
    return %c0_i32, %c0_i32_0 : i32, i32
  }
  func.func @transform_5(%arg0: i32) -> (i32, i32) {
    %c0_i32 = arith.constant 0 : i32
    %c0_i32_0 = arith.constant 0 : i32
    %c0_i32_1 = arith.constant 0 : i32
    return %c0_i32, %c0_i32_0 : i32, i32
  }
  func.func @transform_6(%arg0: i32) -> (i32, i32, i32) {
    %c0_i32 = arith.constant 0 : i32
    %c0_i32_0 = arith.constant 0 : i32
    %c0_i32_1 = arith.constant 0 : i32
    %c0_i32_2 = arith.constant 0 : i32
    return %c0_i32, %c0_i32_0, %c0_i32_1 : i32, i32, i32
  }
  func.func @transform_7(%arg0: i32) -> (i32, i32, i32) {
    %c0_i32 = arith.constant 0 : i32
    %c0_i32_0 = arith.constant 0 : i32
    %c0_i32_1 = arith.constant 0 : i32
    %c0_i32_2 = arith.constant 0 : i32
    return %c0_i32, %c0_i32_0, %c0_i32_1 : i32, i32, i32
  }
  func.func @transform_8(%arg0: i32) -> (i32, i32, i32) {
    %c0_i32 = arith.constant 0 : i32
    %c0_i32_0 = arith.constant 0 : i32
    %c0_i32_1 = arith.constant 0 : i32
    %c0_i32_2 = arith.constant 0 : i32
    return %c0_i32, %c0_i32_0, %c0_i32_1 : i32, i32, i32
  }
  func.func @transform_9(%arg0: i32) -> (i32, i32, i32) {
    %c0_i32 = arith.constant 0 : i32
    %c0_i32_0 = arith.constant 0 : i32
    %c0_i32_1 = arith.constant 0 : i32
    %c0_i32_2 = arith.constant 0 : i32
    return %c0_i32, %c0_i32_0, %c0_i32_1 : i32, i32, i32
  }
  func.func @transform_10(%arg0: i32) -> (i32, i32, i32) {
    %c0_i32 = arith.constant 0 : i32
    %c0_i32_0 = arith.constant 0 : i32
    %c0_i32_1 = arith.constant 0 : i32
    %c0_i32_2 = arith.constant 0 : i32
    return %c0_i32, %c0_i32_0, %c0_i32_1 : i32, i32, i32
  }
  func.func @transform_11(%arg0: i32) -> (i32, i32, i32) {
    %c0_i32 = arith.constant 0 : i32
    %c0_i32_0 = arith.constant 0 : i32
    %c0_i32_1 = arith.constant 0 : i32
    %c0_i32_2 = arith.constant 0 : i32
    return %c0_i32, %c0_i32_0, %c0_i32_1 : i32, i32, i32
  }
  func.func @transform_12(%arg0: i32) -> (i32, i32, i32) {
    %c0_i32 = arith.constant 0 : i32
    %c0_i32_0 = arith.constant 0 : i32
    %c0_i32_1 = arith.constant 0 : i32
    %c0_i32_2 = arith.constant 0 : i32
    return %c0_i32, %c0_i32_0, %c0_i32_1 : i32, i32, i32
  }
  func.func @transform_13(%arg0: i32) -> (i32, i32, i32) {
    %c0_i32 = arith.constant 0 : i32
    %c0_i32_0 = arith.constant 0 : i32
    %c0_i32_1 = arith.constant 0 : i32
    %c0_i32_2 = arith.constant 0 : i32
    return %c0_i32, %c0_i32_0, %c0_i32_1 : i32, i32, i32
  }
  func.func @transform_14(%arg0: i32) -> (i32, i32, i32) {
    %c0_i32 = arith.constant 0 : i32
    %c0_i32_0 = arith.constant 0 : i32
    %c0_i32_1 = arith.constant 0 : i32
    %c0_i32_2 = arith.constant 0 : i32
    return %c0_i32, %c0_i32_0, %c0_i32_1 : i32, i32, i32
  }
  func.func @transform_15(%arg0: i32) -> (i32, i32, i32) {
    %c0_i32 = arith.constant 0 : i32
    %c0_i32_0 = arith.constant 0 : i32
    %c0_i32_1 = arith.constant 0 : i32
    %c0_i32_2 = arith.constant 0 : i32
    return %c0_i32, %c0_i32_0, %c0_i32_1 : i32, i32, i32
  }
  func.func @transform_16(%arg0: i32) -> (i32, i32, i32) {
    %c0_i32 = arith.constant 0 : i32
    %c0_i32_0 = arith.constant 0 : i32
    %c0_i32_1 = arith.constant 0 : i32
    %c0_i32_2 = arith.constant 0 : i32
    return %c0_i32, %c0_i32_0, %c0_i32_1 : i32, i32, i32
  }
  func.func @transform_17(%arg0: i32) -> (i32, i32, i32) {
    %c0_i32 = arith.constant 0 : i32
    %c0_i32_0 = arith.constant 0 : i32
    %c0_i32_1 = arith.constant 0 : i32
    %c0_i32_2 = arith.constant 0 : i32
    return %c0_i32, %c0_i32_0, %c0_i32_1 : i32, i32, i32
  }
  func.func @transform_18(%arg0: i32) -> (i32, i32, i32) {
    %c0_i32 = arith.constant 0 : i32
    %c0_i32_0 = arith.constant 0 : i32
    %c0_i32_1 = arith.constant 0 : i32
    %c0_i32_2 = arith.constant 0 : i32
    return %c0_i32, %c0_i32_0, %c0_i32_1 : i32, i32, i32
  }
  func.func @transform_19(%arg0: i32) -> (i32, i32, i32) {
    %c0_i32 = arith.constant 0 : i32
    %c0_i32_0 = arith.constant 0 : i32
    %c0_i32_1 = arith.constant 0 : i32
    %c0_i32_2 = arith.constant 0 : i32
    return %c0_i32, %c0_i32_0, %c0_i32_1 : i32, i32, i32
  }
  func.func @transform_20(%arg0: i32) -> (i32, i32, i32) {
    %c0_i32 = arith.constant 0 : i32
    %c0_i32_0 = arith.constant 0 : i32
    %c0_i32_1 = arith.constant 0 : i32
    %c0_i32_2 = arith.constant 0 : i32
    return %c0_i32, %c0_i32_0, %c0_i32_1 : i32, i32, i32
  }
  func.func @transform_21(%arg0: i32) -> (i32, i32, i32) {
    %c0_i32 = arith.constant 0 : i32
    %c0_i32_0 = arith.constant 0 : i32
    %c0_i32_1 = arith.constant 0 : i32
    %c0_i32_2 = arith.constant 0 : i32
    return %c0_i32, %c0_i32_0, %c0_i32_1 : i32, i32, i32
  }
  func.func @transform_22(%arg0: i32) -> (i32, i32, i32) {
    %c0_i32 = arith.constant 0 : i32
    %c0_i32_0 = arith.constant 0 : i32
    %c0_i32_1 = arith.constant 0 : i32
    %c0_i32_2 = arith.constant 0 : i32
    return %c0_i32, %c0_i32_0, %c0_i32_1 : i32, i32, i32
  }
  func.func @transform_23(%arg0: i32) -> (i32, i32, i32) {
    %c0_i32 = arith.constant 0 : i32
    %c0_i32_0 = arith.constant 0 : i32
    %c0_i32_1 = arith.constant 0 : i32
    %c0_i32_2 = arith.constant 0 : i32
    return %c0_i32, %c0_i32_0, %c0_i32_1 : i32, i32, i32
  }
  func.func @transform_24(%arg0: i32) -> (i32, i32, i32) {
    %c0_i32 = arith.constant 0 : i32
    %c0_i32_0 = arith.constant 0 : i32
    %c0_i32_1 = arith.constant 0 : i32
    %c0_i32_2 = arith.constant 0 : i32
    return %c0_i32, %c0_i32_0, %c0_i32_1 : i32, i32, i32
  }
  func.func @transform_25(%arg0: i32) -> (i32, i32, i32) {
    %c0_i32 = arith.constant 0 : i32
    %c0_i32_0 = arith.constant 0 : i32
    %c0_i32_1 = arith.constant 0 : i32
    %c0_i32_2 = arith.constant 0 : i32
    return %c0_i32, %c0_i32_0, %c0_i32_1 : i32, i32, i32
  }
  func.func @transform_26(%arg0: i32) -> (i32, i32, i32) {
    %c0_i32 = arith.constant 0 : i32
    %c0_i32_0 = arith.constant 0 : i32
    %c0_i32_1 = arith.constant 0 : i32
    %c0_i32_2 = arith.constant 0 : i32
    return %c0_i32, %c0_i32_0, %c0_i32_1 : i32, i32, i32
  }
  func.func @transform_27(%arg0: i32) -> (i32, i32, i32) {
    %c0_i32 = arith.constant 0 : i32
    %c0_i32_0 = arith.constant 0 : i32
    %c0_i32_1 = arith.constant 0 : i32
    %c0_i32_2 = arith.constant 0 : i32
    return %c0_i32, %c0_i32_0, %c0_i32_1 : i32, i32, i32
  }
  func.func @transform_28(%arg0: i32) -> (i32, i32, i32) {
    %c0_i32 = arith.constant 0 : i32
    %c0_i32_0 = arith.constant 0 : i32
    %c0_i32_1 = arith.constant 0 : i32
    %c0_i32_2 = arith.constant 0 : i32
    return %c0_i32, %c0_i32_0, %c0_i32_1 : i32, i32, i32
  }
  func.func @transform_29(%arg0: i32) -> (i32, i32, i32) {
    %c0_i32 = arith.constant 0 : i32
    %c0_i32_0 = arith.constant 0 : i32
    %c0_i32_1 = arith.constant 0 : i32
    %c0_i32_2 = arith.constant 0 : i32
    return %c0_i32, %c0_i32_0, %c0_i32_1 : i32, i32, i32
  }
  func.func @transform_30(%arg0: i32) -> (i32, i32, i32) {
    %c0_i32 = arith.constant 0 : i32
    %c0_i32_0 = arith.constant 0 : i32
    %c0_i32_1 = arith.constant 0 : i32
    %c0_i32_2 = arith.constant 0 : i32
    return %c0_i32, %c0_i32_0, %c0_i32_1 : i32, i32, i32
  }
  func.func @transform_31(%arg0: i32) -> (i32, i32, i32) {
    %c0_i32 = arith.constant 0 : i32
    %c0_i32_0 = arith.constant 0 : i32
    %c0_i32_1 = arith.constant 0 : i32
    %c0_i32_2 = arith.constant 0 : i32
    return %c0_i32, %c0_i32_0, %c0_i32_1 : i32, i32, i32
  }
  func.func @transform_32(%arg0: i32) -> (i32, i32, i32) {
    %c0_i32 = arith.constant 0 : i32
    %c0_i32_0 = arith.constant 0 : i32
    %c0_i32_1 = arith.constant 0 : i32
    %c0_i32_2 = arith.constant 0 : i32
    return %c0_i32, %c0_i32_0, %c0_i32_1 : i32, i32, i32
  }
  func.func @transform_33(%arg0: i32) -> (i32, i32, i32) {
    %c0_i32 = arith.constant 0 : i32
    %c0_i32_0 = arith.constant 0 : i32
    %c0_i32_1 = arith.constant 0 : i32
    %c0_i32_2 = arith.constant 0 : i32
    return %c0_i32, %c0_i32_0, %c0_i32_1 : i32, i32, i32
  }
  func.func @transform_34(%arg0: i32) -> (i32, i32, i32) {
    %c0_i32 = arith.constant 0 : i32
    %c0_i32_0 = arith.constant 0 : i32
    %c0_i32_1 = arith.constant 0 : i32
    %c0_i32_2 = arith.constant 0 : i32
    return %c0_i32, %c0_i32_0, %c0_i32_1 : i32, i32, i32
  }
  func.func @transform_35(%arg0: i32) -> (i32, i32, i32) {
    %c0_i32 = arith.constant 0 : i32
    %c0_i32_0 = arith.constant 0 : i32
    %c0_i32_1 = arith.constant 0 : i32
    %c0_i32_2 = arith.constant 0 : i32
    return %c0_i32, %c0_i32_0, %c0_i32_1 : i32, i32, i32
  }
  func.func @transform_36(%arg0: i32) -> (i32, i32, i32) {
    %c0_i32 = arith.constant 0 : i32
    %c0_i32_0 = arith.constant 0 : i32
    %c0_i32_1 = arith.constant 0 : i32
    %c0_i32_2 = arith.constant 0 : i32
    return %c0_i32, %c0_i32_0, %c0_i32_1 : i32, i32, i32
  }
  func.func @transform_37(%arg0: i32) -> (i32, i32, i32) {
    %c0_i32 = arith.constant 0 : i32
    %c0_i32_0 = arith.constant 0 : i32
    %c0_i32_1 = arith.constant 0 : i32
    %c0_i32_2 = arith.constant 0 : i32
    return %c0_i32, %c0_i32_0, %c0_i32_1 : i32, i32, i32
  }
  func.func @transform_38(%arg0: i32) -> (i32, i32) {
    %c0_i32 = arith.constant 0 : i32
    %c0_i32_0 = arith.constant 0 : i32
    %c0_i32_1 = arith.constant 0 : i32
    return %c0_i32, %c0_i32_0 : i32, i32
  }
  func.func @transform_39(%arg0: i32) -> (i32, i32) {
    %c0_i32 = arith.constant 0 : i32
    %c0_i32_0 = arith.constant 0 : i32
    %c0_i32_1 = arith.constant 0 : i32
    return %c0_i32, %c0_i32_0 : i32, i32
  }
  func.func @transform_40(%arg0: i32) -> (i32, i32) {
    %c0_i32 = arith.constant 0 : i32
    %c0_i32_0 = arith.constant 0 : i32
    %c0_i32_1 = arith.constant 0 : i32
    return %c0_i32, %c0_i32_0 : i32, i32
  }
  func.func @transform_41(%arg0: i32) -> (i32, i32) {
    %c0_i32 = arith.constant 0 : i32
    %c0_i32_0 = arith.constant 0 : i32
    %c0_i32_1 = arith.constant 0 : i32
    return %c0_i32, %c0_i32_0 : i32, i32
  }
  func.func @transform_42(%arg0: i32) -> (i32, i32, i32) {
    %c0_i32 = arith.constant 0 : i32
    %c0_i32_0 = arith.constant 0 : i32
    %c0_i32_1 = arith.constant 0 : i32
    return %arg0, %c0_i32, %c0_i32_0 : i32, i32, i32
  }
}

</mosaic_0001>

<bundles_post_ra>
// kernel: forward.1
= control target key start
LH: loop header
LB: loop body
LE: loop exit
PB: predicated region body
PF: predicated region fallthrough
CT: control target
= control target key end

     0   :  { %s10583_s6 = smov 1   ;;  %s10584_s10 = smov 2   ;;  %s12007_s0 = inlined_call_operand.smem [shape: u32[43], index: -1, kind: input, shape index: {}] }
   0x1   :  { %s10654_s5 = sld [smem:[%s12007_s0]]   ;;  %s10585_s14 = smov 3  }
   0x2   :  { %s10659_s9 = sld [smem:[%s12007_s0 + %s10583_s6]]   ;;  %s10586_s18 = smov 4  }
   0x3   :  { %s10664_s13 = sld [smem:[%s12007_s0 + %s10584_s10]]   ;;  %s10587_s22 = smov 5  }
   0x4   :  { %s10669_s17 = sld [smem:[%s12007_s0 + %s10585_s14]]   ;;  %s10588_s26 = smov 6  }
   0x5   :  { %s10674_s21 = sld [smem:[%s12007_s0 + %s10586_s18]]   ;;  %s10589_s30 = smov 7  }
   0x6   :  { %s10679_s25 = sld [smem:[%s12007_s0 + %s10587_s22]]   ;;  %s10590_s4 = smov 8  }
   0x7   :  { %12090 = sst [smem:[#allocation11_spill]] %s10654_s5  ;;  %s10591_s10 = smov 9  }
   0x8   :  { %12091 = sst [smem:[#allocation12_spill]] %s10659_s9  ;;  %s10592_s15 = smov 10  }
   0x9   :  { %12092 = sst [smem:[#allocation13_spill]] %s10664_s13  ;;  %s10593_s20 = smov 11  }
   0xa   :  { %12093 = sst [smem:[#allocation14_spill]] %s10669_s17  ;;  %s10595_s1 = smov 13  }
   0xb   :  { %12094 = sst [smem:[#allocation15_spill]] %s10674_s21  ;;  %s10596_s7 = smov 14  }
   0xc   :  { %12095 = sst [smem:[#allocation16_spill]] %s10679_s25  ;;  %s10598_s22 = smov 16  }
   0xd   :  { %s10684_s29 = sld [smem:[%s12007_s0 + %s10588_s26]]   ;;  %s10594_s26 = smov 12  }
   0xe   :  { %s10689_s3 = sld [smem:[%s12007_s0 + %s10589_s30]]   ;;  %s10599_s28 = smov 17  }
   0xf   :  { %s10694_s8 = sld [smem:[%s12007_s0 + %s10590_s4]]  }
  0x10   :  { %s10699_s14 = sld [smem:[%s12007_s0 + %s10591_s10]]  }
  0x11   :  { %s10704_s19 = sld [smem:[%s12007_s0 + %s10592_s15]]   ;;  %s10597_s15 = smov 15  }
  0x12   :  { %s10709_s24 = sld [smem:[%s12007_s0 + %s10593_s20]]  }
  0x13   :  { %12096 = sst [smem:[#allocation17_spill]] %s10684_s29 }
  0x14   :  { %12097 = sst [smem:[#allocation18_spill]] %s10689_s3 }
  0x15   :  { %12098 = sst [smem:[#allocation19_spill]] %s10694_s8 }
  0x16   :  { %12099 = sst [smem:[#allocation20_spill]] %s10699_s14 }
  0x17   :  { %12100 = sst [smem:[#allocation21_spill]] %s10704_s19 }
  0x18   :  { %12101 = sst [smem:[#allocation22_spill]] %s10709_s24 }
  0x19   :  { %s10714_s30 = sld [smem:[%s12007_s0 + %s10594_s26]]  }
  0x1a   :  { %s10719_s6 = sld [smem:[%s12007_s0 + %s10595_s1]]  }
  0x1b   :  { %s10724_s12 = sld [smem:[%s12007_s0 + %s10596_s7]]   ;;  %s10600_s7 = smov 18  }
  0x1c   :  { %s10729_s20 = sld [smem:[%s12007_s0 + %s10597_s15]]   ;;  %s10601_s15 = smov 19  }
  0x1d   :  { %s10734_s27 = sld [smem:[%s12007_s0 + %s10598_s22]]   ;;  %s10602_s22 = smov 20  }
  0x1e   :  { %s10739_s4 = sld [smem:[%s12007_s0 + %s10599_s28]]   ;;  %s10603_s28 = smov 21  }
  0x1f   :  { %12102 = sst [smem:[#allocation23_spill]] %s10714_s30 }
  0x20   :  { %12103 = sst [smem:[#allocation24_spill]] %s10719_s6 }
  0x21   :  { %12104 = sst [smem:[#allocation25_spill]] %s10724_s12 }
  0x22   :  { %12105 = sst [smem:[#allocation26_spill]] %s10729_s20 }
  0x23   :  { %12106 = sst [smem:[#allocation27_spill]] %s10734_s27 }
  0x24   :  { %12107 = sst [smem:[#allocation28_spill]] %s10739_s4 }
  0x25   :  { %s10744_s13 = sld [smem:[%s12007_s0 + %s10600_s7]]   ;;  %s10604_s7 = smov 22  }
  0x26   :  { %s10749_s20 = sld [smem:[%s12007_s0 + %s10601_s15]]   ;;  %s10605_s15 = smov 23  }
  0x27   :  { %s10754_s27 = sld [smem:[%s12007_s0 + %s10602_s22]]   ;;  %s10606_s22 = smov 24  }
  0x28   :  { %s10759_s4 = sld [smem:[%s12007_s0 + %s10603_s28]]   ;;  %s10607_s28 = smov 25  }
  0x2b   :  { %12108 = sst [smem:[#allocation29_spill]] %s10744_s13 }
  0x2c   :  { %12109 = sst [smem:[#allocation30_spill]] %s10749_s20 }
  0x2d   :  { %12110 = sst [smem:[#allocation31_spill]] %s10754_s27 }
  0x2e   :  { %12111 = sst [smem:[#allocation32_spill]] %s10759_s4 }
  0x2f   :  { %s10764_s13 = sld [smem:[%s12007_s0 + %s10604_s7]]   ;;  %s10608_s7 = smov 26  }
  0x30   :  { %s10769_s20 = sld [smem:[%s12007_s0 + %s10605_s15]]   ;;  %s10609_s15 = smov 27  }
  0x31   :  { %s10774_s27 = sld [smem:[%s12007_s0 + %s10606_s22]]   ;;  %s10610_s22 = smov 28  }
  0x32   :  { %s10779_s4 = sld [smem:[%s12007_s0 + %s10607_s28]]   ;;  %s10611_s28 = smov 29  }
  0x35   :  { %12112 = sst [smem:[#allocation33_spill]] %s10764_s13 }
  0x36   :  { %12113 = sst [smem:[#allocation34_spill]] %s10769_s20 }
  0x37   :  { %12114 = sst [smem:[#allocation35_spill]] %s10774_s27 }
  0x38   :  { %12115 = sst [smem:[#allocation36_spill]] %s10779_s4 }
  0x39   :  { %s10784_s13 = sld [smem:[%s12007_s0 + %s10608_s7]]   ;;  %s10612_s7 = smov 30  }
  0x3a   :  { %s10789_s20 = sld [smem:[%s12007_s0 + %s10609_s15]]   ;;  %s10613_s15 = smov 31  }
  0x3b   :  { %s10794_s27 = sld [smem:[%s12007_s0 + %s10610_s22]]   ;;  %s10614_s22 = smov 32  }
  0x3c   :  { %s10799_s4 = sld [smem:[%s12007_s0 + %s10611_s28]]   ;;  %s10615_s28 = smov 33  }
  0x3f   :  { %12116 = sst [smem:[#allocation37_spill]] %s10784_s13 }
  0x40   :  { %12117 = sst [smem:[#allocation38_spill]] %s10789_s20 }
  0x41   :  { %12118 = sst [smem:[#allocation39_spill]] %s10794_s27 }
  0x42   :  { %12119 = sst [smem:[#allocation40_spill]] %s10799_s4 }
  0x43   :  { %s10804_s13 = sld [smem:[%s12007_s0 + %s10612_s7]]   ;;  %s10616_s7 = smov 34  }
  0x44   :  { %s10809_s20 = sld [smem:[%s12007_s0 + %s10613_s15]]   ;;  %s10617_s15 = smov 35  }
  0x45   :  { %s10814_s27 = sld [smem:[%s12007_s0 + %s10614_s22]]   ;;  %s10618_s22 = smov 36  }
  0x46   :  { %s10819_s4 = sld [smem:[%s12007_s0 + %s10615_s28]]   ;;  %s10619_s28 = smov 37  }
  0x49   :  { %12120 = sst [smem:[#allocation41_spill]] %s10804_s13 }
  0x4a   :  { %12121 = sst [smem:[#allocation42_spill]] %s10809_s20 }
  0x4b   :  { %12122 = sst [smem:[#allocation43_spill]] %s10814_s27 }
  0x4c   :  { %12123 = sst [smem:[#allocation44_spill]] %s10819_s4 }
  0x4d   :  { %s10824_s13 = sld [smem:[%s12007_s0 + %s10616_s7]]   ;;  %s10620_s7 = smov 38  }
  0x4e   :  { %s10829_s20 = sld [smem:[%s12007_s0 + %s10617_s15]]   ;;  %s10621_s15 = smov 39  }
  0x4f   :  { %s10834_s27 = sld [smem:[%s12007_s0 + %s10618_s22]]   ;;  %s10622_s22 = smov 40  }
  0x50   :  { %s10839_s4 = sld [smem:[%s12007_s0 + %s10619_s28]]   ;;  %s10623_s28 = smov 41  }
  0x53   :  { %12124 = sst [smem:[#allocation45_spill]] %s10824_s13 }
  0x54   :  { %12125 = sst [smem:[#allocation46_spill]] %s10829_s20 }
  0x55   :  { %12126 = sst [smem:[#allocation47_spill]] %s10834_s27 }
  0x56   :  { %12127 = sst [smem:[#allocation48_spill]] %s10839_s4 }
  0x57   :  { %s10844_s13 = sld [smem:[%s12007_s0 + %s10620_s7]]   ;;  %s10624_s7 = smov 42  }
  0x58   :  { %s10849_s20 = sld [smem:[%s12007_s0 + %s10621_s15]]  }
  0x59   :  { %s10854_s27 = sld [smem:[%s12007_s0 + %s10622_s22]]  }
  0x5a   :  { %s10859_s4 = sld [smem:[%s12007_s0 + %s10623_s28]]  }
  0x5d   :  { %12128 = sst [smem:[#allocation49_spill]] %s10844_s13 }
  0x5e   :  { %12129 = sst [smem:[#allocation50_spill]] %s10849_s20 }
  0x5f   :  { %12130 = sst [smem:[#allocation51_spill]] %s10854_s27 }
  0x60   :  { %12131 = sst [smem:[#allocation52_spill]] %s10859_s4 }
  0x61   :  { %s10864_s13 = sld [smem:[%s12007_s0 + %s10624_s7]]  }
  0x67   :  { %12132 = sst [smem:[#allocation53_spill]] %s10864_s13 }
  0x68   :  { %90 = vsyncpa [#allocation3], 0 }
  0x69   :  { %91 = vsyncpa [#allocation6], 0 }
  0x6a   :  { %92 = vsyncpa [#allocation4], 0 }
  0x6b   :  { %94 = vsyncpa [#allocation4 + $0x1], 0  ;;  %s10866_s15 = smov 0   ;;  %s10868_s16 = smov 0  }
  0x6c   :  { %s10870_s18 = smov 0   ;;  %s10872_s22 = smov 0  }
  0x6d LB: > { %s12133_s30 = sld [smem:[#allocation23_spill]]  ;;  %s12134_s24 = sld [smem:[#allocation22_spill]]  ;;  %s10577_s18 = sphi %s10870_s18, %s12235_s18   ;;  %s10573_s16 = sphi %s10868_s16, %s12234_s16   ;;  %s10569_s15 = sphi %s10866_s15, %s12233_s15   ;;  %s10581_s22 = sphi %s10872_s22, %s12232_s22  }
  0x6e   : > { %s12135_s19 = sld [smem:[#allocation21_spill]]  ;;  %s12136_s6 = sld [smem:[#allocation24_spill]] }
  0x6f   : > { %s12137_s12 = sld [smem:[#allocation25_spill]]  ;;  %s12138_s14 = sld [smem:[#allocation20_spill]] }
  0x70   : > { %s12139_s29 = sld [smem:[#allocation17_spill]]  ;;  %s12140_s8 = sld [smem:[#allocation19_spill]] }
  0x71   : > { %s12141_s20 = sld [smem:[#allocation50_spill]]  ;;  %s12142_s4 = sld [smem:[#allocation52_spill]] }
  0x72   : > { %s12143_s3 = sld [smem:[#allocation18_spill]]  ;;  %12145 = sst [smem:[#allocation55_spill]] %s10573_s16 }
  0x73   : > { %12144 = sst [smem:[#allocation54_spill]] %s10569_s15  ;;  %s10887_s0 = sadd.s32 4294967295, %s10581_s22  }
  0x74   : > { %12146 = sst [smem:[#allocation56_spill]] %s10577_s18  ;;  %s8505_s23 = sadd.s32 4294967294, %s10581_s22  }
  0x75   : > { %12147 = sst [smem:[#allocation57_spill]] %s10581_s22  ;;  %s10891_s26 = sadd.s32 1, %s10581_s22  }
  0x76   : > { %12148 = sst [smem:[#allocation58_spill]] %s10887_s0  ;;  %s1009_s28 = sadd.s32 1, %s10577_s18 }
  0x77   : > { %12149 = sst [smem:[#allocation59_spill]] %s10891_s26  ;;  %s1006_s1 = ssub.s32 %s10581_s22, %s10891_s26 }
  0x78   : > { %p1019_p0 = scmp.ne.s32.totalorder %s10577_s18, %s10573_s16  ;;  %p1007_p1 = scmp.eq.s32.totalorder %s1006_s1, 0 }
  0x79   : > { %p1020_p2 = scmp.eq.s32.totalorder %s10887_s0, 1  ;;  %p1025_p3 = scmp.ne.s32.totalorder %s10573_s16, %s10569_s15 }
  0x7a   : > { %p1026_p4 = scmp.eq.s32.totalorder %s8505_s23, 1  ;;  %p8506_p7 = scmp.ge.s32.totalorder %s10581_s22, 1 }
  0x7b   : > { %s10902_s2 = scalar_select %p1007_p1, %s10577_s18, %s1009_s28  }
  0x7c   : > { %p10904_p5 = por %p1020_p2, %p1019_p0  ;;  %p10908_p6 = por %p1026_p4, %p1025_p3 }
  0x7d   : > { %12150 = sst [smem:[#allocation60_spill]] %s10902_s2  ;;  %p1033_p8 = scmp.lt.s32.totalorder %s10581_s22, 3 }
  0x7e   : > { %s12151_s7 = scalar_select %p10904_p5, 1, 0 }
  0x7f   : > { %s12153_s10 = scalar_select %p10908_p6, 1, 0 }
  0x80   : > { %12152 = sst [smem:[#allocation61_spill]] %s12151_s7  ;;  %p12034_p9 = scmp.eq.s32.totalorder %s10887_s0, 0 }
  0x81   : > { %12154 = sst [smem:[#allocation62_spill]] %s12153_s10  ;;  %p10915_p10 = pnand %p8506_p7, %p1033_p8 }
  0x82   : > { %s10625_s23 = smov [#allocation2]   ;;  %s10626_s1 = smov [#allocation5]  }
  0x83   : > { %s12155_s11 = scalar_select %p10915_p10, 1, 0 }
  0x84   : > { %s1151_s28 = sshll.u32 %s10625_s23, 4  ;;  %p10025_p11 = pneg %p10915_p10  ;;  %s1152_s28 = int_to_ptr.vmem [resolvable:$true] %s1151_s28 }
  0x85   : > { %s1165_s2 = sshll.u32 %s10626_s1, 4  ;;  %s10455_s26 = scalar_lea.hbm %s12141_s20, 16  ;;  %s10927_s2 = int_to_ptr.vmem [resolvable:$true] %s1165_s2 }
  0x86   : > { %p10923_p12 = pnand %p12034_p9, %p10025_p11  ;;  %p10456_p13 = scmp.ne.s32.totalorder %s12141_s20, %s10455_s26 }
  0x87   : > { %p10462_p3 = scmp.lt.u32.totalorder %s10455_s26, %s12141_s20 }
  0x88   : > { %p10457_p0 = pneg %p10923_p12 }
  0x8a   : > { %p10458_p1 = pnand %p10457_p0, %p10456_p13 }
  0x8c   : > { %p10459_p2 = pneg %p10458_p1 }
  0x8e   : > { %p10464_p4 = pnand %p10462_p3, %p10459_p2 }
  0x90   : > { %10467 = shalt.err (!%p10464_p4)
}
  0x91   : > { %s10468_s23 = scalar_lea.vmem %s1152_s28, 16  ;;  %s10475_s1 = scalar_lea.vmem %s1152_s28, 32 }
  0x92   : > { %p10469_p7 = scmp.ne.s32.totalorder %s1152_s28, %s10468_s23  ;;  %p10476_p9 = scmp.lt.s32.totalorder %s1152_s28, %s1152_s28 }
  0x93   : > { %p10477_p6 = scmp.lt.s32.totalorder %s10475_s1, %s10468_s23 }
  0x94   : > { %p10471_p8 = pnand %p10469_p7, %p10457_p0 }
  0x95   : > { %p10478_p5 = por %p10477_p6, %p10476_p9 }
  0x96   : > { %p10472_p11 = pneg %p10471_p8 }
  0x98   : > { %p10479_p10 = pnand %p10478_p5, %p10472_p11 }
  0x9a   : > { %10482 = shalt.err (!%p10479_p10)
}
  0x9b   : > { %10028 = dma.hbm_to_vmem [thread:$0]  (!%p10923_p12), %s12141_s20, 16, %s1152_s28, [#allocation3]  }
  0x9c   : > { %s10483_s26 = scalar_lea.hbm %s12142_s4, 16 }
  0x9d   : > { %p10484_p13 = scmp.ne.s32.totalorder %s12142_s4, %s10483_s26  ;;  %p10490_p3 = scmp.lt.u32.totalorder %s10483_s26, %s12142_s4 }
  0x9f   : > { %p10486_p1 = pnand %p10484_p13, %p10457_p0 }
  0xa1   : > { %p10487_p2 = pneg %p10486_p1 }
  0xa3   : > { %p10492_p4 = pnand %p10490_p3, %p10487_p2 }
  0xa5   : > { %10495 = shalt.err (!%p10492_p4)
}
  0xa6   : > { %s10496_s23 = scalar_lea.vmem %s10927_s2, 16  ;;  %s10503_s28 = scalar_lea.vmem %s10927_s2, 32 }
  0xa7   : > { %p10497_p5 = scmp.ne.s32.totalorder %s10927_s2, %s10496_s23  ;;  %p10504_p10 = scmp.lt.s32.totalorder %s10927_s2, %s10927_s2 }
  0xa8   : > { %p10505_p7 = scmp.lt.s32.totalorder %s10503_s28, %s10496_s23 }
  0xa9   : > { %p10499_p6 = pnand %p10497_p5, %p10457_p0 }
  0xaa   : > { %p10506_p8 = por %p10505_p7, %p10504_p10 }
  0xab   : > { %p10500_p9 = pneg %p10499_p6 }
  0xad   : > { %p10507_p11 = pnand %p10506_p8, %p10500_p9 }
  0xaf   : > { %10510 = shalt.err (!%p10507_p11)
}
  0xb0   : > { %10031 = dma.hbm_to_vmem [thread:$0]  (!%p10923_p12), %s12142_s4, 16, %s10927_s2, [#allocation6]  }
  0xb1   : > { %p12157_p13 = scmp.ne.s32.totalorder %s12155_s11, 0 }
  0xb2   : > { %p12158_p1 = scmp.eq.s32.totalorder (!%p12157_p13), %s10887_s0, 0 }
  0xb3   : > { %1205 = sbr.rel (%p12157_p13) target bundleno = 15960 (0x3e58), region = 188 }
  0xba   : > { %10556 = dma.done.wait (%p12158_p1), [#allocation3], 16   ;;  %p12159_p0 = pmov %p12158_p1 }
  0xbc   : > { %10558 = vsyncadd (%p12159_p0), [#allocation3], 4294967280  ;;  %p12160_p2 = pmov %p12159_p0 }
  0xbd   : > { %p12161_p3 = pmov %p12159_p0 }
  0xbe   : > { %10560 = dma.done.wait (%p12160_p2), [#allocation6], 16  }
  0xbf   : > { %10562 = vsyncadd (%p12161_p3), [#allocation6], 4294967280  ;;  %s12162_s5 = sld [smem:[#allocation11_spill]]  ;;  %s12163_s17 = sld [smem:[#allocation14_spill]]  ;;  %v1389_v0 = vlaneseq  ;;  %vm1340_vm1 = vcmask 261120   ;;  %vm1344_vm2 = vcmask 254976  }
  0xc0   : > { %p1321_p12 = scmp.lt.s32.totalorder %s10887_s0, 1  ;;  %v10627_v8 = vmov 0.0   ;;  %v1394_v24 = vld [vmem:[%s12139_s29] sm:$0xff]  ;;  %v1395_v25 = vld [vmem:[%s12139_s29 + $0x8] sm:$0xff]  ;;  %v1396_v26 = vld [vmem:[%s12139_s29 + $0x10] sm:$0xff]  ;;  %s12164_s21 = sld [smem:[#allocation15_spill]] }
  0xc1   : > { %v10975_v1 = vshrl.u32 %v1389_v0, 7  ;;  %v4056_v2 = vand.u32 127, %v1389_v0  ;;  %v9669_v27 = vpack.c.bf16 %v1395_v25, %v1394_v24  ;;  %v1397_v28 = vld [vmem:[%s12139_s29 + $0x18] sm:$0xff]  ;;  %s12165_s25 = sld [smem:[#allocation16_spill]]  ;;  %v8519_v46 = vld [vmem:[%s12143_s3] ss:$0 sm:$0xff] }
  0xc2   : > { %s10973_s18 = scalar_select %p1321_p12, %s10887_s0, 1  ;;  %v9673_v29 = vpack.c.bf16 %v1397_v28, %v1396_v26  ;;  %vm1499_vm4 = vcmask 64512   ;;  %vm1616_vm5 = vcmask 1041408   ;;  %vm10632_vm7 = vmmov 1  }
  0xc3   : > { %vm4057_vm0 = vcmp.gt.s32.totalorder %v4056_v2, %v10975_v1  ;;  %v1391_v6 = vsub.s32 0, %v10975_v1  ;;  %9670 = vmatprep.subr.bf16.mxu0 %v9669_v27  ;;  %s12037_s26 = smov 64   ;;  %s12061_s23 = smov 96   ;;  %vm11026_vm6 = vmpackc.low %vm1499_vm4, %vm1499_vm4  ;;  %vm1589_vm10 = vcmask 74752   ;;  %vm1585_vm11 = vcmask 80896  }
  0xc4   : > { %s8794_s2 = sshll.u32 %s10973_s18, 4  ;;  %v4058_v10 = vsel %vm4057_vm0, -1e+30, %v10627_v8  ;;  %9672 = vmatpush3.bf16.msra.mxu0 %v9669_v27  ;;  %s12063_s28 = smov 88   ;;  %vm11030_vm8 = vmpackc.low %vm1616_vm5, %vm10632_vm7  ;;  %vm2327_vm12 = vcmask 130048   ;;  %vm2330_vm13 = vcmask 195584  }
  0xc5   : > { %s1325_s11 = scalar_lea.vmem %s12162_s5, %s8794_s2  ;;  %s1335_s1 = scalar_lea.vmem %s12163_s17, %s10973_s18  ;;  %9674 = vmatprep.subr.bf16.mxu0 %v9673_v29  ;;  %vm2591_vm14 = vcmask 523264   ;;  %vm10644_vm15 = vmmov 0  }
  0xc6   : > { %v1336_v3 = vld [vmem:[%s1325_s11] sm:$0xff]  ;;  %v1337_v7 = vld [vmem:[%s1325_s11 + $0x8] sm:$0x3]  ;;  %s12059_s2 = smov 120   ;;  %s12166_s9 = sld [smem:[#allocation12_spill]] }
  0xc7   : > { %v4050_v4 = vld [vmem:[%s1335_s1] sm:$0x1]  ;;  %v1341_v5 = vsel %vm1340_vm1, %v1336_v3, 0.0  ;;  %v1345_v12 = vsel %vm1344_vm2, %v1337_v7, 0.0  ;;  %s12039_s1 = smov 80   ;;  %s12178_s4 = smov 72  }
  0xc8   : > { %vm4051_vm3 = vcmp.eq.s32.totalorder %v4050_v4, 0  ;;  %1342 = vadd.xlane.f32.xlu0 %v1341_v5  ;;  %9676 = vmatpush3.bf16.msra.mxu0 %v9673_v29  ;;  %v8517_v37 = vld [vmem:[%s12164_s21] ss:$0 sm:$0xff]  ;;  %s12179_s5 = smov 104   ;;  %s12181_s17 = smov 40  }
  0xc9   : > { %v4052_v9 = vsel %vm4051_vm3, -1e+30, %v10627_v8  ;;  %v8518_v39 = vld [vmem:[%s12165_s25] ss:$0 sm:$0xff]  ;;  %s12182_s20 = smov 16   ;;  %s12183_s21 = smov 8  }
  0xca   : > { %v4063_v11 = vrot.slane %v4052_v9, %v1391_v6  ;;  %s12184_s25 = smov 24   ;;  %s12199_s15 = sld [smem:[#allocation36_spill]] }
  0xcb   : > { %s12201_s22 = sld [smem:[#allocation38_spill]]  ;;  %s12207_s16 = sld [smem:[#allocation47_spill]] }
  0xcc   : > { %v10989_v13 = vadd.f32 %v4063_v11, %v4058_v10  ;;  %1346 = vadd.xlane.f32.xlu0 %v1345_v12  ;;  %s1328_s11 = scalar_lea.vmem %s12166_s9, %s10973_s18  ;;  %s12180_s9 = smov 48  }
  0xcd   : > { %v1385_v5 = vld [vmem:[%s1328_s11] sm:$0x1]  ;;  %s12043_s11 = smov 112   ;;  %s12214_s7 = sld [smem:[#allocation48_spill]] }
  0xce   : > { %vm1386_vm9 = vcmp.eq.s32.totalorder %v1385_v5, 0 }
 0x155   : > { %v1343_v14 = vpop.xlane.xlu0 %1342 }
 0x156   : > { %v1349_v15 = vmul.f32 0.03125, %v1343_v14 }
 0x158   : > { %v1351_v16 = vsub.f32 %v1336_v3, %v1349_v15 }
 0x159   : > { %v1347_v17 = vpop.xlane.xlu0 %1346 }
 0x15a   : > { %v1350_v18 = vmul.f32 0.03125, %v1347_v17  ;;  %v1353_v19 = vmul.f32 %v1351_v16, %v1351_v16 }
 0x15c   : > { %v1352_v20 = vsub.f32 %v1337_v7, %v1350_v18  ;;  %v1355_v21 = vsel %vm1340_vm1, %v1353_v19, 0.0  ;;  %v1387_v7 = vsel %vm1386_vm9, -1e+30, %v10627_v8 }
 0x15d   : > { %1356 = vadd.xlane.f32.xlu1 %v1355_v21  ;;  %v11051_v9 = vrot.slane %v1387_v7, %v1391_v6 }
 0x15e   : > { %v1354_v22 = vmul.f32 %v1352_v20, %v1352_v20 }
 0x160   : > { %v1358_v23 = vsel %vm1344_vm2, %v1354_v22, 0.0 }
 0x161   : > { %1359 = vadd.xlane.f32.xlu1 %v1358_v23 }
 0x1ea   : > { %v1357_v30 = vpop.xlane.xlu1 %1356 }
 0x1eb   : > { %v1361_v31 = vmul.f32 0.03125, %v1357_v30 }
 0x1ed   : > { %v1363_v32 = vadd.f32 1e-12, %v1361_v31 }
 0x1ee   : > { %v1360_v33 = vpop.xlane.xlu1 %1359 }
 0x1ef   : > { %10285 = vrsqrt.f32 %v1363_v32  ;;  %v1362_v34 = vmul.f32 0.03125, %v1360_v33 }
 0x1f1   : > { %v1364_v35 = vadd.f32 1e-12, %v1362_v34 }
 0x1f3   : > { %10287 = vrsqrt.f32 %v1364_v35 }
 0x1f9   : > { %v10286_v36 = vpop.eup %10285 }
 0x1fa   : > { %v1367_v38 = vmul.f32 %v10286_v36, %v1351_v16 }
 0x1fc   : > { %v1375_v40 = vmul.f32 %v8517_v37, %v1367_v38 }
 0x1fd   : > { %v10288_v41 = vpop.eup %10287 }
 0x1fe   : > { %v1368_v42 = vmul.f32 %v10288_v41, %v1352_v20  ;;  %v10999_v43 = vadd.f32 %v8518_v39, %v1375_v40 }
 0x200   : > { %v1376_v44 = vmul.f32 %v8517_v37, %v1368_v42  ;;  %9088 = vmatprep.mubr.msk.f32.mxu0 %vm1340_vm1, %v10999_v43 }
 0x202   : > { %v11003_v45 = vadd.f32 %v8518_v39, %v1376_v44 }
 0x204   : > { %9089 = vmatmul.mubr.msk.f32.vlgmr.msra.gmra.mrb[0].mxu0 %vm1340_vm1, %v11003_v45 }
 0x2d7   : > { %v9090_v47 = vpop.f32.mrb[0].mxu0 }
 0x2d8   : > { %v1483_v48 = vadd.f32 %v9090_v47, %v8519_v46  ;;  %v1477_v49 = vpop.f32.mrb[1].mxu0 }
 0x2d9   : > { %v1478_v50 = vadd.f32 %v8519_v46, %v1477_v49 }
 0x2da   : > { %v11020_v53 = vmul.f32 0.35355338, %v1483_v48 }
 0x2db   : > { %v11008_v51 = vpack.i.bf16 %v1483_v48, %v1478_v50  ;;  %v11010_v52 = vmul.f32 0.35355338, %v1478_v50 }
 0x2dd   : > { %10141 = vrot.lane.b32.xlu1 %v11008_v51, %s12037_s26  ;;  %10136 = vrot.lane.b32.xlu0 %v11008_v51, %s12061_s23  ;;  %s12057_s26 = smov 56  }
 0x2de   : > { %9095 = vmatprep.mubr.msk.f32.mxu1 %vm1499_vm4, %v11010_v52 }
 0x2e1   : > { %10146 = vrot.lane.b32.xlu0 %v11008_v51, %s12063_s28 }
 0x2e5   : > { %1700 = vrot.lane.b32.xlu0 %v11020_v53, %s12059_s2 }
 0x34f   : > { %v10142_v54 = vpop.permute.xlu1 %10141  ;;  %v10137_v55 = vpop.permute.xlu0 %10136 }
 0x350   : > { %v10144_v56 = vunpack.i.h.bf16 %v10142_v54  ;;  %v10143_v57 = vunpack.i.l.bf16 %v10142_v54  ;;  %v10139_v58 = vunpack.i.h.bf16 %v10137_v55  ;;  %v10138_v59 = vunpack.i.l.bf16 %v10137_v55 }
 0x352   : > { %v9677_v61 = vpack.c.bf16 %v10139_v58, %v10138_v59  ;;  %v9683_v63 = vpack.c.bf16 %v10144_v56, %v10143_v57 }
 0x353   : > { %v10147_v0 = vpop.permute.xlu0 %10146 }
 0x354   : > { %9679 = vmatprep.subr.msk.bf16.mxu1 %vm11026_vm6, %v9677_v61  ;;  %v10149_v2 = vunpack.i.h.bf16 %v10147_v0  ;;  %v10148_v3 = vunpack.i.l.bf16 %v10147_v0 }
 0x355   : > { %9682 = vmatpush3.bf16.xpose.msk.msra.mxu1 %vm11026_vm6, %v9677_v61 }
 0x356   : > { %9685 = vmatprep.subr.msk.bf16.mxu1 %vm11030_vm8, %v9683_v63  ;;  %v9689_v4 = vpack.c.bf16 %v10149_v2, %v10148_v3 }
 0x357   : > { %v1701_v24 = vpop.permute.xlu0 %1700 }
 0x35c   : > { %9096 = vmatmul.mubr.msk.f32.vlgmr.msra.gmra.mrb[0].mxu1 %vm1499_vm4, %v11020_v53 }
 0x35d   : > { %9688 = vmatpush3.bf16.msk.msra.mxu1 %vm11030_vm8, %v9683_v63 }
 0x35e   : > { %9691 = vmatprep.subr.msk.bf16.mxu1 %vm11026_vm6, %v9689_v4 }
 0x42f   : > { %v9097_v10 = vpop.f32.mrb[0].mxu1 }
 0x430   : > { %v1582_v11 = vadd.f32 %v9097_v10, %v11051_v9  ;;  %v1576_v12 = vpop.f32.mrb[1].mxu1 }
 0x431   : > { %v1577_v14 = vadd.f32 %v1576_v12, %v11051_v9 }
 0x432   : > { %v1590_v15 = vsel %vm1589_vm10, %v1582_v11, -inf }
 0x433   : > { %1591 = vmax.xlane.f32.xlu1 %v1590_v15  ;;  %v1586_v16 = vsel %vm1585_vm11, %v1577_v14, -inf }
 0x437   : > { %1587 = vmax.xlane.f32.xlu1 %v1586_v16 }
 0x448   : > { %1698 = vrot.lane.b32.xlu1 %v11010_v52, %s12059_s2 }
 0x44c   : > { %10156 = vrot.lane.b32.xlu1 %v11008_v51, %s12039_s1  ;;  %s12041_s1 = smov 72  }
 0x4c0   : > { %v1592_v1 = vpop.xlane.xlu1 %1591 }
 0x4c1   : > { %v1594_v6 = vsub.f32 %v1582_v11, %v1592_v1 }
 0x4c3   : > { %v1597_v19 = vmul.f32 1.442695, %v1594_v6 }
 0x4c4   : > { %v1588_v17 = vpop.xlane.xlu1 %1587 }
 0x4c5   : > { %v1593_v18 = vsub.f32 %v1577_v14, %v1588_v17 }
 0x4c7   : > { %v1595_v20 = vmul.f32 1.442695, %v1593_v18 }
 0x4c8   : > { %v1699_v23 = vpop.permute.xlu1 %1698 }
 0x4c9   : > { %10289 = vpow2.f32 %v1595_v20 }
 0x4ca   : > { %10291 = vpow2.f32 %v1597_v19 }
 0x4cc   : > { %v10157_v33 = vpop.permute.xlu1 %10156 }
 0x4cd   : > { %v10159_v41 = vunpack.i.h.bf16 %v10157_v33  ;;  %v10158_v42 = vunpack.i.l.bf16 %v10157_v33 }
 0x4cf   : > { %v9701_v48 = vpack.c.bf16 %v10159_v41, %v10158_v42 }
 0x4d3   : > { %v11061_v21 = vpop.eup %10289 }
 0x4d4   : > { %v11063_v22 = vpop.eup %10291  ;;  %9102 = vmatprep.mubr.msk.f32.mxu1 %vm1585_vm11, %v11061_v21 }
 0x4d5   : > { %9103 = vmatmul.mubr.msk.f32.vlgmr.msra.gmra.mrb[2].mxu1 %vm1585_vm11, %v11063_v22 }
 0x4d6   : > { %9694 = vmatpush3.bf16.xpose.msk.msra.mxu1 %vm11026_vm6, %v9689_v4  ;;  %9109 = vmatprep.mubr.msk.f32.mxu1 %vm1499_vm4, %v1699_v23 }
 0x4dd   : > { %9110 = vmatmul.mubr.msk.f32.vlgmr.msra.gmra.mrb[4].mxu1 %vm1499_vm4, %v1701_v24 }
 0x5a8   : > { %v11073_v25 = vpop.f32.mrb[2].mxu1 }
 0x5a9   : > { %v11075_v26 = vpop.f32.mrb[3].mxu1 }
 0x5b0   : > { %v9111_v27 = vpop.f32.mrb[4].mxu1 }
 0x5b1   : > { %v1786_v28 = vadd.f32 %v9111_v27, %v11051_v9  ;;  %v1780_v29 = vpop.f32.mrb[5].mxu1 }
 0x5b2   : > { %v1781_v30 = vadd.f32 %v1780_v29, %v11051_v9 }
 0x5b3   : > { %v1792_v31 = vsel %vm1589_vm10, %v1786_v28, -inf }
 0x5b4   : > { %1793 = vmax.xlane.f32.xlu0 %v1792_v31  ;;  %v1789_v32 = vsel %vm1585_vm11, %v1781_v30, -inf }
 0x5b5   : > { %1790 = vmax.xlane.f32.xlu1 %v1789_v32 }
 0x5c6   : > { %1899 = vrot.lane.b32.xlu1 %v11010_v52, %s12043_s11 }
 0x5ca   : > { %10151 = vrot.lane.b32.xlu0 %v11008_v51, %s12057_s26  ;;  %10166 = vrot.lane.b32.xlu1 %v11008_v51, %s12041_s1  ;;  %s12049_s1 = smov 104   ;;  %s12173_s26 = sld [smem:[#allocation28_spill]] }
 0x5ce   : > { %1901 = vrot.lane.b32.xlu0 %v11020_v53, %s12043_s11  ;;  %s12045_s11 = smov 48  }
 0x641   : > { %v1794_v34 = vpop.xlane.xlu0 %1793 }
 0x642   : > { %v1796_v35 = vsub.f32 %v1786_v28, %v1794_v34  ;;  %v1791_v36 = vpop.xlane.xlu1 %1790 }
 0x643   : > { %v1795_v37 = vsub.f32 %v1781_v30, %v1791_v36 }
 0x644   : > { %v1799_v38 = vmul.f32 1.442695, %v1796_v35 }
 0x645   : > { %v1797_v39 = vmul.f32 1.442695, %v1795_v37  ;;  %v10152_v40 = vpop.permute.xlu0 %10151 }
 0x646   : > { %v10154_v44 = vunpack.i.h.bf16 %v10152_v40  ;;  %v10153_v46 = vunpack.i.l.bf16 %v10152_v40  ;;  %v1900_v54 = vpop.permute.xlu1 %1899 }
 0x647   : > { %10293 = vpow2.f32 %v1797_v39 }
 0x648   : > { %10295 = vpow2.f32 %v1799_v38  ;;  %v9695_v47 = vpack.c.bf16 %v10154_v44, %v10153_v46 }
 0x649   : > { %v1902_v55 = vpop.permute.xlu0 %1901 }
 0x64a   : > { %9697 = vmatprep.subr.msk.bf16.mxu0 %vm11030_vm8, %v9695_v47  ;;  %v10167_v3 = vpop.permute.xlu1 %10166 }
 0x64b   : > { %9700 = vmatpush3.bf16.msk.msra.mxu0 %vm11030_vm8, %v9695_v47  ;;  %v10169_v15 = vunpack.i.h.bf16 %v10167_v3  ;;  %v10168_v16 = vunpack.i.l.bf16 %v10167_v3 }
 0x64c   : > { %9703 = vmatprep.subr.msk.bf16.mxu0 %vm11026_vm6, %v9701_v48 }
 0x64d   : > { %v9713_v17 = vpack.c.bf16 %v10169_v15, %v10168_v16  ;;  %v1488_v15 = vld [vmem:[%s12140_s8 + $0x10] sm:$0xff]  ;;  %v1489_v16 = vld [vmem:[%s12140_s8 + $0x18] sm:$0xff] }
 0x651   : > { %v10294_v49 = vpop.eup %10293 }
 0x652   : > { %v11095_v50 = vpop.eup %10295  ;;  %9116 = vmatprep.mubr.msk.f32.mxu0 %vm1585_vm11, %v10294_v49  ;;  %v1801_v33 = vsel %vm1585_vm11, %v10294_v49, 0.0 }
 0x653   : > { %9117 = vmatmul.mubr.msk.f32.vlgmr.msra.gmra.mrb[2].mxu0 %vm1585_vm11, %v11095_v50  ;;  %v1804_v34 = vsel %vm1589_vm10, %v11095_v50, 0.0 }
 0x654   : > { %9706 = vmatpush3.bf16.xpose.msk.msra.mxu0 %vm11026_vm6, %v9701_v48  ;;  %9123 = vmatprep.mubr.msk.f32.mxu0 %vm1499_vm4, %v1900_v54 }
 0x65b   : > { %9124 = vmatmul.mubr.msk.f32.vlgmr.msra.gmra.mrb[4].mxu0 %vm1499_vm4, %v1902_v55 }
 0x726   : > { %v11104_v56 = vpop.f32.mrb[2].mxu0 }
 0x727   : > { %v11106_v57 = vpop.f32.mrb[3].mxu0 }
 0x72e   : > { %v9125_v58 = vpop.f32.mrb[4].mxu0 }
 0x72f   : > { %v1987_v59 = vadd.f32 %v9125_v58, %v11051_v9  ;;  %v1981_v61 = vpop.f32.mrb[5].mxu0 }
 0x730   : > { %v1982_v63 = vadd.f32 %v1981_v61, %v11051_v9  ;;  %v1599_v61 = vsel %vm1585_vm11, %v11061_v21, 0.0 }
 0x731   : > { %v1993_v0 = vsel %vm1589_vm10, %v1987_v59, -inf }
 0x732   : > { %1994 = vmax.xlane.f32.xlu0 %v1993_v0  ;;  %v1990_v2 = vsel %vm1585_vm11, %v1982_v63, -inf }
 0x733   : > { %1991 = vmax.xlane.f32.xlu1 %v1990_v2 }
 0x744   : > { %2100 = vrot.lane.b32.xlu1 %v11010_v52, %s12049_s1 }
 0x748   : > { %10161 = vrot.lane.b32.xlu0 %v11008_v51, %s12045_s11  ;;  %s12047_s11 = smov 40  }
 0x74c   : > { %2102 = vrot.lane.b32.xlu0 %v11020_v53, %s12049_s1  ;;  %s12051_s1 = smov 8  }
 0x7bf   : > { %v1995_v4 = vpop.xlane.xlu0 %1994 }
 0x7c0   : > { %v1997_v5 = vsub.f32 %v1987_v59, %v1995_v4  ;;  %v1992_v7 = vpop.xlane.xlu1 %1991 }
 0x7c1   : > { %v1996_v10 = vsub.f32 %v1982_v63, %v1992_v7  ;;  %v1602_v63 = vsel %vm1589_vm10, %v11063_v22, 0.0 }
 0x7c2   : > { %v2000_v11 = vmul.f32 1.442695, %v1997_v5 }
 0x7c3   : > { %v1998_v12 = vmul.f32 1.442695, %v1996_v10  ;;  %v10162_v14 = vpop.permute.xlu0 %10161 }
 0x7c4   : > { %v10164_v1 = vunpack.i.h.bf16 %v10162_v14  ;;  %v10163_v6 = vunpack.i.l.bf16 %v10162_v14  ;;  %v2101_v19 = vpop.permute.xlu1 %2100 }
 0x7c5   : > { %10297 = vpow2.f32 %v1998_v12  ;;  %v1487_v12 = vld [vmem:[%s12140_s8 + $0x8] sm:$0xff] }
 0x7c6   : > { %10299 = vpow2.f32 %v2000_v11  ;;  %v9707_v52 = vpack.c.bf16 %v10164_v1, %v10163_v6  ;;  %v1486_v11 = vld [vmem:[%s12140_s8] sm:$0xff]  ;;  %v9729_v1 = vpack.c.bf16 %v1489_v16, %v1488_v15 }
 0x7c7   : > { %v2103_v20 = vpop.permute.xlu0 %2102  ;;  %v9725_v14 = vpack.c.bf16 %v1487_v12, %v1486_v11  ;;  %v8553_v16 = vld [vmem:[%s12135_s19] ss:$0 sm:$0xff] }
 0x7c8   : > { %9709 = vmatprep.subr.msk.bf16.mxu1 %vm11030_vm8, %v9707_v52 }
 0x7c9   : > { %9712 = vmatpush3.bf16.msk.msra.mxu1 %vm11030_vm8, %v9707_v52 }
 0x7ca   : > { %9715 = vmatprep.subr.msk.bf16.mxu1 %vm11026_vm6, %v9713_v17 }
 0x7cf   : > { %v10298_v53 = vpop.eup %10297 }
 0x7d0   : > { %v10300_v18 = vpop.eup %10299  ;;  %9130 = vmatprep.mubr.msk.f32.mxu1 %vm1585_vm11, %v10298_v53  ;;  %v2002_v35 = vsel %vm1585_vm11, %v10298_v53, 0.0 }
 0x7d1   : > { %9131 = vmatmul.mubr.msk.f32.vlgmr.msra.gmra.mrb[6].mxu1 %vm1585_vm11, %v10300_v18  ;;  %v2005_v36 = vsel %vm1589_vm10, %v10300_v18, 0.0 }
 0x7d2   : > { %9718 = vmatpush3.bf16.xpose.msk.msra.mxu1 %vm11026_vm6, %v9713_v17  ;;  %9137 = vmatprep.mubr.msk.f32.mxu1 %vm1499_vm4, %v2101_v19 }
 0x7d9   : > { %9138 = vmatmul.mubr.msk.f32.vlgmr.msra.gmra.mrb[8].mxu1 %vm1499_vm4, %v2103_v20 }
 0x8a4   : > { %v11130_v23 = vpop.f32.mrb[6].mxu1 }
 0x8a5   : > { %v2087_v24 = vpop.f32.mrb[7].mxu1 }
 0x8ac   : > { %v9139_v27 = vpop.f32.mrb[8].mxu1 }
 0x8ad   : > { %v2188_v28 = vadd.f32 %v9139_v27, %v11051_v9  ;;  %v2182_v29 = vpop.f32.mrb[9].mxu1 }
 0x8ae   : > { %v2183_v30 = vadd.f32 %v2182_v29, %v11051_v9 }
 0x8af   : > { %v2194_v31 = vsel %vm1589_vm10, %v2188_v28, -inf }
 0x8b0   : > { %2195 = vmax.xlane.f32.xlu0 %v2194_v31  ;;  %v2191_v32 = vsel %vm1585_vm11, %v2183_v30, -inf }
 0x8b1   : > { %2192 = vmax.xlane.f32.xlu1 %v2191_v32 }
 0x8b5   : > { %1802 = vadd.xlane.f32.xlu1 %v1801_v33 }
 0x8b9   : > { %1805 = vadd.xlane.f32.xlu1 %v1804_v34 }
 0x8bd   : > { %2003 = vadd.xlane.f32.xlu1 %v2002_v35 }
 0x8c1   : > { %2006 = vadd.xlane.f32.xlu1 %v2005_v36 }
 0x8c6   : > { %10171 = vrot.lane.b32.xlu0 %v11008_v51, %s12047_s11  ;;  %s12055_s11 = smov 16  }
 0x93d   : > { %v2196_v37 = vpop.xlane.xlu0 %2195 }
 0x93e   : > { %v2198_v38 = vsub.f32 %v2188_v28, %v2196_v37  ;;  %v2193_v39 = vpop.xlane.xlu1 %2192 }
 0x93f   : > { %v2197_v40 = vsub.f32 %v2183_v30, %v2193_v39 }
 0x940   : > { %v2201_v41 = vmul.f32 1.442695, %v2198_v38 }
 0x941   : > { %v2199_v42 = vmul.f32 1.442695, %v2197_v40  ;;  %v10172_v44 = vpop.permute.xlu0 %10171 }
 0x942   : > { %10301 = vpow2.f32 %v2201_v41  ;;  %v10174_v46 = vunpack.i.h.bf16 %v10172_v44  ;;  %v10173_v47 = vunpack.i.l.bf16 %v10172_v44  ;;  %v1803_v49 = vpop.xlane.xlu1 %1802 }
 0x943   : > { %10303 = vpow2.f32 %v2199_v42 }
 0x944   : > { %v9719_v48 = vpack.c.bf16 %v10174_v46, %v10173_v47 }
 0x946   : > { %9721 = vmatprep.subr.msk.bf16.mxu0 %vm11030_vm8, %v9719_v48  ;;  %v1806_v50 = vpop.xlane.xlu1 %1805 }
 0x947   : > { %9724 = vmatpush3.bf16.msk.msra.mxu0 %vm11030_vm8, %v9719_v48 }
 0x948   : > { %9726 = vmatprep.subr.bf16.mxu0 %v9725_v14 }
 0x94a   : > { %v2004_v59 = vpop.xlane.xlu1 %2003 }
 0x94b   : > { %10305 = vrcp.f32 %v2004_v59 }
 0x94c   : > { %v10302_v51 = vpop.eup %10301  ;;  %10307 = vrcp.f32 %v1803_v49 }
 0x94d   : > { %v10304_v54 = vpop.eup %10303  ;;  %v2206_v55 = vsel %vm1589_vm10, %v10302_v51, 0.0  ;;  %10309 = vrcp.f32 %v1806_v50 }
 0x94e   : > { %2207 = vadd.xlane.f32.xlu0 %v2206_v55  ;;  %9144 = vmatprep.mubr.msk.f32.mxu0 %vm1585_vm11, %v10304_v54  ;;  %v2203_v58 = vsel %vm1585_vm11, %v10304_v54, 0.0  ;;  %v2007_v0 = vpop.xlane.xlu1 %2006 }
 0x94f   : > { %9145 = vmatmul.mubr.msk.f32.vlgmr.msra.gmra.mrb[6].mxu0 %vm1585_vm11, %v10302_v51  ;;  %2204 = vadd.xlane.f32.xlu1 %v2203_v58  ;;  %10311 = vrcp.f32 %v2007_v0 }
 0x950   : > { %9728 = vmatpush3.bf16.msra.mxu0 %v9725_v14 }
 0x951   : > { %9730 = vmatprep.subr.bf16.mxu0 %v9729_v1 }
 0x953   : > { %1600 = vadd.xlane.f32.xlu1 %v1599_v61 }
 0x954   : > { %9732 = vmatpush3.bf16.msra.mxu0 %v9729_v1 }
 0x955   : > { %v10306_v2 = vpop.eup %10305 }
 0x956   : > { %v2098_v3 = vmul.f32 %v10306_v2, %v2087_v24  ;;  %v10308_v4 = vpop.eup %10307  ;;  %v2466_v2 = vld [vmem:[%s12133_s30] sm:$0xff] }
 0x957   : > { %1603 = vadd.xlane.f32.xlu1 %v1602_v63  ;;  %v1897_v21 = vmul.f32 %v10308_v4, %v11106_v57  ;;  %v10310_v5 = vpop.eup %10309  ;;  %v2468_v4 = vld [vmem:[%s12133_s30 + $0x10] sm:$0xff] }
 0x958   : > { %v1898_v22 = vmul.f32 %v10310_v5, %v11104_v56  ;;  %v2469_v5 = vld [vmem:[%s12133_s30 + $0x18] sm:$0xff] }
 0x959   : > { %v10312_v7 = vpop.eup %10311 }
 0x95a   : > { %v2099_v10 = vmul.f32 %v10312_v7, %v11130_v23 }
 0x964   : > { %2311 = vrot.lane.b32.xlu0 %v2098_v3, %s12055_s11  ;;  %v2467_v3 = vld [vmem:[%s12133_s30 + $0x8] sm:$0xff] }
 0x968   : > { %2303 = vrot.lane.b32.xlu1 %v1897_v21, %s12051_s1  ;;  %v9733_v21 = vpack.c.bf16 %v2467_v3, %v2466_v2 }
 0x96a   : > { %9734 = vmatprep.subr.bf16.mxu1 %v9733_v21 }
 0x96b   : > { %9736 = vmatpush3.bf16.msra.mxu1 %v9733_v21 }
 0x96c   : > { %2305 = vrot.lane.b32.xlu1 %v1898_v22, %s12051_s1  ;;  %s12053_s1 = smov 24   ;;  %v9737_v22 = vpack.c.bf16 %v2469_v5, %v2468_v4 }
 0x96e   : > { %9738 = vmatprep.subr.bf16.mxu1 %v9737_v22 }
 0x96f   : > { %9740 = vmatpush3.bf16.msra.mxu1 %v9737_v22 }
 0x970   : > { %2313 = vrot.lane.b32.xlu1 %v2099_v10, %s12055_s11  ;;  %s12172_s11 = sld [smem:[#allocation27_spill]] }
 0x9db   : > { %v2208_v6 = vpop.xlane.xlu0 %2207 }
 0x9dc   : > { %v2205_v57 = vpop.xlane.xlu1 %2204 }
 0x9dd   : > { %10313 = vrcp.f32 %v2205_v57 }
 0x9de   : > { %10315 = vrcp.f32 %v2208_v6  ;;  %v8554_v6 = vld [vmem:[%s12134_s24] ss:$0 sm:$0xff] }
 0x9df   : > { %v2312_v34 = vpop.permute.xlu0 %2311 }
 0x9e0   : > { %v1601_v20 = vpop.xlane.xlu1 %1600 }
 0x9e1   : > { %10317 = vrcp.f32 %v1601_v20  ;;  %v2576_v20 = vld [vmem:[%s12137_s12] sm:$0xff] }
 0x9e4   : > { %v1604_v23 = vpop.xlane.xlu1 %1603 }
 0x9e5   : > { %10319 = vrcp.f32 %v1604_v23  ;;  %v2577_v23 = vld [vmem:[%s12137_s12 + $0x8] sm:$0xff] }
 0x9e7   : > { %v10314_v52 = vpop.eup %10313 }
 0x9e8   : > { %v10316_v18 = vpop.eup %10315  ;;  %v2304_v24 = vpop.permute.xlu1 %2303 }
 0x9eb   : > { %v10318_v27 = vpop.eup %10317 }
 0x9ec   : > { %v2306_v28 = vpop.permute.xlu1 %2305  ;;  %v1696_v29 = vmul.f32 %v10318_v27, %v11075_v26  ;;  %v2578_v27 = vld [vmem:[%s12137_s12 + $0x10] sm:$0xff] }
 0x9ee   : > { %v2325_v32 = vsel %vm1499_vm4, %v1696_v29, %v2304_v24  ;;  %v9741_v24 = vpack.c.bf16 %v2577_v23, %v2576_v20 }
 0x9ef   : > { %v10320_v30 = vpop.eup %10319  ;;  %v2328_v35 = vsel %vm2327_vm12, %v2325_v32, %v2312_v34  ;;  %v2583_v34 = vld [vmem:[%s12137_s12 + $0x38] sm:$0xff] }
 0x9f0   : > { %v2314_v31 = vpop.permute.xlu1 %2313  ;;  %v1697_v33 = vmul.f32 %v10320_v30, %v11073_v25  ;;  %v8550_v25 = vld [vmem:[%s12138_s14] ss:$0 sm:$0xff]  ;;  %9742 = vmatprep.subr.bf16.mxu0 %v9741_v24 }
 0x9f1   : > { %v2580_v30 = vld [vmem:[%s12137_s12 + $0x20] sm:$0xff] }
 0x9f2   : > { %v2326_v37 = vsel %vm1499_vm4, %v1697_v33, %v2306_v28  ;;  %v2579_v28 = vld [vmem:[%s12137_s12 + $0x18] sm:$0xff]  ;;  %v2582_v33 = vld [vmem:[%s12137_s12 + $0x30] sm:$0xff] }
 0x9f3   : > { %v2329_v26 = vsel %vm2327_vm12, %v2326_v37, %v2314_v31  ;;  %v9745_v29 = vpack.c.bf16 %v2579_v28, %v2578_v27  ;;  %v2581_v31 = vld [vmem:[%s12137_s12 + $0x28] sm:$0xff] }
 0x9f4   : > { %v9749_v32 = vpack.c.bf16 %v2581_v31, %v2580_v30 }
 0xa22   : > { %v9146_v56 = vpop.f32.mrb[6].mxu0 }
 0xa23   : > { %v2288_v17 = vpop.f32.mrb[7].mxu0  ;;  %v2300_v19 = vmul.f32 %v10316_v18, %v9146_v56 }
 0xa24   : > { %v2299_v53 = vmul.f32 %v10314_v52, %v2288_v17 }
 0xa26   : > { %2319 = vrot.lane.b32.xlu1 %v2299_v53, %s12053_s1 }
 0xa2a   : > { %2321 = vrot.lane.b32.xlu1 %v2300_v19, %s12053_s1  ;;  %s12171_s1 = sld [smem:[#allocation26_spill]] }
 0xa98   : > { %v2320_v36 = vpop.permute.xlu1 %2319 }
 0xa99   : > { %v2331_v38 = vsel %vm2330_vm13, %v2328_v35, %v2320_v36  ;;  %v9753_v35 = vpack.c.bf16 %v2583_v34, %v2582_v33  ;;  %v8555_v36 = vld [vmem:[%s12136_s6] ss:$0 sm:$0xff] }
 0xa9a   : > { %9155 = vmatprep.mubr.msk.f32.mxu0 %vm1340_vm1, %v2331_v38 }
 0xa9c   : > { %v2322_v39 = vpop.permute.xlu1 %2321 }
 0xa9d   : > { %v2332_v40 = vsel %vm2330_vm13, %v2329_v26, %v2322_v39 }
 0xa9e   : > { %9156 = vmatmul.mubr.msk.f32.vlgmr.msra.gmra.mrb[8].mxu0 %vm1340_vm1, %v2332_v40 }
 0xa9f   : > { %9744 = vmatpush3.bf16.msra.mxu0 %v9741_v24 }
 0xaa0   : > { %9746 = vmatprep.subr.bf16.mxu0 %v9745_v29 }
 0xaa3   : > { %9748 = vmatpush3.bf16.msra.mxu0 %v9745_v29 }
 0xaa4   : > { %9750 = vmatprep.subr.bf16.mxu0 %v9749_v32 }
 0xaa7   : > { %9752 = vmatpush3.bf16.msra.mxu0 %v9749_v32  ;;  %v8561_v32 = vld [vmem:[%s12172_s11] ss:$0 sm:$0xff] }
 0xaa8   : > { %9754 = vmatprep.subr.bf16.mxu0 %v9753_v35 }
 0xaab   : > { %9756 = vmatpush3.bf16.msra.mxu0 %v9753_v35 }
 0xb71   : > { %v9157_v41 = vpop.f32.mrb[8].mxu0 }
 0xb72   : > { %v2417_v42 = vadd.f32 %v9157_v41, %v8550_v25  ;;  %v2411_v44 = vpop.f32.mrb[9].mxu0 }
 0xb73   : > { %v2412_v46 = vadd.f32 %v8550_v25, %v2411_v44 }
 0xb74   : > { %v2421_v47 = vadd.f32 %v2417_v42, %v11003_v45 }
 0xb75   : > { %v2420_v48 = vadd.f32 %v2412_v46, %v10999_v43 }
 0xb76   : > { %v2427_v49 = vsel %vm1344_vm2, %v2421_v47, 0.0 }
 0xb77   : > { %2428 = vadd.xlane.f32.xlu0 %v2427_v49  ;;  %v2424_v51 = vsel %vm1340_vm1, %v2420_v48, 0.0 }
 0xb78   : > { %2425 = vadd.xlane.f32.xlu1 %v2424_v51 }
 0xc04   : > { %v2429_v50 = vpop.xlane.xlu0 %2428 }
 0xc05   : > { %v2431_v54 = vmul.f32 0.03125, %v2429_v50  ;;  %v2426_v55 = vpop.xlane.xlu1 %2425 }
 0xc06   : > { %v2430_v58 = vmul.f32 0.03125, %v2426_v55 }
 0xc07   : > { %v2433_v59 = vsub.f32 %v2421_v47, %v2431_v54 }
 0xc08   : > { %v2432_v61 = vsub.f32 %v2420_v48, %v2430_v58 }
 0xc09   : > { %v2435_v43 = vmul.f32 %v2433_v59, %v2433_v59 }
 0xc0a   : > { %v2434_v63 = vmul.f32 %v2432_v61, %v2432_v61 }
 0xc0b   : > { %v2439_v0 = vsel %vm1344_vm2, %v2435_v43, 0.0  ;;  %v8558_v43 = vld [vmem:[%s12171_s1] ss:$0 sm:$0xff] }
 0xc0c   : > { %v2436_v45 = vsel %vm1340_vm1, %v2434_v63, 0.0 }
 0xc0d   : > { %2437 = vadd.xlane.f32.xlu1 %v2436_v45 }
 0xc11   : > { %2440 = vadd.xlane.f32.xlu1 %v2439_v0 }
 0xc9a   : > { %v2438_v7 = vpop.xlane.xlu1 %2437 }
 0xc9b   : > { %v2442_v10 = vmul.f32 0.03125, %v2438_v7 }
 0xc9d   : > { %v2444_v11 = vadd.f32 1e-12, %v2442_v10 }
 0xc9e   : > { %v2441_v12 = vpop.xlane.xlu1 %2440 }
 0xc9f   : > { %10321 = vrsqrt.f32 %v2444_v11  ;;  %v2443_v14 = vmul.f32 0.03125, %v2441_v12 }
 0xca1   : > { %v2445_v57 = vadd.f32 1e-12, %v2443_v14 }
 0xca3   : > { %10323 = vrsqrt.f32 %v2445_v57 }
 0xca9   : > { %v10322_v15 = vpop.eup %10321 }
 0xcaa   : > { %v2448_v1 = vmul.f32 %v10322_v15, %v2432_v61 }
 0xcac   : > { %v2456_v56 = vmul.f32 %v8553_v16, %v2448_v1 }
 0xcad   : > { %v10324_v52 = vpop.eup %10323 }
 0xcae   : > { %v2449_v17 = vmul.f32 %v10324_v52, %v2433_v59  ;;  %v2464_v53 = vadd.f32 %v8554_v6, %v2456_v56  ;;  %v8563_v52 = vld [vmem:[%s12139_s29 + $0x20] sm:$0xff] }
 0xcb0   : > { %v2457_v18 = vmul.f32 %v8553_v16, %v2449_v17  ;;  %9166 = vmatprep.mubr.msk.f32.mxu1 %vm1340_vm1, %v2464_v53  ;;  %v8564_v17 = vld [vmem:[%s12139_s29 + $0x28] sm:$0xff] }
 0xcb2   : > { %v2465_v19 = vadd.f32 %v8554_v6, %v2457_v18  ;;  %v9757_v18 = vpack.c.bf16 %v8564_v17, %v8563_v52 }
 0xcb4   : > { %9167 = vmatmul.mubr.msk.f32.vlgmr.msra.gmra.mrb[10].mxu1 %vm1340_vm1, %v2465_v19  ;;  %9758 = vmatprep.subr.bf16.mxu1 %v9757_v18 }
 0xcb5   : > { %9760 = vmatpush3.bf16.msra.mxu1 %v9757_v18 }
 0xd87   : > { %v9168_v37 = vpop.f32.mrb[10].mxu1 }
 0xd88   : > { %v2555_v38 = vadd.f32 %v9168_v37, %v8555_v36  ;;  %v2549_v26 = vpop.f32.mrb[11].mxu1 }
 0xd89   : > { %v2550_v39 = vadd.f32 %v8555_v36, %v2549_v26  ;;  %v8562_v36 = vld [vmem:[%s12173_s26] ss:$0 sm:$0xff] }
 0xd8a   : > { %v2559_v40 = vmul.f32 %v2555_v38, %v2555_v38 }
 0xd8b   : > { %v2558_v25 = vmul.f32 %v2550_v39, %v2550_v39 }
 0xd8c   : > { %v2561_v41 = vmul.f32 %v2559_v40, %v2555_v38  ;;  %v8568_v40 = vld [vmem:[%s12143_s3 + $0x1] ss:$0 sm:$0xff]  ;;  %s12177_s3 = smov 112  }
 0xd8d   : > { %v2560_v42 = vmul.f32 %v2558_v25, %v2550_v39 }
 0xd8e   : > { %v2563_v44 = vmul.f32 0.044715, %v2561_v41 }
 0xd8f   : > { %v2562_v46 = vmul.f32 0.044715, %v2560_v42 }
 0xd90   : > { %v2565_v47 = vadd.f32 %v2563_v44, %v2555_v38 }
 0xd91   : > { %v2564_v48 = vadd.f32 %v2562_v46, %v2550_v39 }
 0xd92   : > { %v2567_v49 = vmul.f32 0.7978846, %v2565_v47 }
 0xd93   : > { %v2566_v51 = vmul.f32 0.7978846, %v2564_v48 }
 0xd94   : > { %10325 = vtanh.f32 %v2567_v49 }
 0xd95   : > { %10327 = vtanh.f32 %v2566_v51 }
 0xd9e   : > { %v10326_v50 = vpop.eup %10325 }
 0xd9f   : > { %v10328_v54 = vpop.eup %10327  ;;  %v2571_v55 = vadd.f32 1.0, %v10326_v50 }
 0xda0   : > { %v2570_v58 = vadd.f32 1.0, %v10328_v54 }
 0xda1   : > { %v2573_v59 = vmul.f32 0.5, %v2571_v55 }
 0xda2   : > { %v2572_v61 = vmul.f32 0.5, %v2570_v58 }
 0xda3   : > { %v2575_v45 = vmul.f32 %v2573_v59, %v2555_v38 }
 0xda4   : > { %v2574_v63 = vmul.f32 %v2572_v61, %v2550_v39 }
 0xda6   : > { %9185 = vmatprep.mubr.msk.f32.mxu0 %vm2591_vm14, %v2574_v63 }
 0xda7   : > { %9186 = vmatmul.mubr.msk.f32.vlgmr.msra.gmra.mrb[10].mxu0 %vm2591_vm14, %v2575_v45 }
 0xe7a   : > { %v9187_v0 = vpop.f32.mrb[10].mxu0 }
 0xe7b   : > { %v2670_v2 = vadd.f32 %v9187_v0, %v8558_v43  ;;  %v2664_v3 = vpop.f32.mrb[11].mxu0 }
 0xe7c   : > { %v2665_v4 = vadd.f32 %v8558_v43, %v2664_v3 }
 0xe7d   : > { %v2674_v21 = vadd.f32 %v2670_v2, %v2465_v19  ;;  %v8566_v19 = vld [vmem:[%s12139_s29 + $0x38] sm:$0xff] }
 0xe7e   : > { %v2673_v5 = vadd.f32 %v2665_v4, %v2464_v53  ;;  %v8565_v53 = vld [vmem:[%s12139_s29 + $0x30] sm:$0xff]  ;;  %s8516_s29 = sshll.u32 %s10973_s18, 3  ;;  %s12189_s18 = sld [smem:[#allocation32_spill]] }
 0xe7f   : > { %v2680_v22 = vsel %vm1344_vm2, %v2674_v21, 0.0  ;;  %v9761_v20 = vpack.c.bf16 %v8566_v19, %v8565_v53 }
 0xe80   : > { %2681 = vadd.xlane.f32.xlu1 %v2680_v22  ;;  %v2677_v7 = vsel %vm1340_vm1, %v2673_v5, 0.0 }
 0xe81   : > { %2678 = vadd.xlane.f32.xlu0 %v2677_v7  ;;  %9762 = vmatprep.subr.bf16.mxu1 %v9761_v20 }
 0xe82   : > { %9764 = vmatpush3.bf16.msra.mxu1 %v9761_v20 }
 0xf0d   : > { %v2682_v10 = vpop.xlane.xlu1 %2681 }
 0xf0e   : > { %v2684_v11 = vmul.f32 0.03125, %v2682_v10  ;;  %v2679_v12 = vpop.xlane.xlu0 %2678 }
 0xf0f   : > { %v2683_v14 = vmul.f32 0.03125, %v2679_v12 }
 0xf10   : > { %v2686_v57 = vsub.f32 %v2674_v21, %v2684_v11 }
 0xf11   : > { %v2685_v15 = vsub.f32 %v2673_v5, %v2683_v14 }
 0xf12   : > { %v2688_v16 = vmul.f32 %v2686_v57, %v2686_v57 }
 0xf13   : > { %v2687_v1 = vmul.f32 %v2685_v15, %v2685_v15 }
 0xf14   : > { %v2692_v6 = vsel %vm1344_vm2, %v2688_v16, 0.0 }
 0xf15   : > { %2693 = vadd.xlane.f32.xlu1 %v2692_v6  ;;  %v2689_v56 = vsel %vm1340_vm1, %v2687_v1, 0.0 }
 0xf16   : > { %2690 = vadd.xlane.f32.xlu0 %v2689_v56 }
 0xfa2   : > { %v2694_v23 = vpop.xlane.xlu1 %2693 }
 0xfa3   : > { %v2696_v24 = vmul.f32 0.03125, %v2694_v23  ;;  %v2691_v27 = vpop.xlane.xlu0 %2690 }
 0xfa4   : > { %v2695_v28 = vmul.f32 0.03125, %v2691_v27 }
 0xfa5   : > { %v2698_v29 = vadd.f32 1e-12, %v2696_v24 }
 0xfa6   : > { %v2697_v30 = vadd.f32 1e-12, %v2695_v28 }
 0xfa7   : > { %10329 = vrsqrt.f32 %v2698_v29 }
 0xfa8   : > { %10331 = vrsqrt.f32 %v2697_v30 }
 0xfb1   : > { %v10330_v31 = vpop.eup %10329 }
 0xfb2   : > { %v10332_v33 = vpop.eup %10331  ;;  %v2702_v34 = vmul.f32 %v10330_v31, %v2686_v57 }
 0xfb3   : > { %v2701_v35 = vmul.f32 %v10332_v33, %v2685_v15 }
 0xfb4   : > { %v2710_v37 = vmul.f32 %v8561_v32, %v2702_v34 }
 0xfb5   : > { %v2709_v38 = vmul.f32 %v8561_v32, %v2701_v35 }
 0xfb6   : > { %v11217_v39 = vadd.f32 %v8562_v36, %v2710_v37 }
 0xfb7   : > { %v11215_v26 = vadd.f32 %v8562_v36, %v2709_v38 }
 0xfb9   : > { %9196 = vmatprep.mubr.msk.f32.mxu1 %vm1340_vm1, %v11215_v26 }
 0xfba   : > { %9197 = vmatmul.mubr.msk.f32.vlgmr.msra.gmra.mrb[12].mxu1 %vm1340_vm1, %v11217_v39 }
0x108d   : > { %v9198_v25 = vpop.f32.mrb[12].mxu1 }
0x108e   : > { %v2810_v41 = vadd.f32 %v9198_v25, %v8568_v40  ;;  %v2804_v42 = vpop.f32.mrb[13].mxu1 }
0x108f   : > { %v2805_v44 = vadd.f32 %v8568_v40, %v2804_v42 }
0x1090   : > { %v11234_v48 = vmul.f32 0.35355338, %v2810_v41 }
0x1091   : > { %v11224_v46 = vpack.i.bf16 %v2810_v41, %v2805_v44  ;;  %v11226_v47 = vmul.f32 0.35355338, %v2805_v44 }
0x1093   : > { %10181 = vrot.lane.b32.xlu1 %v11224_v46, %s12063_s28  ;;  %10176 = vrot.lane.b32.xlu0 %v11224_v46, %s12061_s23  ;;  %s12175_s23 = smov 80   ;;  %s12176_s28 = smov 64  }
0x1094   : > { %9203 = vmatprep.mubr.msk.f32.mxu1 %vm1499_vm4, %v11226_v47 }
0x1097   : > { %3025 = vrot.lane.b32.xlu0 %v11234_v48, %s12059_s2  ;;  %3023 = vrot.lane.b32.xlu1 %v11226_v47, %s12059_s2  ;;  %s12174_s2 = smov 56  }
0x1105   : > { %v10182_v49 = vpop.permute.xlu1 %10181  ;;  %v10177_v51 = vpop.permute.xlu0 %10176 }
0x1106   : > { %v10184_v50 = vunpack.i.h.bf16 %v10182_v49  ;;  %v10183_v54 = vunpack.i.l.bf16 %v10182_v49  ;;  %v10179_v55 = vunpack.i.h.bf16 %v10177_v51  ;;  %v10178_v58 = vunpack.i.l.bf16 %v10177_v51 }
0x1108   : > { %v9765_v59 = vpack.c.bf16 %v10179_v55, %v10178_v58  ;;  %v9777_v61 = vpack.c.bf16 %v10184_v50, %v10183_v54 }
0x1109   : > { %v3024_v63 = vpop.permute.xlu1 %3023  ;;  %v3026_v45 = vpop.permute.xlu0 %3025 }
0x110a   : > { %9767 = vmatprep.subr.msk.bf16.mxu1 %vm11026_vm6, %v9765_v59 }
0x110b   : > { %9770 = vmatpush3.bf16.xpose.msk.msra.mxu1 %vm11026_vm6, %v9765_v59 }
0x110c   : > { %9779 = vmatprep.subr.msk.bf16.mxu1 %vm11026_vm6, %v9777_v61 }
0x1112   : > { %9204 = vmatmul.mubr.msk.f32.vlgmr.msra.gmra.mrb[14].mxu1 %vm1499_vm4, %v11234_v48 }
0x1113   : > { %9782 = vmatpush3.bf16.xpose.msk.msra.mxu1 %vm11026_vm6, %v9777_v61  ;;  %9217 = vmatprep.mubr.msk.f32.mxu1 %vm1499_vm4, %v3024_v63 }
0x111a   : > { %9218 = vmatmul.mubr.msk.f32.vlgmr.msra.gmra.mrb[16].mxu1 %vm1499_vm4, %v3026_v45 }
0x11e5   : > { %v9205_v43 = vpop.f32.mrb[14].mxu1 }
0x11e6   : > { %v2910_v0 = vadd.f32 %v9205_v43, %v11051_v9  ;;  %v2904_v2 = vpop.f32.mrb[15].mxu1 }
0x11e7   : > { %v2905_v3 = vadd.f32 %v2904_v2, %v11051_v9 }
0x11e8   : > { %v2916_v4 = vsel %vm1589_vm10, %v2910_v0, -inf }
0x11e9   : > { %2917 = vmax.xlane.f32.xlu0 %v2916_v4  ;;  %v2913_v21 = vsel %vm1585_vm11, %v2905_v3, -inf }
0x11ea   : > { %2914 = vmax.xlane.f32.xlu1 %v2913_v21 }
0x11ed   : > { %v9219_v5 = vpop.f32.mrb[16].mxu1 }
0x11ee   : > { %v3111_v22 = vadd.f32 %v9219_v5, %v11051_v9  ;;  %v3105_v7 = vpop.f32.mrb[17].mxu1 }
0x11ef   : > { %v3106_v10 = vadd.f32 %v3105_v7, %v11051_v9 }
0x11f0   : > { %v3117_v11 = vsel %vm1589_vm10, %v3111_v22, -inf }
0x11f1   : > { %3118 = vmax.xlane.f32.xlu1 %v3117_v11  ;;  %v3114_v12 = vsel %vm1585_vm11, %v3106_v10, -inf }
0x11f2   : > { %3115 = vmax.xlane.f32.xlu0 %v3114_v12 }
0x1202   : > { %10191 = vrot.lane.b32.xlu1 %v11224_v46, %s12174_s2 }
0x1206   : > { %10196 = vrot.lane.b32.xlu1 %v11224_v46, %s12175_s23 }
0x1208   : > { %10186 = vrot.lane.b32.xlu0 %v11224_v46, %s12176_s28 }
0x120a   : > { %3226 = vrot.lane.b32.xlu1 %v11234_v48, %s12177_s3 }
0x120c   : > { %3224 = vrot.lane.b32.xlu0 %v11226_v47, %s12177_s3 }
0x1276   : > { %v2918_v14 = vpop.xlane.xlu0 %2917 }
0x1277   : > { %v2915_v57 = vpop.xlane.xlu1 %2914  ;;  %v2920_v16 = vsub.f32 %v2910_v0, %v2918_v14 }
0x1278   : > { %v2919_v15 = vsub.f32 %v2905_v3, %v2915_v57 }
0x1279   : > { %v2923_v6 = vmul.f32 1.442695, %v2920_v16 }
0x127a   : > { %v2921_v1 = vmul.f32 1.442695, %v2919_v15 }
0x127c   : > { %10333 = vpow2.f32 %v2921_v1 }
0x127d   : > { %10335 = vpow2.f32 %v2923_v6 }
0x127e   : > { %v3119_v56 = vpop.xlane.xlu1 %3118 }
0x127f   : > { %v3121_v52 = vsub.f32 %v3111_v22, %v3119_v56  ;;  %v3116_v17 = vpop.xlane.xlu0 %3115 }
0x1280   : > { %v3120_v53 = vsub.f32 %v3106_v10, %v3116_v17 }
0x1281   : > { %v3124_v18 = vmul.f32 1.442695, %v3121_v52 }
0x1282   : > { %v3122_v19 = vmul.f32 1.442695, %v3120_v53  ;;  %v10192_v20 = vpop.permute.xlu1 %10191 }
0x1283   : > { %v10194_v23 = vunpack.i.h.bf16 %v10192_v20  ;;  %v10187_v24 = vpop.permute.xlu0 %10186  ;;  %v10193_v27 = vunpack.i.l.bf16 %v10192_v20 }
0x1284   : > { %10337 = vpow2.f32 %v3122_v19  ;;  %v10189_v28 = vunpack.i.h.bf16 %v10187_v24  ;;  %v10188_v29 = vunpack.i.l.bf16 %v10187_v24 }
0x1285   : > { %10339 = vpow2.f32 %v3124_v18  ;;  %v9783_v33 = vpack.c.bf16 %v10194_v23, %v10193_v27 }
0x1286   : > { %v11270_v30 = vpop.eup %10333  ;;  %v9771_v31 = vpack.c.bf16 %v10189_v28, %v10188_v29  ;;  %v10197_v32 = vpop.permute.xlu1 %10196 }
0x1287   : > { %9210 = vmatprep.mubr.msk.f32.mxu0 %vm1585_vm11, %v11270_v30  ;;  %v10199_v34 = vunpack.i.h.bf16 %v10197_v32  ;;  %v10198_v35 = vunpack.i.l.bf16 %v10197_v32  ;;  %v11280_v36 = vpop.eup %10335  ;;  %v3225_v25 = vpop.permute.xlu0 %3224 }
0x1288   : > { %9773 = vmatprep.subr.msk.bf16.mxu0 %vm11030_vm8, %v9771_v31 }
0x1289   : > { %9776 = vmatpush3.bf16.msk.msra.mxu0 %vm11030_vm8, %v9771_v31  ;;  %v9789_v37 = vpack.c.bf16 %v10199_v34, %v10198_v35 }
0x128a   : > { %9785 = vmatprep.subr.msk.bf16.mxu0 %vm11030_vm8, %v9783_v33  ;;  %v3227_v41 = vpop.permute.xlu1 %3226 }
0x128c   : > { %9211 = vmatmul.mubr.msk.f32.vlgmr.msra.gmra.mrb[12].mxu0 %vm1585_vm11, %v11280_v36 }
0x128d   : > { %9788 = vmatpush3.bf16.msk.msra.mxu0 %vm11030_vm8, %v9783_v33 }
0x128e   : > { %v11286_v38 = vpop.eup %10337  ;;  %9791 = vmatprep.subr.msk.bf16.mxu0 %vm11026_vm6, %v9789_v37 }
0x128f   : > { %v11290_v40 = vpop.eup %10339  ;;  %9224 = vmatprep.mubr.msk.f32.mxu0 %vm1585_vm11, %v11286_v38  ;;  %v3126_v18 = vsel %vm1585_vm11, %v11286_v38, 0.0 }
0x1290   : > { %9225 = vmatmul.mubr.msk.f32.vlgmr.msra.gmra.mrb[14].mxu0 %vm1585_vm11, %v11290_v40  ;;  %v3129_v19 = vsel %vm1589_vm10, %v11290_v40, 0.0 }
0x1291   : > { %9231 = vmatprep.mubr.msk.f32.mxu0 %vm1499_vm4, %v3225_v25 }
0x1296   : > { %9794 = vmatpush3.bf16.xpose.msk.msra.mxu0 %vm11026_vm6, %v9789_v37 }
0x129d   : > { %9232 = vmatmul.mubr.msk.f32.vlgmr.msra.gmra.mrb[16].mxu0 %vm1499_vm4, %v3227_v41 }
0x135f   : > { %v11300_v42 = vpop.f32.mrb[12].mxu0 }
0x1360   : > { %v11302_v44 = vpop.f32.mrb[13].mxu0 }
0x1363   : > { %v11304_v49 = vpop.f32.mrb[14].mxu0 }
0x1364   : > { %v11306_v51 = vpop.f32.mrb[15].mxu0 }
0x1370   : > { %v9233_v50 = vpop.f32.mrb[16].mxu0 }
0x1371   : > { %v3312_v54 = vadd.f32 %v9233_v50, %v11051_v9  ;;  %v3306_v55 = vpop.f32.mrb[17].mxu0 }
0x1372   : > { %v3307_v58 = vadd.f32 %v3306_v55, %v11051_v9 }
0x1373   : > { %v3318_v59 = vsel %vm1589_vm10, %v3312_v54, -inf }
0x1374   : > { %3319 = vmax.xlane.f32.xlu1 %v3318_v59  ;;  %v3315_v61 = vsel %vm1585_vm11, %v3307_v58, -inf }
0x1375   : > { %3316 = vmax.xlane.f32.xlu0 %v3315_v61 }
0x1385   : > { %10206 = vrot.lane.b32.xlu1 %v11224_v46, %s12178_s4 }
0x1389   : > { %3427 = vrot.lane.b32.xlu1 %v11234_v48, %s12179_s5 }
0x138b   : > { %10201 = vrot.lane.b32.xlu0 %v11224_v46, %s12180_s9 }
0x138f   : > { %3425 = vrot.lane.b32.xlu0 %v11226_v47, %s12179_s5 }
0x1401   : > { %v3320_v63 = vpop.xlane.xlu1 %3319 }
0x1402   : > { %v3322_v45 = vsub.f32 %v3312_v54, %v3320_v63  ;;  %v3317_v43 = vpop.xlane.xlu0 %3316  ;;  %v2925_v54 = vsel %vm1585_vm11, %v11270_v30, 0.0 }
0x1403   : > { %v3321_v0 = vsub.f32 %v3307_v58, %v3317_v43  ;;  %v2928_v58 = vsel %vm1589_vm10, %v11280_v36, 0.0 }
0x1404   : > { %v3325_v2 = vmul.f32 1.442695, %v3322_v45 }
0x1405   : > { %v3323_v3 = vmul.f32 1.442695, %v3321_v0  ;;  %v10207_v4 = vpop.permute.xlu1 %10206 }
0x1406   : > { %v10209_v21 = vunpack.i.h.bf16 %v10207_v4  ;;  %v10202_v5 = vpop.permute.xlu0 %10201  ;;  %v10208_v22 = vunpack.i.l.bf16 %v10207_v4  ;;  %v8572_v4 = vld [vmem:[%s12140_s8 + $0x28] sm:$0xff] }
0x1407   : > { %10341 = vpow2.f32 %v3323_v3  ;;  %v10204_v7 = vunpack.i.h.bf16 %v10202_v5  ;;  %v10203_v10 = vunpack.i.l.bf16 %v10202_v5  ;;  %v8571_v3 = vld [vmem:[%s12140_s8 + $0x20] sm:$0xff] }
0x1408   : > { %10343 = vpow2.f32 %v3325_v2  ;;  %v9801_v11 = vpack.c.bf16 %v10209_v21, %v10208_v22  ;;  %v9813_v21 = vpack.c.bf16 %v8572_v4, %v8571_v3  ;;  %v8574_v22 = vld [vmem:[%s12140_s8 + $0x38] sm:$0xff]  ;;  %v8612_v3 = vld [vmem:[%s12133_s30 + $0x28] sm:$0xff] }
0x1409   : > { %v9795_v48 = vpack.c.bf16 %v10204_v7, %v10203_v10  ;;  %v3428_v57 = vpop.permute.xlu1 %3427 }
0x140a   : > { %v3426_v14 = vpop.permute.xlu0 %3425 }
0x140b   : > { %9797 = vmatprep.subr.msk.bf16.mxu1 %vm11030_vm8, %v9795_v48 }
0x140c   : > { %9800 = vmatpush3.bf16.msk.msra.mxu1 %vm11030_vm8, %v9795_v48 }
0x140d   : > { %9803 = vmatprep.subr.msk.bf16.mxu1 %vm11026_vm6, %v9801_v11 }
0x1411   : > { %v10342_v47 = vpop.eup %10341 }
0x1412   : > { %v10344_v12 = vpop.eup %10343  ;;  %9238 = vmatprep.mubr.msk.f32.mxu1 %vm1585_vm11, %v10342_v47  ;;  %v3327_v20 = vsel %vm1585_vm11, %v10342_v47, 0.0 }
0x1413   : > { %9239 = vmatmul.mubr.msk.f32.vlgmr.msra.gmra.mrb[18].mxu1 %vm1585_vm11, %v10344_v12  ;;  %v3330_v23 = vsel %vm1589_vm10, %v10344_v12, 0.0 }
0x1414   : > { %9245 = vmatprep.mubr.msk.f32.mxu1 %vm1499_vm4, %v3426_v14 }
0x1415   : > { %9806 = vmatpush3.bf16.xpose.msk.msra.mxu1 %vm11026_vm6, %v9801_v11 }
0x141c   : > { %9246 = vmatmul.mubr.msk.f32.vlgmr.msra.gmra.mrb[20].mxu1 %vm1499_vm4, %v3428_v57 }
0x14e6   : > { %v11332_v15 = vpop.f32.mrb[18].mxu1 }
0x14e7   : > { %v3412_v16 = vpop.f32.mrb[19].mxu1 }
0x14ef   : > { %v9247_v1 = vpop.f32.mrb[20].mxu1 }
0x14f0   : > { %v3513_v6 = vadd.f32 %v9247_v1, %v11051_v9  ;;  %v3507_v56 = vpop.f32.mrb[21].mxu1 }
0x14f1   : > { %v3508_v52 = vadd.f32 %v3507_v56, %v11051_v9 }
0x14f2   : > { %v3519_v17 = vsel %vm1589_vm10, %v3513_v6, -inf }
0x14f3   : > { %3520 = vmax.xlane.f32.xlu1 %v3519_v17  ;;  %v3516_v53 = vsel %vm1585_vm11, %v3508_v52, -inf }
0x14f4   : > { %3517 = vmax.xlane.f32.xlu0 %v3516_v53 }
0x14f7   : > { %3127 = vadd.xlane.f32.xlu1 %v3126_v18 }
0x14fb   : > { %3130 = vadd.xlane.f32.xlu1 %v3129_v19 }
0x14ff   : > { %3328 = vadd.xlane.f32.xlu1 %v3327_v20 }
0x1503   : > { %3331 = vadd.xlane.f32.xlu1 %v3330_v23 }
0x150a   : > { %10211 = vrot.lane.b32.xlu0 %v11224_v46, %s12181_s17 }
0x1580   : > { %v3521_v24 = vpop.xlane.xlu1 %3520 }
0x1581   : > { %v3523_v27 = vsub.f32 %v3513_v6, %v3521_v24  ;;  %v3518_v28 = vpop.xlane.xlu0 %3517 }
0x1582   : > { %v3522_v29 = vsub.f32 %v3508_v52, %v3518_v28 }
0x1583   : > { %v3526_v31 = vmul.f32 1.442695, %v3523_v27 }
0x1584   : > { %v3524_v32 = vmul.f32 1.442695, %v3522_v29  ;;  %v3128_v38 = vpop.xlane.xlu1 %3127 }
0x1585   : > { %10345 = vpow2.f32 %v3526_v31  ;;  %v10212_v33 = vpop.permute.xlu0 %10211  ;;  %v8604_v31 = vld [vmem:[%s12138_s14 + $0x1] ss:$0 sm:$0xff]  ;;  %s12190_s14 = smov %s12189_s18 }
0x1586   : > { %10347 = vpow2.f32 %v3524_v32  ;;  %v10214_v34 = vunpack.i.h.bf16 %v10212_v33  ;;  %v10213_v35 = vunpack.i.l.bf16 %v10212_v33 }
0x1588   : > { %v9807_v37 = vpack.c.bf16 %v10214_v34, %v10213_v35  ;;  %v3131_v25 = vpop.xlane.xlu1 %3130 }
0x158a   : > { %9809 = vmatprep.subr.msk.bf16.mxu0 %vm11030_vm8, %v9807_v37 }
0x158b   : > { %9812 = vmatpush3.bf16.msk.msra.mxu0 %vm11030_vm8, %v9807_v37 }
0x158c   : > { %v3329_v55 = vpop.xlane.xlu1 %3328  ;;  %9814 = vmatprep.subr.bf16.mxu0 %v9813_v21 }
0x158d   : > { %10349 = vrcp.f32 %v3329_v55 }
0x158e   : > { %10351 = vrcp.f32 %v3128_v38 }
0x158f   : > { %v10346_v46 = vpop.eup %10345  ;;  %10353 = vrcp.f32 %v3131_v25 }
0x1590   : > { %v10348_v40 = vpop.eup %10347  ;;  %v3531_v41 = vsel %vm1589_vm10, %v10346_v46, 0.0  ;;  %v3332_v59 = vpop.xlane.xlu1 %3331 }
0x1591   : > { %3532 = vadd.xlane.f32.xlu1 %v3531_v41  ;;  %9252 = vmatprep.mubr.msk.f32.mxu0 %vm1585_vm11, %v10348_v40  ;;  %v3528_v50 = vsel %vm1585_vm11, %v10348_v40, 0.0  ;;  %10355 = vrcp.f32 %v3332_v59 }
0x1592   : > { %3529 = vadd.xlane.f32.xlu0 %v3528_v50  ;;  %9253 = vmatmul.mubr.msk.f32.vlgmr.msra.gmra.mrb[18].mxu0 %vm1585_vm11, %v10346_v46 }
0x1593   : > { %9816 = vmatpush3.bf16.msra.mxu0 %v9813_v21  ;;  %v8613_v21 = vld [vmem:[%s12133_s30 + $0x30] sm:$0xff] }
0x1595   : > { %2926 = vadd.xlane.f32.xlu1 %v2925_v54 }
0x1597   : > { %v10350_v61 = vpop.eup %10349 }
0x1598   : > { %v10352_v63 = vpop.eup %10351  ;;  %v3423_v45 = vmul.f32 %v10350_v61, %v3412_v16 }
0x1599   : > { %2929 = vadd.xlane.f32.xlu1 %v2928_v58  ;;  %v3222_v30 = vmul.f32 %v10352_v63, %v11306_v51  ;;  %v10354_v43 = vpop.eup %10353  ;;  %v8573_v51 = vld [vmem:[%s12140_s8 + $0x30] sm:$0xff]  ;;  %s12185_s8 = sld [smem:[#allocation13_spill]] }
0x159a   : > { %v3223_v36 = vmul.f32 %v10354_v43, %v11304_v49  ;;  %v9817_v10 = vpack.c.bf16 %v8574_v22, %v8573_v51  ;;  %v10643_v22 = vmov 0.0|0.0  }
0x159b   : > { %v10356_v0 = vpop.eup %10355 }
0x159c   : > { %v3424_v2 = vmul.f32 %v10356_v0, %v11332_v15  ;;  %9818 = vmatprep.subr.bf16.mxu0 %v9817_v10 }
0x159d   : > { %9820 = vmatpush3.bf16.msra.mxu0 %v9817_v10 }
0x159f   : > { %s1332_s10 = scalar_lea.vmem %s12185_s8, %s8516_s29  ;;  %s12186_s29 = sld [smem:[#allocation31_spill]] }
0x15a0   : > { %v11387_v46 = vld [vmem:[%s1332_s10] sm:$0xff]  ;;  %s12187_s8 = sld [smem:[#allocation29_spill]]  ;;  %s12188_s10 = sld [smem:[#allocation30_spill]] }
0x15a1   : > { %v4068_v25 = vsel %vm1340_vm1, %v11387_v46, 0.0 }
0x15a8   : > { %3636 = vrot.lane.b32.xlu0 %v3423_v45, %s12182_s20 }
0x15aa   : > { %3628 = vrot.lane.b32.xlu1 %v3222_v30, %s12183_s21 }
0x15ae   : > { %3630 = vrot.lane.b32.xlu1 %v3223_v36, %s12183_s21 }
0x15b2   : > { %3638 = vrot.lane.b32.xlu1 %v3424_v2, %s12182_s20  ;;  %v8611_v2 = vld [vmem:[%s12133_s30 + $0x20] sm:$0xff] }
0x15b3   : > { %v9821_v4 = vpack.c.bf16 %v8612_v3, %v8611_v2  ;;  %v8637_v3 = vld [vmem:[%s12189_s18] ss:$0 sm:$0xff]  ;;  %s12193_s18 = smov 120  }
0x15b5   : > { %9822 = vmatprep.subr.bf16.mxu1 %v9821_v4 }
0x15b6   : > { %9824 = vmatpush3.bf16.msra.mxu1 %v9821_v4 }
0x161e   : > { %v3533_v7 = vpop.xlane.xlu1 %3532 }
0x161f   : > { %v3530_v5 = vpop.xlane.xlu0 %3529 }
0x1620   : > { %10357 = vrcp.f32 %v3530_v5  ;;  %v8614_v5 = vld [vmem:[%s12133_s30 + $0x38] sm:$0xff]  ;;  %s12197_s30 = sld [smem:[#allocation37_spill]] }
0x1621   : > { %10359 = vrcp.f32 %v3533_v7  ;;  %v9825_v51 = vpack.c.bf16 %v8614_v5, %v8613_v21 }
0x1622   : > { %v2927_v57 = vpop.xlane.xlu1 %2926 }
0x1623   : > { %10361 = vrcp.f32 %v2927_v57  ;;  %v3637_v19 = vpop.permute.xlu0 %3636  ;;  %9826 = vmatprep.subr.bf16.mxu1 %v9825_v51 }
0x1624   : > { %9828 = vmatpush3.bf16.msra.mxu1 %v9825_v51 }
0x1625   : > { %9845 = vmatprep.subr.bf16.mxu1 %v10643_v22 }
0x1626   : > { %v2930_v15 = vpop.xlane.xlu1 %2929 }
0x1627   : > { %10363 = vrcp.f32 %v2930_v15 }
0x162a   : > { %v10358_v48 = vpop.eup %10357  ;;  %v3629_v16 = vpop.permute.xlu1 %3628 }
0x162b   : > { %v10360_v12 = vpop.eup %10359 }
0x162d   : > { %v10362_v1 = vpop.eup %10361 }
0x162e   : > { %v3631_v6 = vpop.permute.xlu1 %3630  ;;  %v3021_v56 = vmul.f32 %v10362_v1, %v11302_v44 }
0x1630   : > { %v3650_v53 = vsel %vm1499_vm4, %v3021_v56, %v3629_v16  ;;  %v8609_v16 = vld [vmem:[%s12135_s19 + $0x1] ss:$0 sm:$0xff]  ;;  %s12194_s19 = sld [smem:[#allocation33_spill]] }
0x1631   : > { %v10364_v52 = vpop.eup %10363  ;;  %v3652_v20 = vsel %vm2327_vm12, %v3650_v53, %v3637_v19  ;;  %v4095_v53 = vld [vmem:[%s12186_s29] sm:$0xff] }
0x1632   : > { %v3639_v17 = vpop.permute.xlu1 %3638  ;;  %v3022_v18 = vmul.f32 %v10364_v52, %v11300_v42  ;;  %v8610_v52 = vld [vmem:[%s12134_s24 + $0x1] ss:$0 sm:$0xff]  ;;  %s12196_s24 = sld [smem:[#allocation39_spill]] }
0x1634   : > { %v3651_v24 = vsel %vm1499_vm4, %v3022_v18, %v3631_v6  ;;  %v4096_v18 = vld [vmem:[%s12186_s29 + $0x8] sm:$0xff] }
0x1635   : > { %v3653_v44 = vsel %vm2327_vm12, %v3651_v24, %v3639_v17  ;;  %v9846_v24 = vpack.c.bf16 %v4096_v18, %v4095_v53 }
0x1665   : > { %v9254_v49 = vpop.f32.mrb[18].mxu0 }
0x1666   : > { %v3613_v11 = vpop.f32.mrb[19].mxu0  ;;  %v3625_v14 = vmul.f32 %v10360_v12, %v9254_v49 }
0x1667   : > { %v3624_v47 = vmul.f32 %v10358_v48, %v3613_v11 }
0x1669   : > { %3644 = vrot.lane.b32.xlu1 %v3624_v47, %s12184_s25 }
0x166d   : > { %3646 = vrot.lane.b32.xlu1 %v3625_v14, %s12184_s25 }
0x16db   : > { %v3645_v23 = vpop.permute.xlu1 %3644 }
0x16dc   : > { %v3654_v27 = vsel %vm2330_vm13, %v3652_v20, %v3645_v23 }
0x16dd   : > { %9263 = vmatprep.mubr.msk.f32.mxu0 %vm1340_vm1, %v3654_v27 }
0x16df   : > { %v3647_v28 = vpop.permute.xlu1 %3646 }
0x16e0   : > { %v3655_v29 = vsel %vm2330_vm13, %v3653_v44, %v3647_v28  ;;  %v4097_v28 = vld [vmem:[%s12186_s29 + $0x10] sm:$0xff] }
0x16e1   : > { %9264 = vmatmul.mubr.msk.f32.vlgmr.msra.gmra.mrb[20].mxu0 %vm1340_vm1, %v3655_v29  ;;  %v4098_v29 = vld [vmem:[%s12186_s29 + $0x18] sm:$0xff] }
0x17b4   : > { %v9265_v42 = vpop.f32.mrb[20].mxu0 }
0x17b5   : > { %v3740_v32 = vadd.f32 %v9265_v42, %v8604_v31  ;;  %v3734_v33 = vpop.f32.mrb[21].mxu0  ;;  %v9849_v42 = vpack.c.bf16 %v4098_v29, %v4097_v28 }
0x17b6   : > { %v3735_v34 = vadd.f32 %v8604_v31, %v3734_v33  ;;  %v8635_v31 = vld [vmem:[%s12187_s8] ss:$0 sm:$0xff] }
0x17b7   : > { %v3744_v35 = vadd.f32 %v3740_v32, %v11217_v39  ;;  %v8636_v33 = vld [vmem:[%s12188_s10] ss:$0 sm:$0xff] }
0x17b8   : > { %v3743_v37 = vadd.f32 %v3735_v34, %v11215_v26 }
0x17b9   : > { %v3752_v38 = vsel %vm1344_vm2, %v3744_v35, 0.0 }
0x17ba   : > { %3753 = vadd.xlane.f32.xlu0 %v3752_v38  ;;  %v3749_v40 = vsel %vm1340_vm1, %v3743_v37, 0.0 }
0x17bb   : > { %3750 = vadd.xlane.f32.xlu1 %v3749_v40  ;;  %v8621_v40 = vld [vmem:[%s12137_s12 + $0x50] sm:$0xff] }
0x17bf   : > { %4069 = vadd.xlane.f32.xlu1 %v4068_v25  ;;  %v8622_v25 = vld [vmem:[%s12137_s12 + $0x58] sm:$0xff] }
0x1847   : > { %v3754_v41 = vpop.xlane.xlu0 %3753 }
0x1848   : > { %v3756_v50 = vmul.f32 0.03125, %v3754_v41  ;;  %v3751_v54 = vpop.xlane.xlu1 %3750  ;;  %v9833_v41 = vpack.c.bf16 %v8622_v25, %v8621_v40 }
0x1849   : > { %v3755_v55 = vmul.f32 0.03125, %v3751_v54  ;;  %v8624_v54 = vld [vmem:[%s12137_s12 + $0x68] sm:$0xff] }
0x184a   : > { %v3758_v39 = vsub.f32 %v3744_v35, %v3756_v50  ;;  %v8619_v35 = vld [vmem:[%s12137_s12 + $0x40] sm:$0xff] }
0x184b   : > { %v3757_v26 = vsub.f32 %v3743_v37, %v3755_v55  ;;  %v8620_v37 = vld [vmem:[%s12137_s12 + $0x48] sm:$0xff]  ;;  %v8623_v50 = vld [vmem:[%s12137_s12 + $0x60] sm:$0xff] }
0x184c   : > { %v4070_v58 = vpop.xlane.xlu1 %4069  ;;  %v3760_v59 = vmul.f32 %v3758_v39, %v3758_v39  ;;  %v9829_v38 = vpack.c.bf16 %v8620_v37, %v8619_v35  ;;  %v9837_v55 = vpack.c.bf16 %v8624_v54, %v8623_v50 }
0x184d   : > { %v4071_v61 = vmul.f32 0.03125, %v4070_v58  ;;  %v3759_v63 = vmul.f32 %v3757_v26, %v3757_v26 }
0x184e   : > { %v3764_v45 = vsel %vm1344_vm2, %v3760_v59, 0.0  ;;  %9830 = vmatprep.subr.bf16.mxu0 %v9829_v38  ;;  %v8616_v59 = vld [vmem:[%s12136_s6 + $0x1] ss:$0 sm:$0xff]  ;;  %s12192_s6 = smov 96  }
0x184f   : > { %v4072_v30 = vsub.f32 %v11387_v46, %v4071_v61  ;;  %3765 = vadd.xlane.f32.xlu1 %v3764_v45  ;;  %v3761_v43 = vsel %vm1340_vm1, %v3759_v63, 0.0  ;;  %9832 = vmatpush3.bf16.msra.mxu0 %v9829_v38 }
0x1850   : > { %3762 = vadd.xlane.f32.xlu0 %v3761_v43  ;;  %9834 = vmatprep.subr.bf16.mxu0 %v9833_v41 }
0x1851   : > { %v4073_v36 = vmul.f32 %v4072_v30, %v4072_v30 }
0x1853   : > { %v4074_v0 = vsel %vm1340_vm1, %v4073_v36, 0.0  ;;  %9836 = vmatpush3.bf16.msra.mxu0 %v9833_v41 }
0x1854   : > { %4075 = vadd.xlane.f32.xlu0 %v4074_v0  ;;  %9838 = vmatprep.subr.bf16.mxu0 %v9837_v55 }
0x1857   : > { %9840 = vmatpush3.bf16.msra.mxu0 %v9837_v55 }
0x18dc   : > { %v3766_v7 = vpop.xlane.xlu1 %3765 }
0x18dd   : > { %v3768_v10 = vmul.f32 0.03125, %v3766_v7  ;;  %v3763_v49 = vpop.xlane.xlu0 %3762 }
0x18de   : > { %v3767_v48 = vmul.f32 0.03125, %v3763_v49 }
0x18df   : > { %v3770_v11 = vadd.f32 1e-12, %v3768_v10 }
0x18e0   : > { %v3769_v47 = vadd.f32 1e-12, %v3767_v48 }
0x18e1   : > { %10365 = vrsqrt.f32 %v3770_v11  ;;  %v4076_v12 = vpop.xlane.xlu0 %4075 }
0x18e2   : > { %10367 = vrsqrt.f32 %v3769_v47  ;;  %v4077_v14 = vmul.f32 0.03125, %v4076_v12 }
0x18e4   : > { %v4078_v57 = vadd.f32 1e-05, %v4077_v14 }
0x18e6   : > { %10369 = vrsqrt.f32 %v4078_v57 }
0x18eb   : > { %v10366_v15 = vpop.eup %10365 }
0x18ec   : > { %v10368_v1 = vpop.eup %10367  ;;  %v3774_v6 = vmul.f32 %v10366_v15, %v3758_v39  ;;  %v8625_v39 = vld [vmem:[%s12137_s12 + $0x70] sm:$0xff] }
0x18ed   : > { %v3773_v56 = vmul.f32 %v10368_v1, %v3757_v26  ;;  %v8626_v26 = vld [vmem:[%s12137_s12 + $0x78] sm:$0xff]  ;;  %s12191_s12 = smov 88  }
0x18ee   : > { %v3782_v17 = vmul.f32 %v8609_v16, %v3774_v6  ;;  %v9841_v58 = vpack.c.bf16 %v8626_v26, %v8625_v39 }
0x18ef   : > { %v3781_v19 = vmul.f32 %v8609_v16, %v3773_v56 }
0x18f0   : > { %v10370_v20 = vpop.eup %10369  ;;  %v11407_v44 = vadd.f32 %v8610_v52, %v3782_v17  ;;  %9842 = vmatprep.subr.bf16.mxu0 %v9841_v58 }
0x18f1   : > { %v11405_v23 = vadd.f32 %v8610_v52, %v3781_v19  ;;  %v4080_v27 = vmul.f32 %v10370_v20, %v4072_v30  ;;  %9844 = vmatpush3.bf16.msra.mxu0 %v9841_v58 }
0x18f2   : > { %9317 = vmatprep.subr.mxu0 %v10627_v8 }
0x18f3   : > { %9274 = vmatprep.mubr.msk.f32.mxu1 %vm1340_vm1, %v11405_v23  ;;  %v4087_v32 = vmul.f32 %v8635_v31, %v4080_v27 }
0x18f4   : > { %9275 = vmatmul.mubr.msk.f32.vlgmr.msra.gmra.mrb[22].mxu1 %vm1340_vm1, %v11407_v44 }
0x18f5   : > { %9847 = vmatpush3.bf16.msra.mxu1 %v9846_v24  ;;  %9304 = vmatprep.mubr.msk.f32.mxu1 %vm10644_vm15, %v10627_v8  ;;  %v4094_v34 = vadd.f32 %v8636_v33, %v4087_v32 }
0x18f6   : > { %9848 = vmatprep.subr.bf16.mxu1 %v10643_v22 }
0x18f9   : > { %9850 = vmatpush3.bf16.msra.mxu1 %v9849_v42 }
0x18fa   : > { %9307 = vmatprep.subr.mxu1 %v10627_v8 }
0x18fc   : > { %9305 = vmatmul.mubr.msk.f32.vlgmr.msra.gmra.mrb[24].mxu1 %vm1340_vm1, %v4094_v34 }
0x18fd   : > { %9309 = vmatprep.mubr.msk.f32.mxu1 %vm10644_vm15, %v10627_v8 }
0x19c7   : > { %v9276_v61 = vpop.f32.mrb[22].mxu1 }
0x19c8   : > { %v3882_v63 = vadd.f32 %v9276_v61, %v8616_v59  ;;  %v3876_v45 = vpop.f32.mrb[23].mxu1 }
0x19c9   : > { %v3877_v30 = vadd.f32 %v8616_v59, %v3876_v45 }
0x19ca   : > { %v3886_v43 = vmul.f32 %v3882_v63, %v3882_v63 }
0x19cb   : > { %v3885_v36 = vmul.f32 %v3877_v30, %v3877_v30 }
0x19cc   : > { %v3888_v0 = vmul.f32 %v3886_v43, %v3882_v63 }
0x19cd   : > { %v3887_v2 = vmul.f32 %v3885_v36, %v3877_v30 }
0x19ce   : > { %v3890_v4 = vmul.f32 0.044715, %v3888_v0 }
0x19cf   : > { %v3889_v21 = vmul.f32 0.044715, %v3887_v2  ;;  %v4175_v5 = vpop.f32.mrb[24].mxu1 }
0x19d0   : > { %v3892_v51 = vadd.f32 %v3890_v4, %v3882_v63  ;;  %v11435_v7 = vadd.f32 %v8637_v3, %v4175_v5  ;;  %v9306_v10 = vpop.f32.mrb[25].mxu1 }
0x19d1   : > { %v3891_v49 = vadd.f32 %v3889_v21, %v3877_v30 }
0x19d2   : > { %v3894_v48 = vmul.f32 0.7978846, %v3892_v51  ;;  %4352 = vrot.lane.b32.xlu0 %v11435_v7, %s12191_s12  ;;  %4186 = vrot.lane.b32.xlu1 %v11435_v7, %s12192_s6  ;;  %v4184_v47 = vmul.f32 0.35355338, %v11435_v7 }
0x19d3   : > { %v3893_v11 = vmul.f32 0.7978846, %v3891_v49 }
0x19d4   : > { %10371 = vtanh.f32 %v3894_v48 }
0x19d5   : > { %10373 = vtanh.f32 %v3893_v11 }
0x19d6   : > { %4515 = vrot.lane.b32.xlu0 %v4184_v47, %s12177_s3  ;;  %4350 = vrot.lane.b32.xlu1 %v4184_v47, %s12193_s18 }
0x19da   : > { %4680 = vrot.lane.b32.xlu0 %v4184_v47, %s12179_s5  ;;  %4517 = vrot.lane.b32.xlu1 %v11435_v7, %s12175_s23 }
0x19de   : > { %v10372_v12 = vpop.eup %10371  ;;  %4682 = vrot.lane.b32.xlu1 %v11435_v7, %s12178_s4 }
0x19df   : > { %v10374_v14 = vpop.eup %10373  ;;  %v3898_v57 = vadd.f32 1.0, %v10372_v12 }
0x19e0   : > { %v3897_v15 = vadd.f32 1.0, %v10374_v14 }
0x19e1   : > { %v3900_v16 = vmul.f32 0.5, %v3898_v57 }
0x19e2   : > { %v3899_v1 = vmul.f32 0.5, %v3897_v15 }
0x19e3   : > { %v3902_v56 = vmul.f32 %v3900_v16, %v3882_v63 }
0x19e4   : > { %v3901_v6 = vmul.f32 %v3899_v1, %v3877_v30 }
0x19e6   : > { %9293 = vmatprep.mubr.msk.f32.mxu0 %vm2591_vm14, %v3901_v6 }
0x19e7   : > { %9294 = vmatmul.mubr.msk.f32.vlgmr.msra.gmra.mrb[22].mxu0 %vm2591_vm14, %v3902_v56 }
0x19e8   : > { %9319 = vmatprep.mubr.msk.f32.mxu0 %vm10644_vm15, %v10627_v8 }
0x1a44   : > { %v4353_v52 = vpop.permute.xlu0 %4352  ;;  %v4187_v17 = vpop.permute.xlu1 %4186 }
0x1a45   : > { %9308 = vmatpush3.xpose.msk.msra.mxu1 %vm1499_vm4, %v4187_v17  ;;  %9318 = vmatpush3.xpose.msk.msra.mxu0 %vm1499_vm4, %v4353_v52  ;;  %v8628_v17 = vld [vmem:[%s12171_s1 + $0x1] ss:$0 sm:$0xff]  ;;  %s12195_s1 = sld [smem:[#allocation34_spill]] }
0x1a46   : > { %9327 = vmatprep.subr.mxu0 %v10627_v8  ;;  %9312 = vmatprep.subr.mxu1 %v10627_v8 }
0x1a48   : > { %v4351_v53 = vpop.permute.xlu1 %4350  ;;  %9310 = vmatmul.mubr.msk.f32.vlgmr.msra.gmra.mrb[26].mxu1 %vm1499_vm4, %v4184_v47  ;;  %v4516_v19 = vpop.permute.xlu0 %4515 }
0x1a49   : > { %9320 = vmatmul.mubr.msk.f32.vlgmr.msra.gmra.mrb[24].mxu0 %vm1499_vm4, %v4351_v53  ;;  %9314 = vmatprep.mubr.msk.f32.mxu1 %vm10644_vm15, %v10627_v8 }
0x1a4a   : > { %9329 = vmatprep.mubr.msk.f32.mxu0 %vm10644_vm15, %v10627_v8 }
0x1a4c   : > { %v4518_v18 = vpop.permute.xlu1 %4517  ;;  %v4681_v24 = vpop.permute.xlu0 %4680 }
0x1a4d   : > { %9328 = vmatpush3.xpose.msk.msra.mxu0 %vm1499_vm4, %v4518_v18 }
0x1a4e   : > { %9337 = vmatprep.subr.mxu0 %v10627_v8 }
0x1a50   : > { %v4683_v20 = vpop.permute.xlu1 %4682  ;;  %9330 = vmatmul.mubr.msk.f32.vlgmr.msra.gmra.mrb[26].mxu0 %vm1499_vm4, %v4516_v19 }
0x1a51   : > { %9338 = vmatpush3.xpose.msk.msra.mxu0 %vm1499_vm4, %v4683_v20  ;;  %9339 = vmatprep.mubr.msk.f32.mxu0 %vm10644_vm15, %v10627_v8  ;;  %v4179_v20 = vld [vmem:[%s12194_s19] sm:$0xff] }
0x1a52   : > { %9851 = vmatprep.subr.bf16.mxu0 %v10643_v22 }
0x1a54   : > { %9340 = vmatmul.mubr.msk.f32.vlgmr.msra.gmra.mrb[28].mxu0 %vm1499_vm4, %v4681_v24  ;;  %v4180_v24 = vld [vmem:[%s12194_s19 + $0x8] sm:$0xff] }
0x1a55   : > { %9355 = vmatprep.mubr.msk.f32.mxu0 %vm10644_vm15, %v10627_v8 }
0x1aba   : > { %v11473_v27 = vpop.f32.mrb[22].mxu0 }
0x1abb   : > { %v11475_v28 = vpop.f32.mrb[23].mxu0 }
0x1abc   : > { %v3993_v53 = vadd.f32 %v8628_v17, %v11475_v28 }
0x1abe   : > { %v4001_v19 = vadd.f32 %v3993_v53, %v11405_v23 }
0x1b1b   : > { %v4259_v29 = vpop.f32.mrb[26].mxu1 }
0x1b1c   : > { %v4260_v31 = vadd.f32 %v4259_v29, %v10989_v13  ;;  %v9311_v42 = vpop.f32.mrb[27].mxu1  ;;  %v4424_v32 = vpop.f32.mrb[24].mxu0  ;;  %v4181_v29 = vld [vmem:[%s12194_s19 + $0x10] sm:$0xff] }
0x1b1d   : > { %v4425_v33 = vadd.f32 %v4424_v32, %v10989_v13  ;;  %v9321_v34 = vpop.f32.mrb[25].mxu0  ;;  %v4182_v42 = vld [vmem:[%s12194_s19 + $0x18] sm:$0xff] }
0x1b1e   : > { %v4263_v35 = vsel %vm1499_vm4, %v4260_v31, -inf  ;;  %v9855_v32 = vpack.c.bf16 %v4182_v42, %v4181_v29 }
0x1b1f   : > { %4264 = vmax.xlane.f32.xlu1 %v4263_v35  ;;  %v4428_v37 = vsel %vm1499_vm4, %v4425_v33, -inf }
0x1b20   : > { %4429 = vmax.xlane.f32.xlu0 %v4428_v37 }
0x1b23   : > { %v4589_v38 = vpop.f32.mrb[26].mxu0 }
0x1b24   : > { %v4590_v40 = vadd.f32 %v4589_v38, %v10989_v13  ;;  %v9331_v25 = vpop.f32.mrb[27].mxu0 }
0x1b26   : > { %v4593_v41 = vsel %vm1499_vm4, %v4590_v40, -inf }
0x1b27   : > { %4594 = vmax.xlane.f32.xlu0 %v4593_v41  ;;  %v4754_v50 = vpop.f32.mrb[28].mxu0 }
0x1b28   : > { %v9341_v54 = vpop.f32.mrb[29].mxu0  ;;  %v4755_v55 = vadd.f32 %v4754_v50, %v10989_v13  ;;  %v3998_v50 = vadd.f32 %v11473_v27, %v8628_v17 }
0x1b2a   : > { %v4758_v39 = vsel %vm1499_vm4, %v4755_v55, -inf  ;;  %v4002_v54 = vadd.f32 %v3998_v50, %v11407_v44  ;;  %v4971_v50 = vld [vmem:[%s12197_s30 + $0x10] sm:$0xff] }
0x1b30   : > { %4437 = vrot.lane.b32.xlu1 %v11435_v7, %s12174_s2 }
0x1b3d   : > { %4272 = vrot.lane.b32.xlu0 %v11435_v7, %s12176_s28 }
0x1b41   : > { %4767 = vrot.lane.b32.xlu0 %v11435_v7, %s12181_s17 }
0x1b54   : > { %4759 = vmax.xlane.f32.xlu1 %v4758_v39 }
0x1b65   : > { %4602 = vrot.lane.b32.xlu1 %v11435_v7, %s12180_s9 }
0x1bac   : > { %v4265_v26 = vpop.xlane.xlu1 %4264 }
0x1bad   : > { %v4266_v58 = vsub.f32 %v4260_v31, %v4265_v26  ;;  %v4430_v59 = vpop.xlane.xlu0 %4429  ;;  %v9852_v31 = vpack.c.bf16 %v4180_v24, %v4179_v20 }
0x1bae   : > { %v4431_v61 = vsub.f32 %v4425_v33, %v4430_v59  ;;  %v4007_v33 = vsel %vm1340_vm1, %v4001_v19, 0.0 }
0x1baf   : > { %v4267_v63 = vmul.f32 1.442695, %v4266_v58  ;;  %9853 = vmatpush3.bf16.msra.mxu0 %v9852_v31 }
0x1bb0   : > { %v4432_v45 = vmul.f32 1.442695, %v4431_v61  ;;  %v4438_v4 = vpop.permute.xlu1 %4437  ;;  %9854 = vmatprep.subr.bf16.mxu0 %v10643_v22 }
0x1bb1   : > { %10375 = vpow2.f32 %v4267_v63 }
0x1bb2   : > { %10377 = vpow2.f32 %v4432_v45 }
0x1bb3   : > { %9856 = vmatpush3.bf16.msra.mxu0 %v9855_v32  ;;  %v8633_v32 = vld [vmem:[%s12172_s11 + $0x1] ss:$0 sm:$0xff]  ;;  %s12198_s11 = sld [smem:[#allocation35_spill]] }
0x1bb4   : > { %v4595_v30 = vpop.xlane.xlu0 %4594 }
0x1bb5   : > { %v4596_v43 = vsub.f32 %v4590_v40, %v4595_v30 }
0x1bb7   : > { %v4597_v36 = vmul.f32 1.442695, %v4596_v43 }
0x1bb8   : > { %v4273_v0 = vpop.permute.xlu0 %4272 }
0x1bb9   : > { %10379 = vpow2.f32 %v4597_v36  ;;  %9313 = vmatpush3.msra.mxu1 %v4273_v0 }
0x1bba   : > { %9322 = vmatprep.subr.mxu1 %v10627_v8 }
0x1bbb   : > { %v10376_v2 = vpop.eup %10375 }
0x1bbc   : > { %v10378_v3 = vpop.eup %10377  ;;  %9315 = vmatmul.mubr.msk.f32.vlgmr.msra.gmra.mrb[28].mxu1 %vm1499_vm4, %v10376_v2  ;;  %v4269_v5 = vsel %vm1499_vm4, %v10376_v2, 0.0  ;;  %v4768_v47 = vpop.permute.xlu0 %4767 }
0x1bbd   : > { %9323 = vmatpush3.msra.mxu1 %v4438_v4  ;;  %v4434_v21 = vsel %vm1499_vm4, %v10378_v3, 0.0  ;;  %9324 = vmatprep.mubr.msk.f32.mxu1 %vm10644_vm15, %v10627_v8 }
0x1bbe   : > { %4435 = vadd.xlane.f32.xlu1 %v4434_v21  ;;  %9332 = vmatprep.subr.mxu1 %v10627_v8  ;;  %v8651_v21 = vld [vmem:[%s12195_s1] ss:$0 sm:$0xff] }
0x1bc0   : > { %9325 = vmatmul.mubr.msk.f32.vlgmr.msra.gmra.mrb[30].mxu1 %vm1499_vm4, %v10378_v3 }
0x1bc1   : > { %9334 = vmatprep.mubr.msk.f32.mxu1 %vm10644_vm15, %v10627_v8 }
0x1bc2   : > { %4270 = vadd.xlane.f32.xlu1 %v4269_v5 }
0x1bc3   : > { %v10380_v51 = vpop.eup %10379 }
0x1bc4   : > { %v4599_v7 = vsel %vm1499_vm4, %v10380_v51, 0.0 }
0x1bc5   : > { %4600 = vadd.xlane.f32.xlu0 %v4599_v7 }
0x1be1   : > { %v4760_v10 = vpop.xlane.xlu1 %4759 }
0x1be2   : > { %v4761_v49 = vsub.f32 %v4755_v55, %v4760_v10  ;;  %v4010_v55 = vsel %vm1344_vm2, %v4002_v54, 0.0 }
0x1be4   : > { %v4762_v48 = vmul.f32 1.442695, %v4761_v49 }
0x1be5   : > { %v4603_v11 = vpop.permute.xlu1 %4602 }
0x1be6   : > { %10381 = vpow2.f32 %v4762_v48  ;;  %9333 = vmatpush3.msra.mxu1 %v4603_v11 }
0x1be7   : > { %9335 = vmatmul.mubr.msk.f32.vlgmr.msra.gmra.mrb[32].mxu1 %vm1499_vm4, %v10380_v51  ;;  %9342 = vmatprep.subr.mxu1 %v10627_v8 }
0x1be8   : > { %9343 = vmatpush3.msra.mxu1 %v4768_v47  ;;  %9344 = vmatprep.mubr.msk.f32.mxu1 %vm10644_vm15, %v10627_v8 }
0x1be9   : > { %9857 = vmatprep.subr.bf16.mxu1 %v10643_v22 }
0x1bf0   : > { %v10382_v12 = vpop.eup %10381 }
0x1bf1   : > { %9345 = vmatmul.mubr.msk.f32.vlgmr.msra.gmra.mrb[34].mxu1 %vm1499_vm4, %v10382_v12  ;;  %v4764_v14 = vsel %vm1499_vm4, %v10382_v12, 0.0  ;;  %v5053_v12 = vld [vmem:[%s12196_s24] sm:$0xff] }
0x1bf2   : > { %4765 = vadd.xlane.f32.xlu0 %v4764_v14  ;;  %9366 = vmatprep.mubr.msk.f32.mxu1 %vm10644_vm15, %v10627_v8  ;;  %v5054_v14 = vld [vmem:[%s12196_s24 + $0x8] sm:$0xff] }
0x1c4b   : > { %v4436_v57 = vpop.xlane.xlu1 %4435 }
0x1c4c   : > { %10383 = vrcp.f32 %v4436_v57  ;;  %v5055_v57 = vld [vmem:[%s12196_s24 + $0x10] sm:$0xff] }
0x1c4f   : > { %v4271_v39 = vpop.xlane.xlu1 %4270 }
0x1c52   : > { %v4601_v18 = vpop.xlane.xlu0 %4600 }
0x1c53   : > { %10385 = vrcp.f32 %v4601_v18 }
0x1c56   : > { %v10384_v1 = vpop.eup %10383 }
0x1c5d   : > { %v10386_v35 = vpop.eup %10385 }
0x1c7f   : > { %v4766_v34 = vpop.xlane.xlu0 %4765 }
0x1c80   : > { %10387 = vrcp.f32 %v4766_v34 }
0x1c81   : > { %10389 = vrcp.f32 %v4271_v39 }
0x1c8a   : > { %v10388_v23 = vpop.eup %10387 }
0x1c8b   : > { %v10390_v26 = vpop.eup %10389 }
0x1c8f   : > { %v4344_v15 = vpop.f32.mrb[28].mxu1 }
0x1c90   : > { %v9316_v16 = vpop.f32.mrb[29].mxu1  ;;  %v4349_v61 = vmul.f32 %v10390_v26, %v4344_v15  ;;  %v9863_v15 = vpack.c.bf16 %v5054_v14, %v5053_v12 }
0x1c91   : > { %v5056_v16 = vld [vmem:[%s12196_s24 + $0x18] sm:$0xff] }
0x1c92   : > { %9864 = vmatprep.subr.bf16.mxu0 %v9863_v15 }
0x1c93   : > { %v4509_v6 = vpop.f32.mrb[30].mxu1 }
0x1c94   : > { %v4514_v56 = vmul.f32 %v10384_v1, %v4509_v6  ;;  %v9326_v52 = vpop.f32.mrb[31].mxu1  ;;  %v9867_v1 = vpack.c.bf16 %v5056_v16, %v5055_v57 }
0x1c96   : > { %4846 = vrot.lane.b32.xlu0 %v4514_v56, %s12183_s21 }
0x1cb5   : > { %4008 = vadd.xlane.f32.xlu0 %v4007_v33 }
0x1cba   : > { %v4674_v28 = vpop.f32.mrb[32].mxu1 }
0x1cbb   : > { %v4679_v37 = vmul.f32 %v10386_v35, %v4674_v28  ;;  %v9336_v38 = vpop.f32.mrb[33].mxu1  ;;  %v8634_v28 = vld [vmem:[%s12173_s26 + $0x1] ss:$0 sm:$0xff]  ;;  %s12200_s26 = sld [smem:[#allocation40_spill]] }
0x1cbd   : > { %4850 = vrot.lane.b32.xlu1 %v4679_v37, %s12182_s20 }
0x1cc4   : > { %v4839_v40 = vpop.f32.mrb[34].mxu1 }
0x1cc5   : > { %v4844_v25 = vmul.f32 %v10388_v23, %v4839_v40  ;;  %v9346_v41 = vpop.f32.mrb[35].mxu1  ;;  %v4969_v40 = vld [vmem:[%s12197_s30] sm:$0xff] }
0x1cc7   : > { %4854 = vrot.lane.b32.xlu1 %v4844_v25, %s12184_s25  ;;  %v4970_v25 = vld [vmem:[%s12197_s30 + $0x8] sm:$0xff] }
0x1cc8   : > { %v9858_v41 = vpack.c.bf16 %v4970_v25, %v4969_v40 }
0x1cca   : > { %9859 = vmatpush3.bf16.msra.mxu1 %v9858_v41 }
0x1ccb   : > { %9860 = vmatprep.subr.bf16.mxu1 %v10643_v22 }
0x1ceb   : > { %4011 = vadd.xlane.f32.xlu1 %v4010_v55 }
0x1d08   : > { %v4847_v58 = vpop.permute.xlu0 %4846 }
0x1d09   : > { %v4857_v63 = vsel %vm1499_vm4, %v4349_v61, %v4847_v58  ;;  %v8653_v61 = vld [vmem:[%s12198_s11] ss:$0 sm:$0xff] }
0x1d2f   : > { %v4851_v59 = vpop.permute.xlu1 %4850 }
0x1d30   : > { %v4858_v45 = vsel %vm2327_vm12, %v4857_v63, %v4851_v59 }
0x1d39   : > { %v4855_v30 = vpop.permute.xlu1 %4854 }
0x1d3a   : > { %v4859_v43 = vsel %vm2330_vm13, %v4858_v45, %v4855_v30  ;;  %v8654_v45 = vld [vmem:[%s12199_s15] ss:$0 sm:$0xff]  ;;  %s12202_s15 = sld [smem:[#allocation41_spill]] }
0x1d3b   : > { %9356 = vmatmul.mubr.msk.f32.vlgmr.msra.gmra.mrb[30].mxu0 %vm1340_vm1, %v4859_v43 }
0x1d3c   : > { %9866 = vmatpush3.bf16.msra.mxu0 %v9863_v15 }
0x1d3d   : > { %9868 = vmatprep.subr.bf16.mxu0 %v9867_v1 }
0x1d40   : > { %9870 = vmatpush3.bf16.msra.mxu0 %v9867_v1  ;;  %s12203_s0 = smov %s12202_s15 }
0x1d41   : > { %9875 = vmatprep.subr.bf16.mxu0 %v10643_v22 }
0x1d42   : > { %v4009_v3 = vpop.xlane.xlu0 %4008 }
0x1d43   : > { %v4013_v4 = vmul.f32 0.03125, %v4009_v3 }
0x1d45   : > { %v4015_v51 = vsub.f32 %v4001_v19, %v4013_v4 }
0x1d47   : > { %v4017_v11 = vmul.f32 %v4015_v51, %v4015_v51 }
0x1d49   : > { %v4019_v47 = vsel %vm1340_vm1, %v4017_v11, 0.0 }
0x1d78   : > { %v4012_v44 = vpop.xlane.xlu1 %4011 }
0x1d79   : > { %v4014_v27 = vmul.f32 0.03125, %v4012_v44  ;;  %v8657_v44 = vld [vmem:[%s12200_s26] ss:$0 sm:$0xff] }
0x1d7b   : > { %v4016_v36 = vsub.f32 %v4002_v54, %v4014_v27  ;;  %v4972_v54 = vld [vmem:[%s12197_s30 + $0x18] sm:$0xff] }
0x1d7c   : > { %v9861_v55 = vpack.c.bf16 %v4972_v54, %v4971_v50 }
0x1d7d   : > { %v4018_v0 = vmul.f32 %v4016_v36, %v4016_v36 }
0x1d7e   : > { %9862 = vmatpush3.bf16.msra.mxu1 %v9861_v55 }
0x1d7f   : > { %v4022_v2 = vsel %vm1344_vm2, %v4018_v0, 0.0  ;;  %9871 = vmatprep.subr.bf16.mxu1 %v10643_v22 }
0x1d80   : > { %4023 = vadd.xlane.f32.xlu1 %v4022_v2 }
0x1e0e   : > { %v4935_v5 = vpop.f32.mrb[30].mxu0 }
0x1e0f   : > { %v4936_v7 = vadd.f32 %v8651_v21, %v4935_v5  ;;  %v9357_v10 = vpop.f32.mrb[31].mxu0 }
0x1e11   : > { %v11535_v49 = vadd.f32 %v4936_v7, %v11387_v46  ;;  %v4024_v46 = vpop.xlane.xlu1 %4023 }
0x1e12   : > { %v4026_v6 = vmul.f32 0.03125, %v4024_v46 }
0x1e13   : > { %v4942_v48 = vsel %vm1340_vm1, %v11535_v49, 0.0 }
0x1e14   : > { %4943 = vadd.xlane.f32.xlu0 %v4942_v48  ;;  %v4028_v56 = vadd.f32 1e-12, %v4026_v6  ;;  %v8655_v48 = vld [vmem:[%s12201_s22] ss:$0 sm:$0xff]  ;;  %s12204_s22 = sld [smem:[#allocation42_spill]] }
0x1e16   : > { %10391 = vrsqrt.f32 %v4028_v56 }
0x1e18   : > { %4020 = vadd.xlane.f32.xlu0 %v4019_v47 }
0x1e20   : > { %v10392_v31 = vpop.eup %10391 }
0x1e21   : > { %v4032_v42 = vmul.f32 %v10392_v31, %v4016_v36 }
0x1e23   : > { %v4040_v35 = vmul.f32 %v8633_v32, %v4032_v42 }
0x1e25   : > { %v11551_v23 = vadd.f32 %v8634_v28, %v4040_v35 }
0x1ea1   : > { %v4944_v52 = vpop.xlane.xlu0 %4943 }
0x1ea2   : > { %v4945_v17 = vmul.f32 0.03125, %v4944_v52 }
0x1ea4   : > { %v4946_v53 = vsub.f32 %v11535_v49, %v4945_v17 }
0x1ea5   : > { %v4021_v18 = vpop.xlane.xlu0 %4020 }
0x1ea6   : > { %v4025_v19 = vmul.f32 0.03125, %v4021_v18  ;;  %v4947_v20 = vmul.f32 %v4946_v53, %v4946_v53 }
0x1ea8   : > { %v4027_v24 = vadd.f32 1e-12, %v4025_v19  ;;  %v4948_v29 = vsel %vm1340_vm1, %v4947_v20, 0.0 }
0x1ea9   : > { %4949 = vadd.xlane.f32.xlu0 %v4948_v29 }
0x1eaa   : > { %10393 = vrsqrt.f32 %v4027_v24 }
0x1eb4   : > { %v10394_v33 = vpop.eup %10393 }
0x1eb5   : > { %v4031_v34 = vmul.f32 %v10394_v33, %v4015_v51 }
0x1eb7   : > { %v4039_v37 = vmul.f32 %v8633_v32, %v4031_v34 }
0x1eb9   : > { %v11549_v38 = vadd.f32 %v8634_v28, %v4039_v37 }
0x1ebb   : > { %9377 = vmatprep.mubr.msk.f32.mxu0 %vm1340_vm1, %v11549_v38 }
0x1ebc   : > { %9378 = vmatmul.mubr.msk.f32.vlgmr.msra.gmra.mrb[32].mxu0 %vm1340_vm1, %v11551_v23 }
0x1ebd   : > { %9391 = vmatprep.mubr.msk.f32.mxu0 %vm10644_vm15, %v10627_v8 }
0x1f36   : > { %v4950_v39 = vpop.xlane.xlu0 %4949 }
0x1f37   : > { %v4951_v26 = vmul.f32 0.03125, %v4950_v39 }
0x1f39   : > { %v4952_v58 = vadd.f32 1e-05, %v4951_v26 }
0x1f3b   : > { %10395 = vrsqrt.f32 %v4952_v58 }
0x1f45   : > { %v10396_v59 = vpop.eup %10395 }
0x1f46   : > { %v4954_v63 = vmul.f32 %v10396_v59, %v4946_v53 }
0x1f48   : > { %v4961_v30 = vmul.f32 %v8653_v61, %v4954_v63 }
0x1f4a   : > { %v4968_v43 = vadd.f32 %v8654_v45, %v4961_v30 }
0x1f4c   : > { %9367 = vmatmul.mubr.msk.f32.vlgmr.msra.gmra.mrb[36].mxu1 %vm1340_vm1, %v4968_v43 }
0x1f4d   : > { %9384 = vmatprep.mubr.msk.f32.mxu1 %vm10644_vm15, %v10627_v8 }
0x1f8f   : > { %v9379_v27 = vpop.f32.mrb[32].mxu0 }
0x1f90   : > { %v5142_v36 = vadd.f32 %v9379_v27, %v8657_v44  ;;  %v5136_v0 = vpop.f32.mrb[33].mxu0 }
0x1f91   : > { %v5137_v2 = vadd.f32 %v8657_v44, %v5136_v0 }
0x1f93   : > { %v11571_v3 = vpack.i.bf16 %v5142_v36, %v5137_v2  ;;  %v9872_v4 = vpack.c.bf16 %v5142_v36, %v5137_v2 }
0x1f95   : > { %10216 = vrot.lane.b32.xlu1 %v11571_v3, %s12193_s18  ;;  %9874 = vmatpush3.bf16.xpose.msk.msra.mxu1 %vm11026_vm6, %v9872_v4 }
0x1f96   : > { %9879 = vmatprep.subr.bf16.mxu1 %v10643_v22 }
0x1f99   : > { %10221 = vrot.lane.b32.xlu1 %v11571_v3, %s12192_s6 }
0x2007   : > { %v10217_v21 = vpop.permute.xlu1 %10216 }
0x2008   : > { %v10219_v11 = vunpack.i.h.bf16 %v10217_v21  ;;  %v10218_v47 = vunpack.i.l.bf16 %v10217_v21 }
0x200a   : > { %v9880_v16 = vpack.c.bf16 %v10219_v11, %v10218_v47 }
0x200b   : > { %v10222_v5 = vpop.permute.xlu1 %10221 }
0x200c   : > { %v10224_v51 = vunpack.i.h.bf16 %v10222_v5  ;;  %v10223_v7 = vunpack.i.l.bf16 %v10222_v5 }
0x200e   : > { %v9876_v10 = vpack.c.bf16 %v10224_v51, %v10223_v7 }
0x2010   : > { %9878 = vmatpush3.bf16.msk.msra.mxu0 %vm11030_vm8, %v9876_v10 }
0x2011   : > { %9883 = vmatprep.subr.bf16.mxu0 %v10643_v22 }
0x201f   : > { %v5049_v12 = vpop.f32.mrb[36].mxu1 }
0x2020   : > { %v5050_v14 = vadd.f32 %v8655_v48, %v5049_v12  ;;  %v9368_v57 = vpop.f32.mrb[37].mxu1 }
0x2022   : > { %v5150_v15 = vmul.f32 0.35355338, %v5050_v14 }
0x2024   : > { %5321 = vrot.lane.b32.xlu0 %v5150_v15, %s12193_s18  ;;  %9385 = vmatmul.mubr.msk.f32.vlgmr.msra.gmra.mrb[38].mxu1 %vm1499_vm4, %v5150_v15 }
0x2025   : > { %9882 = vmatpush3.bf16.xpose.msk.msra.mxu1 %vm11026_vm6, %v9880_v16  ;;  %9398 = vmatprep.mubr.msk.f32.mxu1 %vm10644_vm15, %v10627_v8 }
0x2026   : > { %9891 = vmatprep.subr.bf16.mxu1 %v10643_v22 }
0x2096   : > { %v5322_v1 = vpop.permute.xlu0 %5321 }
0x2097   : > { %9399 = vmatmul.mubr.msk.f32.vlgmr.msra.gmra.mrb[40].mxu1 %vm1499_vm4, %v5322_v1 }
0x2098   : > { %9419 = vmatprep.mubr.msk.f32.mxu1 %vm10644_vm15, %v10627_v8 }
0x20f7   : > { %v5226_v46 = vpop.f32.mrb[38].mxu1 }
0x20f8   : > { %v5227_v6 = vadd.f32 %v5226_v46, %v11051_v9  ;;  %v9386_v56 = vpop.f32.mrb[39].mxu1 }
0x20fa   : > { %v5230_v52 = vsel %vm1585_vm11, %v5227_v6, -inf }
0x20fb   : > { %5231 = vmax.xlane.f32.xlu1 %v5230_v52 }
0x210c   : > { %10231 = vrot.lane.b32.xlu1 %v11571_v3, %s12177_s3 }
0x2110   : > { %5494 = vrot.lane.b32.xlu1 %v5150_v15, %s12177_s3 }
0x2114   : > { %10236 = vrot.lane.b32.xlu1 %v11571_v3, %s12175_s23 }
0x2118   : > { %10241 = vrot.lane.b32.xlu1 %v11571_v3, %s12179_s5 }
0x211c   : > { %5667 = vrot.lane.b32.xlu1 %v5150_v15, %s12179_s5 }
0x216a   : > { %v5399_v17 = vpop.f32.mrb[40].mxu1 }
0x216b   : > { %v5400_v53 = vadd.f32 %v5399_v17, %v11051_v9  ;;  %v9400_v18 = vpop.f32.mrb[41].mxu1 }
0x216d   : > { %v5403_v19 = vsel %vm1585_vm11, %v5400_v53, -inf }
0x216e   : > { %5404 = vmax.xlane.f32.xlu0 %v5403_v19 }
0x2184   : > { %10226 = vrot.lane.b32.xlu0 %v11571_v3, %s12191_s12 }
0x2188   : > { %v5232_v20 = vpop.xlane.xlu1 %5231 }
0x2189   : > { %v5233_v24 = vsub.f32 %v5227_v6, %v5232_v20 }
0x218b   : > { %v5234_v29 = vmul.f32 1.442695, %v5233_v24 }
0x218c   : > { %v10232_v31 = vpop.permute.xlu1 %10231 }
0x218d   : > { %10397 = vpow2.f32 %v5234_v29  ;;  %v10234_v39 = vunpack.i.h.bf16 %v10232_v31  ;;  %v10233_v26 = vunpack.i.l.bf16 %v10232_v31 }
0x218f   : > { %v9888_v59 = vpack.c.bf16 %v10234_v39, %v10233_v26 }
0x2190   : > { %v5495_v42 = vpop.permute.xlu1 %5494 }
0x2194   : > { %v10237_v32 = vpop.permute.xlu1 %10236 }
0x2195   : > { %v10239_v33 = vunpack.i.h.bf16 %v10237_v32  ;;  %v10238_v34 = vunpack.i.l.bf16 %v10237_v32 }
0x2197   : > { %v11608_v35 = vpop.eup %10397  ;;  %v9892_v28 = vpack.c.bf16 %v10239_v33, %v10238_v34  ;;  %v5145_v34 = vld [vmem:[%s12202_s15] sm:$0xff]  ;;  %s12205_s15 = sld [smem:[#allocation45_spill]] }
0x2198   : > { %9392 = vmatmul.mubr.msk.f32.vlgmr.msra.gmra.mrb[34].mxu0 %vm1585_vm11, %v11608_v35  ;;  %v10242_v10 = vpop.permute.xlu1 %10241  ;;  %v5236_v24 = vsel %vm1585_vm11, %v11608_v35, 0.0 }
0x2199   : > { %9894 = vmatpush3.bf16.msk.msra.mxu1 %vm11030_vm8, %v9892_v28  ;;  %9405 = vmatprep.mubr.msk.f32.mxu0 %vm10644_vm15, %v10627_v8  ;;  %v10244_v48 = vunpack.i.h.bf16 %v10242_v10  ;;  %v10243_v11 = vunpack.i.l.bf16 %v10242_v10  ;;  %v5146_v28 = vld [vmem:[%s12203_s0 + $0x8] sm:$0xff] }
0x219a   : > { %9895 = vmatprep.subr.bf16.mxu1 %v10643_v22 }
0x219b   : > { %v9896_v12 = vpack.c.bf16 %v10244_v48, %v10243_v11 }
0x219c   : > { %v5668_v14 = vpop.permute.xlu1 %5667 }
0x219d   : > { %s12206_s27 = smov %s12205_s15  ;;  %v5964_v11 = vld [vmem:[%s12205_s15] sm:$0xff]  ;;  %s12211_s15 = sld [smem:[#allocation44_spill]] }
0x21fb   : > { %v5405_v37 = vpop.xlane.xlu0 %5404 }
0x21fc   : > { %v5406_v40 = vsub.f32 %v5400_v53, %v5405_v37  ;;  %v5147_v37 = vld [vmem:[%s12203_s0 + $0x10] sm:$0xff] }
0x21fe   : > { %v5407_v25 = vmul.f32 1.442695, %v5406_v40  ;;  %v9904_v40 = vpack.c.bf16 %v5146_v28, %v5145_v34 }
0x21ff   : > { %v10227_v41 = vpop.permute.xlu0 %10226 }
0x2200   : > { %10399 = vpow2.f32 %v5407_v25  ;;  %v10229_v50 = vunpack.i.h.bf16 %v10227_v41  ;;  %v10228_v54 = vunpack.i.l.bf16 %v10227_v41  ;;  %v5148_v25 = vld [vmem:[%s12203_s0 + $0x18] sm:$0xff]  ;;  %s12208_s0 = smov %s12207_s16 }
0x2201   : > { %v9907_v41 = vpack.c.bf16 %v5148_v25, %v5147_v37  ;;  %v6056_v34 = vld [vmem:[%s12208_s0 + $0x38] sm:$0xff] }
0x2202   : > { %v9884_v55 = vpack.c.bf16 %v10229_v50, %v10228_v54 }
0x2204   : > { %9886 = vmatpush3.bf16.msk.msra.mxu0 %vm11030_vm8, %v9884_v55 }
0x2205   : > { %9887 = vmatprep.subr.bf16.mxu0 %v10643_v22 }
0x220a   : > { %v10400_v58 = vpop.eup %10399 }
0x220b   : > { %9406 = vmatmul.mubr.msk.f32.vlgmr.msra.gmra.mrb[36].mxu0 %vm1585_vm11, %v10400_v58  ;;  %v5409_v56 = vsel %vm1585_vm11, %v10400_v58, 0.0 }
0x220c   : > { %9412 = vmatprep.mubr.msk.f32.mxu0 %vm10644_vm15, %v10627_v8 }
0x220d   : > { %9890 = vmatpush3.bf16.xpose.msk.msra.mxu0 %vm11026_vm6, %v9888_v59 }
0x220e   : > { %9899 = vmatprep.subr.bf16.mxu0 %v10643_v22 }
0x2214   : > { %9413 = vmatmul.mubr.msk.f32.vlgmr.msra.gmra.mrb[38].mxu0 %vm1499_vm4, %v5495_v42 }
0x2215   : > { %9433 = vmatprep.mubr.msk.f32.mxu0 %vm10644_vm15, %v10627_v8 }
0x226b   : > { %v11629_v61 = vpop.f32.mrb[34].mxu0 }
0x226c   : > { %v9393_v63 = vpop.f32.mrb[35].mxu0 }
0x22de   : > { %v5488_v45 = vpop.f32.mrb[36].mxu0 }
0x22df   : > { %v9407_v30 = vpop.f32.mrb[37].mxu0 }
0x22e7   : > { %v5572_v43 = vpop.f32.mrb[38].mxu0 }
0x22e8   : > { %v5573_v44 = vadd.f32 %v5572_v43, %v11051_v9  ;;  %v9414_v27 = vpop.f32.mrb[39].mxu0 }
0x22ea   : > { %v5576_v36 = vsel %vm1585_vm11, %v5573_v44, -inf }
0x22eb   : > { %5577 = vmax.xlane.f32.xlu0 %v5576_v36  ;;  %v8680_v36 = vld [vmem:[%s12204_s22] ss:$0 sm:$0xff]  ;;  %s12209_s22 = sld [smem:[#allocation43_spill]] }
0x22f1   : > { %s12210_s13 = smov %s12209_s22 }
0x2301   : > { %10246 = vrot.lane.b32.xlu0 %v11571_v3, %s12178_s4 }
0x2378   : > { %v5578_v0 = vpop.xlane.xlu0 %5577 }
0x2379   : > { %v5579_v2 = vsub.f32 %v5573_v44, %v5578_v0 }
0x237b   : > { %v5580_v4 = vmul.f32 1.442695, %v5579_v2 }
0x237c   : > { %v10247_v21 = vpop.permute.xlu0 %10246 }
0x237d   : > { %10401 = vpow2.f32 %v5580_v4  ;;  %v10249_v5 = vunpack.i.h.bf16 %v10247_v21  ;;  %v10248_v51 = vunpack.i.l.bf16 %v10247_v21 }
0x237f   : > { %v9900_v7 = vpack.c.bf16 %v10249_v5, %v10248_v51 }
0x2381   : > { %9902 = vmatpush3.bf16.msk.msra.mxu0 %vm11030_vm8, %v9900_v7 }
0x2382   : > { %9903 = vmatprep.subr.bf16.mxu0 %v10643_v22 }
0x2387   : > { %v10402_v47 = vpop.eup %10401 }
0x2388   : > { %9420 = vmatmul.mubr.msk.f32.vlgmr.msra.gmra.mrb[42].mxu1 %vm1585_vm11, %v10402_v47  ;;  %v5582_v3 = vsel %vm1585_vm11, %v10402_v47, 0.0  ;;  %v5965_v47 = vld [vmem:[%s12206_s27 + $0x8] sm:$0xff] }
0x2389   : > { %9898 = vmatpush3.bf16.xpose.msk.msra.mxu1 %vm11026_vm6, %v9896_v12  ;;  %5583 = vadd.xlane.f32.xlu0 %v5582_v3  ;;  %v9910_v12 = vpack.c.bf16 %v5965_v47, %v5964_v11  ;;  %v5967_v3 = vld [vmem:[%s12206_s27 + $0x18] sm:$0xff] }
0x238a   : > { %9426 = vmatprep.mubr.msk.f32.mxu1 %vm10644_vm15, %v10627_v8  ;;  %9909 = vmatprep.subr.bf16.mxu1 %v10643_v22 }
0x2390   : > { %9427 = vmatmul.mubr.msk.f32.vlgmr.msra.gmra.mrb[44].mxu1 %vm1499_vm4, %v5668_v14 }
0x2391   : > { %9455 = vmatprep.mubr.msk.f32.mxu1 %vm10644_vm15, %v10627_v8  ;;  %9911 = vmatpush3.bf16.msra.mxu1 %v9910_v12  ;;  %v8697_v12 = vld [vmem:[%s12190_s14 + $0x1] ss:$0 sm:$0xff] }
0x2392   : > { %9912 = vmatprep.subr.bf16.mxu1 %v10643_v22 }
0x2416   : > { %v5584_v29 = vpop.xlane.xlu0 %5583 }
0x245b   : > { %v5661_v57 = vpop.f32.mrb[42].mxu1 }
0x245c   : > { %v9421_v15 = vpop.f32.mrb[43].mxu1 }
0x245d   : > { %v6050_v15 = vld [vmem:[%s12208_s0 + $0x8] sm:$0xff] }
0x2463   : > { %v5745_v16 = vpop.f32.mrb[44].mxu1 }
0x2464   : > { %v5746_v1 = vadd.f32 %v5745_v16, %v11051_v9  ;;  %v9428_v46 = vpop.f32.mrb[45].mxu1  ;;  %v6051_v16 = vld [vmem:[%s12208_s0 + $0x10] sm:$0xff] }
0x2465   : > { %v6052_v46 = vld [vmem:[%s12208_s0 + $0x18] sm:$0xff] }
0x2466   : > { %v5749_v6 = vsel %vm1585_vm11, %v5746_v1, -inf }
0x2467   : > { %5750 = vmax.xlane.f32.xlu1 %v5749_v6  ;;  %v9919_v6 = vpack.c.bf16 %v6052_v46, %v6051_v16 }
0x246b   : > { %5410 = vadd.xlane.f32.xlu1 %v5409_v56  ;;  %v6053_v56 = vld [vmem:[%s12208_s0 + $0x20] sm:$0xff] }
0x24f4   : > { %v5751_v52 = vpop.xlane.xlu1 %5750 }
0x24f5   : > { %v5752_v17 = vsub.f32 %v5746_v1, %v5751_v52  ;;  %v6054_v52 = vld [vmem:[%s12208_s0 + $0x28] sm:$0xff] }
0x24f7   : > { %v5753_v53 = vmul.f32 1.442695, %v5752_v17  ;;  %v9922_v17 = vpack.c.bf16 %v6054_v52, %v6053_v56 }
0x24f8   : > { %v5411_v20 = vpop.xlane.xlu1 %5410 }
0x24f9   : > { %10403 = vpow2.f32 %v5753_v53 }
0x24fa   : > { %10405 = vrcp.f32 %v5411_v20 }
0x24fb   : > { %10407 = vrcp.f32 %v5584_v29 }
0x2503   : > { %v10404_v18 = vpop.eup %10403 }
0x2504   : > { %9434 = vmatmul.mubr.msk.f32.vlgmr.msra.gmra.mrb[40].mxu0 %vm1585_vm11, %v10404_v18  ;;  %v5755_v19 = vsel %vm1585_vm11, %v10404_v18, 0.0  ;;  %v10406_v31 = vpop.eup %10405 }
0x2505   : > { %5756 = vadd.xlane.f32.xlu1 %v5755_v19  ;;  %9444 = vmatprep.mubr.msk.f32.mxu0 %vm10644_vm15, %v10627_v8  ;;  %v5493_v42 = vmul.f32 %v10406_v31, %v5488_v45  ;;  %v10408_v32 = vpop.eup %10407  ;;  %v8683_v31 = vld [vmem:[%s12211_s15] ss:$0 sm:$0xff] }
0x2506   : > { %v5666_v33 = vmul.f32 %v10408_v32, %v5661_v57  ;;  %9905 = vmatpush3.bf16.msra.mxu0 %v9904_v40  ;;  %v6049_v57 = vld [vmem:[%s12207_s16] sm:$0xff]  ;;  %s12212_s16 = sld [smem:[#allocation46_spill]] }
0x2507   : > { %9906 = vmatprep.subr.bf16.mxu0 %v10643_v22  ;;  %v9916_v1 = vpack.c.bf16 %v6050_v15, %v6049_v57 }
0x2509   : > { %5237 = vadd.xlane.f32.xlu1 %v5236_v24  ;;  %v8682_v24 = vld [vmem:[%s12209_s22] ss:$0 sm:$0xff] }
0x250a   : > { %9908 = vmatpush3.bf16.msra.mxu0 %v9907_v41 }
0x250b   : > { %9915 = vmatprep.subr.bf16.mxu0 %v10643_v22 }
0x250c   : > { %v8684_v37 = vld [vmem:[%s12212_s16] ss:$0 sm:$0xff] }
0x251a   : > { %5841 = vrot.lane.b32.xlu1 %v5493_v42, %s12183_s21 }
0x251e   : > { %5845 = vrot.lane.b32.xlu1 %v5666_v33, %s12182_s20  ;;  %v6055_v33 = vld [vmem:[%s12208_s0 + $0x30] sm:$0xff] }
0x251f   : > { %v9925_v28 = vpack.c.bf16 %v6056_v34, %v6055_v33 }
0x2592   : > { %v5757_v35 = vpop.xlane.xlu1 %5756 }
0x2593   : > { %10409 = vrcp.f32 %v5757_v35 }
0x2596   : > { %v5238_v26 = vpop.xlane.xlu1 %5237 }
0x2597   : > { %10411 = vrcp.f32 %v5238_v26 }
0x259a   : > { %v5842_v59 = vpop.permute.xlu1 %5841 }
0x259d   : > { %v10410_v50 = vpop.eup %10409 }
0x259e   : > { %v5846_v45 = vpop.permute.xlu1 %5845 }
0x25a1   : > { %v10412_v58 = vpop.eup %10411 }
0x25a2   : > { %v5320_v63 = vmul.f32 %v10412_v58, %v11629_v61 }
0x25a4   : > { %v5852_v30 = vsel %vm1499_vm4, %v5320_v63, %v5842_v59 }
0x25a5   : > { %v5853_v43 = vsel %vm2327_vm12, %v5852_v30, %v5846_v45 }
0x25d7   : > { %v5834_v54 = vpop.f32.mrb[40].mxu0 }
0x25d8   : > { %v5839_v55 = vmul.f32 %v10410_v50, %v5834_v54  ;;  %v9435_v39 = vpop.f32.mrb[41].mxu0  ;;  %v8686_v50 = vld [vmem:[%s12214_s7] ss:$0 sm:$0xff] }
0x25da   : > { %5849 = vrot.lane.b32.xlu1 %v5839_v55, %s12184_s25 }
0x264c   : > { %v5850_v44 = vpop.permute.xlu1 %5849 }
0x264d   : > { %v5854_v27 = vsel %vm2330_vm13, %v5853_v43, %v5850_v44  ;;  %v8692_v44 = vld [vmem:[%s12186_s29 + $0x20] sm:$0xff] }
0x264e   : > { %9445 = vmatmul.mubr.msk.f32.vlgmr.msra.gmra.mrb[42].mxu0 %vm1340_vm1, %v5854_v27  ;;  %v8693_v27 = vld [vmem:[%s12186_s29 + $0x28] sm:$0xff] }
0x264f   : > { %9474 = vmatprep.mubr.msk.f32.mxu0 %vm10644_vm15, %v10627_v8  ;;  %9917 = vmatpush3.bf16.msra.mxu0 %v9916_v1 }
0x2650   : > { %9918 = vmatprep.subr.bf16.mxu0 %v10643_v22 }
0x2653   : > { %9920 = vmatpush3.bf16.msra.mxu0 %v9919_v6 }
0x2654   : > { %9921 = vmatprep.subr.bf16.mxu0 %v10643_v22 }
0x2657   : > { %9923 = vmatpush3.bf16.msra.mxu0 %v9922_v17 }
0x2658   : > { %9924 = vmatprep.subr.bf16.mxu0 %v10643_v22 }
0x265b   : > { %9926 = vmatpush3.bf16.msra.mxu0 %v9925_v28 }
0x265c   : > { %9498 = vmatprep.subr.mxu0 %v10627_v8 }
0x2721   : > { %v5930_v0 = vpop.f32.mrb[42].mxu0 }
0x2722   : > { %v5931_v2 = vadd.f32 %v8680_v36, %v5930_v0  ;;  %v9446_v61 = vpop.f32.mrb[43].mxu0  ;;  %v9928_v36 = vpack.c.bf16 %v8693_v27, %v8692_v44  ;;  %v8694_v0 = vld [vmem:[%s12186_s29 + $0x30] sm:$0xff] }
0x2724   : > { %v5934_v4 = vadd.f32 %v5931_v2, %v11535_v49  ;;  %v5966_v49 = vld [vmem:[%s12206_s27 + $0x10] sm:$0xff]  ;;  %s12213_s27 = smov %s12212_s16  ;;  %v8695_v2 = vld [vmem:[%s12186_s29 + $0x38] sm:$0xff] }
0x2725   : > { %v9913_v14 = vpack.c.bf16 %v5967_v3, %v5966_v49  ;;  %v9931_v61 = vpack.c.bf16 %v8695_v2, %v8694_v0 }
0x2726   : > { %v5937_v21 = vsel %vm1340_vm1, %v5934_v4, 0.0 }
0x2727   : > { %5938 = vadd.xlane.f32.xlu0 %v5937_v21  ;;  %9914 = vmatpush3.bf16.msra.mxu1 %v9913_v14 }
0x2728   : > { %9927 = vmatprep.subr.bf16.mxu1 %v10643_v22 }
0x27b4   : > { %v5939_v5 = vpop.xlane.xlu0 %5938 }
0x27b5   : > { %v5940_v51 = vmul.f32 0.03125, %v5939_v5 }
0x27b7   : > { %v5941_v7 = vsub.f32 %v5934_v4, %v5940_v51 }
0x27b9   : > { %v5942_v10 = vmul.f32 %v5941_v7, %v5941_v7 }
0x27bb   : > { %v5943_v48 = vsel %vm1340_vm1, %v5942_v10, 0.0 }
0x27bc   : > { %5944 = vadd.xlane.f32.xlu1 %v5943_v48  ;;  %v8691_v48 = vld [vmem:[%s12188_s10 + $0x1] ss:$0 sm:$0xff] }
0x2849   : > { %v5945_v53 = vpop.xlane.xlu1 %5944 }
0x284a   : > { %v5946_v18 = vmul.f32 0.03125, %v5945_v53 }
0x284c   : > { %v5947_v19 = vadd.f32 1e-05, %v5946_v18 }
0x284e   : > { %10413 = vrsqrt.f32 %v5947_v19 }
0x2858   : > { %v10414_v20 = vpop.eup %10413 }
0x2859   : > { %v5949_v29 = vmul.f32 %v10414_v20, %v5941_v7  ;;  %v8690_v7 = vld [vmem:[%s12187_s8 + $0x1] ss:$0 sm:$0xff] }
0x285b   : > { %v5956_v42 = vmul.f32 %v8682_v24, %v5949_v29 }
0x285d   : > { %v5963_v32 = vadd.f32 %v8683_v31, %v5956_v42 }
0x285f   : > { %9456 = vmatmul.mubr.msk.f32.vlgmr.msra.gmra.mrb[46].mxu1 %vm1340_vm1, %v5963_v32 }
0x2860   : > { %9485 = vmatprep.mubr.msk.f32.mxu1 %vm10644_vm15, %v10627_v8  ;;  %9929 = vmatpush3.bf16.msra.mxu1 %v9928_v36 }
0x2861   : > { %9930 = vmatprep.subr.bf16.mxu1 %v10643_v22 }
0x2864   : > { %9932 = vmatpush3.bf16.msra.mxu1 %v9931_v61 }
0x2865   : > { %9488 = vmatprep.subr.mxu1 %v10627_v8 }
0x2932   : > { %v6044_v40 = vpop.f32.mrb[46].mxu1 }
0x2933   : > { %v6045_v25 = vadd.f32 %v8684_v37, %v6044_v40  ;;  %v9457_v41 = vpop.f32.mrb[47].mxu1 }
0x2935   : > { %v6048_v35 = vmax.f32 %v6045_v25, 0.0 }
0x2937   : > { %9475 = vmatmul.mubr.msk.f32.vlgmr.msra.gmra.mrb[44].mxu0 %vm2591_vm14, %v6048_v35 }
0x2938   : > { %9500 = vmatprep.mubr.msk.f32.mxu0 %vm10644_vm15, %v10627_v8 }
0x2a0a   : > { %v6133_v54 = vpop.f32.mrb[44].mxu0 }
0x2a0b   : > { %v6134_v55 = vadd.f32 %v8686_v50, %v6133_v54  ;;  %v9476_v39 = vpop.f32.mrb[45].mxu0 }
0x2a0d   : > { %v11705_v26 = vadd.f32 %v6134_v55, %v5934_v4 }
0x2a0f   : > { %v6142_v58 = vsel %vm1340_vm1, %v11705_v26, 0.0 }
0x2a10   : > { %6143 = vadd.xlane.f32.xlu0 %v6142_v58 }
0x2a9d   : > { %v6144_v59 = vpop.xlane.xlu0 %6143 }
0x2a9e   : > { %v6145_v63 = vmul.f32 0.03125, %v6144_v59 }
0x2aa0   : > { %v6146_v45 = vsub.f32 %v11705_v26, %v6145_v63 }
0x2aa2   : > { %v6147_v30 = vmul.f32 %v6146_v45, %v6146_v45 }
0x2aa4   : > { %v6148_v43 = vsel %vm1340_vm1, %v6147_v30, 0.0 }
0x2aa5   : > { %6149 = vadd.xlane.f32.xlu0 %v6148_v43 }
0x2b32   : > { %v6150_v4 = vpop.xlane.xlu0 %6149 }
0x2b33   : > { %v6151_v21 = vmul.f32 0.03125, %v6150_v4 }
0x2b35   : > { %v6152_v5 = vadd.f32 1e-05, %v6151_v21 }
0x2b37   : > { %10415 = vrsqrt.f32 %v6152_v5 }
0x2b41   : > { %v10416_v51 = vpop.eup %10415 }
0x2b42   : > { %v6154_v10 = vmul.f32 %v10416_v51, %v6146_v45 }
0x2b44   : > { %v6161_v11 = vmul.f32 %v8690_v7, %v6154_v10 }
0x2b46   : > { %v6168_v47 = vadd.f32 %v8691_v48, %v6161_v11  ;;  %v8699_v48 = vld [vmem:[%s12194_s19 + $0x20] sm:$0xff]  ;;  %v8700_v11 = vld [vmem:[%s12194_s19 + $0x28] sm:$0xff] }
0x2b48   : > { %9486 = vmatmul.mubr.msk.f32.vlgmr.msra.gmra.mrb[48].mxu1 %vm1340_vm1, %v6168_v47  ;;  %v9934_v47 = vpack.c.bf16 %v8700_v11, %v8699_v48  ;;  %v8725_v48 = vld [vmem:[%s12197_s30 + $0x38] sm:$0xff] }
0x2b49   : > { %9490 = vmatprep.mubr.msk.f32.mxu1 %vm10644_vm15, %v10627_v8 }
0x2c1b   : > { %v6251_v49 = vpop.f32.mrb[48].mxu1 }
0x2c1c   : > { %v6252_v3 = vadd.f32 %v8697_v12, %v6251_v49  ;;  %v9487_v14 = vpop.f32.mrb[49].mxu1 }
0x2c1d   : > { %v8701_v14 = vld [vmem:[%s12194_s19 + $0x30] sm:$0xff] }
0x2c1e   : > { %6595 = vrot.lane.b32.xlu1 %v6252_v3, %s12175_s23  ;;  %6264 = vrot.lane.b32.xlu0 %v6252_v3, %s12192_s6  ;;  %v6262_v57 = vmul.f32 0.35355338, %v6252_v3 }
0x2c22   : > { %6350 = vrot.lane.b32.xlu1 %v6252_v3, %s12176_s28  ;;  %6430 = vrot.lane.b32.xlu0 %v6252_v3, %s12191_s12  ;;  %s12226_s28 = sld [smem:[#allocation61_spill]] }
0x2c26   : > { %6760 = vrot.lane.b32.xlu0 %v6252_v3, %s12178_s4 }
0x2c28   : > { %p12227_p5 = scmp.ne.s32.totalorder %s12226_s28, 0 }
0x2c2a   : > { %6428 = vrot.lane.b32.xlu0 %v6262_v57, %s12193_s18 }
0x2c2e   : > { %6593 = vrot.lane.b32.xlu0 %v6262_v57, %s12177_s3 }
0x2c32   : > { %6758 = vrot.lane.b32.xlu0 %v6262_v57, %s12179_s5 }
0x2c90   : > { %v6596_v15 = vpop.permute.xlu1 %6595  ;;  %v6265_v16 = vpop.permute.xlu0 %6264 }
0x2c91   : > { %9489 = vmatpush3.xpose.msk.msra.mxu1 %vm1499_vm4, %v6265_v16 }
0x2c92   : > { %9493 = vmatprep.subr.mxu1 %v10627_v8 }
0x2c94   : > { %v6351_v1 = vpop.permute.xlu1 %6350  ;;  %v6431_v46 = vpop.permute.xlu0 %6430  ;;  %9491 = vmatmul.mubr.msk.f32.vlgmr.msra.gmra.mrb[50].mxu1 %vm1499_vm4, %v6262_v57  ;;  %v8702_v57 = vld [vmem:[%s12194_s19 + $0x38] sm:$0xff] }
0x2c95   : > { %9494 = vmatpush3.msra.mxu1 %v6351_v1  ;;  %9499 = vmatpush3.xpose.msk.msra.mxu0 %vm1499_vm4, %v6431_v46  ;;  %v8729_v1 = vld [vmem:[%s12196_s24 + $0x20] sm:$0xff]  ;;  %v8730_v46 = vld [vmem:[%s12196_s24 + $0x28] sm:$0xff] }
0x2c96   : > { %9508 = vmatprep.subr.mxu0 %v10627_v8  ;;  %9495 = vmatprep.mubr.msk.f32.mxu1 %vm10644_vm15, %v10627_v8 }
0x2c97   : > { %9503 = vmatprep.subr.mxu1 %v10627_v8 }
0x2c98   : > { %v6761_v6 = vpop.permute.xlu0 %6760 }
0x2c9c   : > { %v6429_v56 = vpop.permute.xlu0 %6428 }
0x2c9d   : > { %9501 = vmatmul.mubr.msk.f32.vlgmr.msra.gmra.mrb[46].mxu0 %vm1499_vm4, %v6429_v56 }
0x2c9e   : > { %9509 = vmatpush3.xpose.msk.msra.mxu0 %vm1499_vm4, %v6596_v15  ;;  %9510 = vmatprep.mubr.msk.f32.mxu0 %vm10644_vm15, %v10627_v8  ;;  %v9937_v15 = vpack.c.bf16 %v8702_v57, %v8701_v14  ;;  %v8720_v14 = vld [vmem:[%s12198_s11 + $0x1] ss:$0 sm:$0xff] }
0x2c9f   : > { %9518 = vmatprep.subr.mxu0 %v10627_v8 }
0x2ca0   : > { %v6594_v52 = vpop.permute.xlu0 %6593 }
0x2ca1   : > { %9511 = vmatmul.mubr.msk.f32.vlgmr.msra.gmra.mrb[48].mxu0 %vm1499_vm4, %v6594_v52 }
0x2ca2   : > { %9519 = vmatpush3.xpose.msk.msra.mxu0 %vm1499_vm4, %v6761_v6  ;;  %9520 = vmatprep.mubr.msk.f32.mxu0 %vm10644_vm15, %v10627_v8  ;;  %v9945_v6 = vpack.c.bf16 %v8730_v46, %v8729_v1 }
0x2ca3   : > { %9933 = vmatprep.subr.bf16.mxu0 %v10643_v22 }
0x2ca4   : > { %v6759_v17 = vpop.permute.xlu0 %6758 }
0x2ca5   : > { %9521 = vmatmul.mubr.msk.f32.vlgmr.msra.gmra.mrb[50].mxu0 %vm1499_vm4, %v6759_v17 }
0x2ca6   : > { %9536 = vmatprep.mubr.msk.f32.mxu0 %vm10644_vm15, %v10627_v8  ;;  %9935 = vmatpush3.bf16.msra.mxu0 %v9934_v47 }
0x2ca7   : > { %9936 = vmatprep.subr.bf16.mxu0 %v10643_v22 }
0x2caa   : > { %9938 = vmatpush3.bf16.msra.mxu0 %v9937_v15 }
0x2cab   : > { %9946 = vmatprep.subr.bf16.mxu0 %v9945_v6 }
0x2d67   : > { %v6337_v53 = vpop.f32.mrb[50].mxu1 }
0x2d68   : > { %v6338_v18 = vadd.f32 %v6337_v53, %v10989_v13  ;;  %v9492_v19 = vpop.f32.mrb[51].mxu1 }
0x2d6a   : > { %v6341_v20 = vsel %vm1499_vm4, %v6338_v18, -inf }
0x2d6b   : > { %6342 = vmax.xlane.f32.xlu0 %v6341_v20 }
0x2d70   : > { %v6502_v24 = vpop.f32.mrb[46].mxu0 }
0x2d71   : > { %v6503_v29 = vadd.f32 %v6502_v24, %v10989_v13  ;;  %v9502_v31 = vpop.f32.mrb[47].mxu0 }
0x2d73   : > { %v6506_v42 = vsel %vm1499_vm4, %v6503_v29, -inf }
0x2d74   : > { %6507 = vmax.xlane.f32.xlu1 %v6506_v42  ;;  %v6667_v32 = vpop.f32.mrb[48].mxu0 }
0x2d75   : > { %v6668_v33 = vadd.f32 %v6667_v32, %v10989_v13  ;;  %v9512_v34 = vpop.f32.mrb[49].mxu0 }
0x2d77   : > { %v6671_v28 = vsel %vm1499_vm4, %v6668_v33, -inf }
0x2d78   : > { %v6832_v37 = vpop.f32.mrb[50].mxu0  ;;  %6672 = vmax.xlane.f32.xlu0 %v6671_v28 }
0x2d79   : > { %v6833_v40 = vadd.f32 %v6832_v37, %v10989_v13  ;;  %v9522_v25 = vpop.f32.mrb[51].mxu0 }
0x2d7a   : > { %v8731_v25 = vld [vmem:[%s12196_s24 + $0x30] sm:$0xff] }
0x2d7b   : > { %v6836_v41 = vsel %vm1499_vm4, %v6833_v40, -inf }
0x2d7c   : > { %6837 = vmax.xlane.f32.xlu0 %v6836_v41  ;;  %v8732_v41 = vld [vmem:[%s12196_s24 + $0x38] sm:$0xff] }
0x2d85   : > { %6680 = vrot.lane.b32.xlu1 %v6252_v3, %s12180_s9  ;;  %s12215_s9 = sld [smem:[#allocation36_spill]] }
0x2d89   : > { %6845 = vrot.lane.b32.xlu1 %v6252_v3, %s12181_s17  ;;  %s12216_s17 = sld [smem:[#allocation38_spill]] }
0x2d8b   : > { %v8721_v15 = vld [vmem:[%s12215_s9 + $0x1] ss:$0 sm:$0xff] }
0x2d92   : > { %6515 = vrot.lane.b32.xlu0 %v6252_v3, %s12174_s2 }
0x2df8   : > { %v6343_v35 = vpop.xlane.xlu0 %6342 }
0x2df9   : > { %v6344_v50 = vsub.f32 %v6338_v18, %v6343_v35 }
0x2dfb   : > { %v6345_v54 = vmul.f32 1.442695, %v6344_v50 }
0x2dfd   : > { %10417 = vpow2.f32 %v6345_v54 }
0x2e01   : > { %v6508_v55 = vpop.xlane.xlu1 %6507 }
0x2e02   : > { %v6509_v39 = vsub.f32 %v6503_v29, %v6508_v55  ;;  %v9949_v55 = vpack.c.bf16 %v8732_v41, %v8731_v25 }
0x2e04   : > { %v6510_v58 = vmul.f32 1.442695, %v6509_v39 }
0x2e05   : > { %v6673_v59 = vpop.xlane.xlu0 %6672  ;;  %v6681_v36 = vpop.permute.xlu1 %6680 }
0x2e06   : > { %10419 = vpow2.f32 %v6510_v58  ;;  %v6674_v13 = vsub.f32 %v6668_v33, %v6673_v59  ;;  %v8716_v58 = vld [vmem:[%s12195_s1 + $0x1] ss:$0 sm:$0xff] }
0x2e07   : > { %v10418_v63 = vpop.eup %10417 }
0x2e08   : > { %v6675_v45 = vmul.f32 1.442695, %v6674_v13  ;;  %9496 = vmatmul.mubr.msk.f32.vlgmr.msra.gmra.mrb[52].mxu1 %vm1499_vm4, %v10418_v63  ;;  %v6347_v7 = vsel %vm1499_vm4, %v10418_v63, 0.0 }
0x2e09   : > { %v6838_v30 = vpop.xlane.xlu0 %6837  ;;  %9505 = vmatprep.mubr.msk.f32.mxu1 %vm10644_vm15, %v10627_v8  ;;  %v6846_v4 = vpop.permute.xlu1 %6845 }
0x2e0a   : > { %10421 = vpow2.f32 %v6675_v45  ;;  %v6839_v43 = vsub.f32 %v6833_v40, %v6838_v30  ;;  %v8734_v30 = vld [vmem:[%s12200_s26 + $0x1] ss:$0 sm:$0xff] }
0x2e0c   : > { %v6840_v44 = vmul.f32 1.442695, %v6839_v43 }
0x2e0d   : > { %v6516_v27 = vpop.permute.xlu0 %6515 }
0x2e0e   : > { %10423 = vpow2.f32 %v6840_v44  ;;  %9504 = vmatpush3.msra.mxu1 %v6516_v27 }
0x2e0f   : > { %9513 = vmatprep.subr.mxu1 %v10627_v8 }
0x2e10   : > { %v10420_v0 = vpop.eup %10419 }
0x2e11   : > { %9506 = vmatmul.mubr.msk.f32.vlgmr.msra.gmra.mrb[54].mxu1 %vm1499_vm4, %v10420_v0  ;;  %v6512_v2 = vsel %vm1499_vm4, %v10420_v0, 0.0 }
0x2e12   : > { %9514 = vmatpush3.msra.mxu1 %v6681_v36  ;;  %6513 = vadd.xlane.f32.xlu0 %v6512_v2 }
0x2e13   : > { %9515 = vmatprep.mubr.msk.f32.mxu1 %vm10644_vm15, %v10627_v8  ;;  %9523 = vmatprep.subr.mxu1 %v10627_v8 }
0x2e14   : > { %v10422_v61 = vpop.eup %10421 }
0x2e15   : > { %9516 = vmatmul.mubr.msk.f32.vlgmr.msra.gmra.mrb[56].mxu1 %vm1499_vm4, %v10422_v61  ;;  %v6677_v21 = vsel %vm1499_vm4, %v10422_v61, 0.0 }
0x2e16   : > { %9524 = vmatpush3.msra.mxu1 %v6846_v4  ;;  %6678 = vadd.xlane.f32.xlu1 %v6677_v21 }
0x2e17   : > { %9525 = vmatprep.mubr.msk.f32.mxu1 %vm10644_vm15, %v10627_v8  ;;  %9939 = vmatprep.subr.bf16.mxu1 %v10643_v22 }
0x2e18   : > { %v10424_v5 = vpop.eup %10423 }
0x2e19   : > { %9526 = vmatmul.mubr.msk.f32.vlgmr.msra.gmra.mrb[58].mxu1 %vm1499_vm4, %v10424_v5  ;;  %v6842_v51 = vsel %vm1499_vm4, %v10424_v5, 0.0  ;;  %v8722_v5 = vld [vmem:[%s12197_s30 + $0x20] sm:$0xff] }
0x2e1a   : > { %6843 = vadd.xlane.f32.xlu0 %v6842_v51  ;;  %9547 = vmatprep.mubr.msk.f32.mxu1 %vm10644_vm15, %v10627_v8  ;;  %v8723_v51 = vld [vmem:[%s12197_s30 + $0x28] sm:$0xff] }
0x2e1e   : > { %6348 = vadd.xlane.f32.xlu0 %v6347_v7  ;;  %v9940_v7 = vpack.c.bf16 %v8723_v51, %v8722_v5 }
0x2e20   : > { %9941 = vmatpush3.bf16.msra.mxu1 %v9940_v7 }
0x2e21   : > { %9942 = vmatprep.subr.bf16.mxu1 %v10643_v22 }
0x2e9f   : > { %v6514_v10 = vpop.xlane.xlu0 %6513 }
0x2ea0   : > { %10425 = vrcp.f32 %v6514_v10  ;;  %v8724_v10 = vld [vmem:[%s12197_s30 + $0x30] sm:$0xff] }
0x2ea1   : > { %v9943_v11 = vpack.c.bf16 %v8725_v48, %v8724_v10 }
0x2ea3   : > { %v6679_v12 = vpop.xlane.xlu1 %6678  ;;  %9944 = vmatpush3.bf16.msra.mxu1 %v9943_v11 }
0x2ea4   : > { %10427 = vrcp.f32 %v6679_v12  ;;  %9953 = vmatprep.subr.bf16.mxu1 %v10643_v22 }
0x2ea7   : > { %v6844_v16 = vpop.xlane.xlu0 %6843 }
0x2ea8   : > { %10429 = vrcp.f32 %v6844_v16 }
0x2eaa   : > { %v10426_v56 = vpop.eup %10425 }
0x2eab   : > { %v6349_v33 = vpop.xlane.xlu0 %6348 }
0x2eac   : > { %10431 = vrcp.f32 %v6349_v33 }
0x2eae   : > { %v10428_v18 = vpop.eup %10427 }
0x2eb2   : > { %v10430_v29 = vpop.eup %10429 }
0x2eb6   : > { %v10432_v34 = vpop.eup %10431 }
0x2edb   : > { %v6422_v49 = vpop.f32.mrb[52].mxu1 }
0x2edc   : > { %v9497_v3 = vpop.f32.mrb[53].mxu1  ;;  %v6427_v37 = vmul.f32 %v10432_v34, %v6422_v49 }
0x2ee4   : > { %v6587_v52 = vpop.f32.mrb[54].mxu1 }
0x2ee5   : > { %v6592_v17 = vmul.f32 %v10426_v56, %v6587_v52  ;;  %v9507_v53 = vpop.f32.mrb[55].mxu1 }
0x2ee7   : > { %6924 = vrot.lane.b32.xlu1 %v6592_v17, %s12183_s21 }
0x2ee8   : > { %v6752_v19 = vpop.f32.mrb[56].mxu1 }
0x2ee9   : > { %v6757_v20 = vmul.f32 %v10428_v18, %v6752_v19  ;;  %v9517_v24 = vpop.f32.mrb[57].mxu1 }
0x2eeb   : > { %6928 = vrot.lane.b32.xlu0 %v6757_v20, %s12182_s20 }
0x2eec   : > { %v6917_v31 = vpop.f32.mrb[58].mxu1 }
0x2eed   : > { %v6922_v42 = vmul.f32 %v10430_v29, %v6917_v31  ;;  %v9527_v32 = vpop.f32.mrb[59].mxu1 }
0x2eef   : > { %6932 = vrot.lane.b32.xlu1 %v6922_v42, %s12184_s25 }
0x2f59   : > { %v6925_v28 = vpop.permute.xlu1 %6924 }
0x2f5a   : > { %v6935_v35 = vsel %vm1499_vm4, %v6427_v37, %v6925_v28 }
0x2f5d   : > { %v6929_v40 = vpop.permute.xlu0 %6928 }
0x2f5e   : > { %v6936_v50 = vsel %vm2327_vm12, %v6935_v35, %v6929_v40 }
0x2f61   : > { %v6933_v54 = vpop.permute.xlu1 %6932 }
0x2f62   : > { %v6937_v39 = vsel %vm2330_vm13, %v6936_v50, %v6933_v54 }
0x2f63   : > { %9537 = vmatmul.mubr.msk.f32.vlgmr.msra.gmra.mrb[52].mxu0 %vm1340_vm1, %v6937_v39 }
0x2f64   : > { %9948 = vmatpush3.bf16.msra.mxu0 %v9945_v6  ;;  %9558 = vmatprep.mubr.msk.f32.mxu0 %vm1340_vm1, %v11549_v38  ;;  %v8727_v6 = vld [vmem:[%s12216_s17 + $0x1] ss:$0 sm:$0xff] }
0x2f65   : > { %9950 = vmatprep.subr.bf16.mxu0 %v9949_v55 }
0x2f68   : > { %9952 = vmatpush3.bf16.msra.mxu0 %v9949_v55 }
0x2f69   : > { %9957 = vmatprep.subr.bf16.mxu0 %v10643_v22 }
0x2f6b   : > { %9559 = vmatmul.mubr.msk.f32.vlgmr.msra.gmra.mrb[54].mxu0 %vm1340_vm1, %v11551_v23 }
0x2f6c   : > { %9572 = vmatprep.mubr.msk.f32.mxu0 %vm10644_vm15, %v10627_v8 }
0x3036   : > { %v7013_v59 = vpop.f32.mrb[52].mxu0 }
0x3037   : > { %v7014_v13 = vadd.f32 %v8716_v58, %v7013_v59  ;;  %v9538_v63 = vpop.f32.mrb[53].mxu0 }
0x3039   : > { %v11807_v45 = vadd.f32 %v7014_v13, %v11705_v26 }
0x303b   : > { %v7022_v38 = vsel %vm1340_vm1, %v11807_v45, 0.0 }
0x303c   : > { %7023 = vadd.xlane.f32.xlu1 %v7022_v38 }
0x303e   : > { %v9560_v43 = vpop.f32.mrb[54].mxu0 }
0x303f   : > { %v7220_v44 = vadd.f32 %v9560_v43, %v8734_v30  ;;  %v7214_v23 = vpop.f32.mrb[55].mxu0 }
0x3040   : > { %v7215_v27 = vadd.f32 %v8734_v30, %v7214_v23 }
0x3042   : > { %v11812_v36 = vpack.i.bf16 %v7220_v44, %v7215_v27  ;;  %v9954_v0 = vpack.c.bf16 %v7220_v44, %v7215_v27 }
0x30c9   : > { %v7024_v2 = vpop.xlane.xlu1 %7023 }
0x30ca   : > { %v7025_v61 = vmul.f32 0.03125, %v7024_v2 }
0x30cc   : > { %v7026_v26 = vsub.f32 %v11807_v45, %v7025_v61 }
0x30ce   : > { %v7027_v4 = vmul.f32 %v7026_v26, %v7026_v26 }
0x30d0   : > { %v7028_v21 = vsel %vm1340_vm1, %v7027_v4, 0.0 }
0x30d1   : > { %7029 = vadd.xlane.f32.xlu0 %v7028_v21 }
0x30e7   : > { %10251 = vrot.lane.b32.xlu0 %v11812_v36, %s12193_s18 }
0x315e   : > { %v7030_v47 = vpop.xlane.xlu0 %7029 }
0x315f   : > { %v7031_v12 = vmul.f32 0.03125, %v7030_v47 }
0x3161   : > { %v7032_v49 = vadd.f32 1e-05, %v7031_v12 }
0x3162   : > { %v10252_v46 = vpop.permute.xlu0 %10251 }
0x3163   : > { %10433 = vrsqrt.f32 %v7032_v49  ;;  %v10254_v56 = vunpack.i.h.bf16 %v10252_v46  ;;  %v10253_v52 = vunpack.i.l.bf16 %v10252_v46 }
0x3165   : > { %v9962_v20 = vpack.c.bf16 %v10254_v56, %v10253_v52 }
0x316d   : > { %v10434_v3 = vpop.eup %10433 }
0x316e   : > { %v7034_v57 = vmul.f32 %v10434_v3, %v7026_v26 }
0x3170   : > { %v7041_v16 = vmul.f32 %v8720_v14, %v7034_v57 }
0x3172   : > { %v7048_v1 = vadd.f32 %v8721_v15, %v7041_v16 }
0x3174   : > { %9548 = vmatmul.mubr.msk.f32.vlgmr.msra.gmra.mrb[60].mxu1 %vm1340_vm1, %v7048_v1 }
0x3175   : > { %9956 = vmatpush3.bf16.xpose.msk.msra.mxu1 %vm11026_vm6, %v9954_v0  ;;  %9565 = vmatprep.mubr.msk.f32.mxu1 %vm10644_vm15, %v10627_v8 }
0x3176   : > { %9961 = vmatprep.subr.bf16.mxu1 %v10643_v22 }
0x3247   : > { %v7131_v17 = vpop.f32.mrb[60].mxu1 }
0x3248   : > { %v7132_v53 = vadd.f32 %v8727_v6, %v7131_v17  ;;  %v9549_v18 = vpop.f32.mrb[61].mxu1 }
0x324a   : > { %v7230_v19 = vmul.f32 0.35355338, %v7132_v53 }
0x324c   : > { %7401 = vrot.lane.b32.xlu1 %v7230_v19, %s12193_s18  ;;  %9566 = vmatmul.mubr.msk.f32.vlgmr.msra.gmra.mrb[62].mxu1 %vm1499_vm4, %v7230_v19 }
0x324d   : > { %9964 = vmatpush3.bf16.xpose.msk.msra.mxu1 %vm11026_vm6, %v9962_v20  ;;  %9579 = vmatprep.mubr.msk.f32.mxu1 %vm10644_vm15, %v10627_v8 }
0x324e   : > { %9973 = vmatprep.subr.bf16.mxu1 %v10643_v22 }
0x32be   : > { %v7402_v24 = vpop.permute.xlu1 %7401 }
0x32bf   : > { %9580 = vmatmul.mubr.msk.f32.vlgmr.msra.gmra.mrb[64].mxu1 %vm1499_vm4, %v7402_v24 }
0x32c0   : > { %9600 = vmatprep.mubr.msk.f32.mxu1 %vm10644_vm15, %v10627_v8 }
0x331f   : > { %v7306_v29 = vpop.f32.mrb[62].mxu1 }
0x3320   : > { %v7307_v31 = vadd.f32 %v7306_v29, %v11051_v9  ;;  %v9567_v42 = vpop.f32.mrb[63].mxu1 }
0x3322   : > { %v7310_v32 = vsel %vm1585_vm11, %v7307_v31, -inf }
0x3323   : > { %7311 = vmax.xlane.f32.xlu1 %v7310_v32 }
0x3334   : > { %10261 = vrot.lane.b32.xlu1 %v11812_v36, %s12191_s12  ;;  %s12222_s12 = sld [smem:[#allocation49_spill]] }
0x3338   : > { %10266 = vrot.lane.b32.xlu1 %v11812_v36, %s12177_s3 }
0x3392   : > { %v7479_v33 = vpop.f32.mrb[64].mxu1 }
0x3393   : > { %v7480_v34 = vadd.f32 %v7479_v33, %v11051_v9  ;;  %v9581_v28 = vpop.f32.mrb[65].mxu1 }
0x3395   : > { %v7483_v37 = vsel %vm1585_vm11, %v7480_v34, -inf }
0x3396   : > { %7484 = vmax.xlane.f32.xlu0 %v7483_v37 }
0x33ac   : > { %10256 = vrot.lane.b32.xlu0 %v11812_v36, %s12192_s6  ;;  %s12221_s6 = sld [smem:[#allocation51_spill]] }
0x33b0   : > { %7574 = vrot.lane.b32.xlu0 %v7230_v19, %s12177_s3  ;;  %v7312_v40 = vpop.xlane.xlu1 %7311  ;;  %s12219_s3 = sld [smem:[#allocation45_spill]] }
0x33b1   : > { %v7313_v25 = vsub.f32 %v7307_v31, %v7312_v40 }
0x33b3   : > { %v7314_v41 = vmul.f32 1.442695, %v7313_v25 }
0x33b4   : > { %10271 = vrot.lane.b32.xlu0 %v11812_v36, %s12175_s23  ;;  %v10262_v55 = vpop.permute.xlu1 %10261  ;;  %s12225_s23 = sld [smem:[#allocation53_spill]] }
0x33b5   : > { %10435 = vpow2.f32 %v7314_v41  ;;  %v10264_v13 = vunpack.i.h.bf16 %v10262_v55  ;;  %v10263_v63 = vunpack.i.l.bf16 %v10262_v55 }
0x33b7   : > { %v9966_v44 = vpack.c.bf16 %v10264_v13, %v10263_v63 }
0x33b8   : > { %10276 = vrot.lane.b32.xlu0 %v11812_v36, %s12179_s5  ;;  %v10267_v27 = vpop.permute.xlu1 %10266 }
0x33b9   : > { %v10269_v4 = vunpack.i.h.bf16 %v10267_v27  ;;  %v10268_v21 = vunpack.i.l.bf16 %v10267_v27 }
0x33bb   : > { %v9970_v5 = vpack.c.bf16 %v10269_v4, %v10268_v21 }
0x33bc   : > { %7747 = vrot.lane.b32.xlu0 %v7230_v19, %s12179_s5  ;;  %s12217_s5 = sld [smem:[#allocation41_spill]] }
0x33bf   : > { %v11862_v43 = vpop.eup %10435 }
0x33c0   : > { %v7316_v42 = vsel %vm1585_vm11, %v11862_v43, 0.0 }
0x33c2   : > { %v8738_v55 = vld [vmem:[%s12217_s5 + $0x28] sm:$0xff] }
0x3423   : > { %v7485_v35 = vpop.xlane.xlu0 %7484 }
0x3424   : > { %v7486_v50 = vsub.f32 %v7480_v34, %v7485_v35 }
0x3426   : > { %v7487_v54 = vmul.f32 1.442695, %v7486_v50 }
0x3427   : > { %v10257_v39 = vpop.permute.xlu0 %10256 }
0x3428   : > { %10437 = vpow2.f32 %v7487_v54  ;;  %v10259_v58 = vunpack.i.h.bf16 %v10257_v39  ;;  %v10258_v59 = vunpack.i.l.bf16 %v10257_v39  ;;  %v8737_v54 = vld [vmem:[%s12217_s5 + $0x20] sm:$0xff]  ;;  %v8739_v39 = vld [vmem:[%s12217_s5 + $0x30] sm:$0xff] }
0x342a   : > { %v9958_v38 = vpack.c.bf16 %v10259_v58, %v10258_v59  ;;  %v9986_v58 = vpack.c.bf16 %v8738_v55, %v8737_v54  ;;  %v8740_v59 = vld [vmem:[%s12217_s5 + $0x38] sm:$0xff]  ;;  %v8784_v55 = vld [vmem:[%s12214_s7 + $0x1] ss:$0 sm:$0xff] }
0x342b   : > { %v7575_v30 = vpop.permute.xlu0 %7574  ;;  %v9989_v13 = vpack.c.bf16 %v8740_v59, %v8739_v39 }
0x342c   : > { %9960 = vmatpush3.bf16.msk.msra.mxu0 %vm11030_vm8, %v9958_v38 }
0x342d   : > { %9965 = vmatprep.subr.bf16.mxu0 %v10643_v22 }
0x342f   : > { %v10272_v23 = vpop.permute.xlu0 %10271  ;;  %9573 = vmatmul.mubr.msk.f32.vlgmr.msra.gmra.mrb[56].mxu0 %vm1585_vm11, %v11862_v43 }
0x3430   : > { %v10274_v0 = vunpack.i.h.bf16 %v10272_v23  ;;  %v10273_v2 = vunpack.i.l.bf16 %v10272_v23  ;;  %9968 = vmatpush3.bf16.msk.msra.mxu0 %vm11030_vm8, %v9966_v44  ;;  %9586 = vmatprep.mubr.msk.f32.mxu0 %vm10644_vm15, %v10627_v8 }
0x3431   : > { %9969 = vmatprep.subr.bf16.mxu0 %v10643_v22 }
0x3432   : > { %v10438_v61 = vpop.eup %10437  ;;  %v9974_v26 = vpack.c.bf16 %v10274_v0, %v10273_v2 }
0x3433   : > { %9587 = vmatmul.mubr.msk.f32.vlgmr.msra.gmra.mrb[58].mxu0 %vm1585_vm11, %v10438_v61  ;;  %v10277_v6 = vpop.permute.xlu0 %10276  ;;  %v7489_v29 = vsel %vm1585_vm11, %v10438_v61, 0.0 }
0x3434   : > { %9976 = vmatpush3.bf16.msk.msra.mxu1 %vm11030_vm8, %v9974_v26  ;;  %9593 = vmatprep.mubr.msk.f32.mxu0 %vm10644_vm15, %v10627_v8  ;;  %v10279_v56 = vunpack.i.h.bf16 %v10277_v6  ;;  %v10278_v52 = vunpack.i.l.bf16 %v10277_v6 }
0x3435   : > { %9977 = vmatprep.subr.bf16.mxu1 %v10643_v22 }
0x3436   : > { %v9978_v53 = vpack.c.bf16 %v10279_v56, %v10278_v52  ;;  %v8775_v56 = vld [vmem:[%s12208_s0 + $0x40] sm:$0xff]  ;;  %v8776_v52 = vld [vmem:[%s12208_s0 + $0x48] sm:$0xff] }
0x3439   : > { %9972 = vmatpush3.bf16.xpose.msk.msra.mxu0 %vm11026_vm6, %v9970_v5 }
0x343a   : > { %9981 = vmatprep.subr.bf16.mxu0 %v10643_v22 }
0x3440   : > { %9594 = vmatmul.mubr.msk.f32.vlgmr.msra.gmra.mrb[60].mxu0 %vm1499_vm4, %v7575_v30 }
0x3441   : > { %9614 = vmatprep.mubr.msk.f32.mxu0 %vm10644_vm15, %v10627_v8 }
0x3502   : > { %v11883_v51 = vpop.f32.mrb[56].mxu0 }
0x3503   : > { %v9574_v7 = vpop.f32.mrb[57].mxu0 }
0x3506   : > { %v7568_v10 = vpop.f32.mrb[58].mxu0 }
0x3507   : > { %v9588_v48 = vpop.f32.mrb[59].mxu0 }
0x3513   : > { %v7652_v11 = vpop.f32.mrb[60].mxu0 }
0x3514   : > { %v7653_v47 = vadd.f32 %v7652_v11, %v11051_v9  ;;  %v9595_v12 = vpop.f32.mrb[61].mxu0 }
0x3516   : > { %v7656_v49 = vsel %vm1585_vm11, %v7653_v47, -inf }
0x3517   : > { %7657 = vmax.xlane.f32.xlu1 %v7656_v49 }
0x3528   : > { %10281 = vrot.lane.b32.xlu1 %v11812_v36, %s12178_s4  ;;  %v7748_v36 = vpop.permute.xlu0 %7747  ;;  %s12224_s4 = sld [smem:[#allocation58_spill]] }
0x352e   : > { %s8791_s22 = sshll.u32 %s12224_s4, 7 }
0x352f   : > { %s11968_s9 = scalar_lea.hbm %s12225_s23, %s8791_s22 }
0x35a4   : > { %v7658_v3 = vpop.xlane.xlu1 %7657 }
0x35a5   : > { %v7659_v14 = vsub.f32 %v7653_v47, %v7658_v3 }
0x35a7   : > { %v7660_v57 = vmul.f32 1.442695, %v7659_v14 }
0x35a8   : > { %v10282_v15 = vpop.permute.xlu1 %10281 }
0x35a9   : > { %10439 = vpow2.f32 %v7660_v57  ;;  %v10284_v16 = vunpack.i.h.bf16 %v10282_v15  ;;  %v10283_v1 = vunpack.i.l.bf16 %v10282_v15  ;;  %v8768_v15 = vld [vmem:[%s12219_s3 + $0x20] sm:$0xff] }
0x35ab   : > { %v9982_v46 = vpack.c.bf16 %v10284_v16, %v10283_v1  ;;  %v8769_v16 = vld [vmem:[%s12219_s3 + $0x28] sm:$0xff] }
0x35ac   : > { %v9992_v1 = vpack.c.bf16 %v8769_v16, %v8768_v15 }
0x35ad   : > { %9984 = vmatpush3.bf16.msk.msra.mxu0 %vm11030_vm8, %v9982_v46  ;;  %v8771_v46 = vld [vmem:[%s12219_s3 + $0x38] sm:$0xff] }
0x35ae   : > { %9985 = vmatprep.subr.bf16.mxu0 %v10643_v22 }
0x35b3   : > { %v10440_v17 = vpop.eup %10439 }
0x35b4   : > { %9601 = vmatmul.mubr.msk.f32.vlgmr.msra.gmra.mrb[66].mxu1 %vm1585_vm11, %v10440_v17  ;;  %v7662_v31 = vsel %vm1585_vm11, %v10440_v17, 0.0  ;;  %v8777_v17 = vld [vmem:[%s12208_s0 + $0x50] sm:$0xff] }
0x35b5   : > { %9980 = vmatpush3.bf16.xpose.msk.msra.mxu1 %vm11026_vm6, %v9978_v53  ;;  %9607 = vmatprep.mubr.msk.f32.mxu1 %vm10644_vm15, %v10627_v8  ;;  %v9998_v53 = vpack.c.bf16 %v8776_v52, %v8775_v56 }
0x35b6   : > { %9991 = vmatprep.subr.bf16.mxu1 %v10643_v22 }
0x35bc   : > { %9608 = vmatmul.mubr.msk.f32.vlgmr.msra.gmra.mrb[68].mxu1 %vm1499_vm4, %v7748_v36  ;;  %v8778_v36 = vld [vmem:[%s12208_s0 + $0x58] sm:$0xff] }
0x35bd   : > { %9636 = vmatprep.mubr.msk.f32.mxu1 %vm10644_vm15, %v10627_v8  ;;  %9993 = vmatpush3.bf16.msra.mxu1 %v9992_v1 }
0x35be   : > { %9994 = vmatprep.subr.bf16.mxu1 %v10643_v22 }
0x3687   : > { %v7741_v62 = vpop.f32.mrb[66].mxu1 }
0x3688   : > { %v9602_v18 = vpop.f32.mrb[67].mxu1 }
0x3689   : > { %v8779_v18 = vld [vmem:[%s12208_s0 + $0x60] sm:$0xff] }
0x368f   : > { %v7825_v19 = vpop.f32.mrb[68].mxu1 }
0x3690   : > { %v7826_v20 = vadd.f32 %v7825_v19, %v11051_v9  ;;  %v9609_v24 = vpop.f32.mrb[69].mxu1  ;;  %v8780_v19 = vld [vmem:[%s12208_s0 + $0x68] sm:$0xff] }
0x3692   : > { %v7829_v60 = vsel %vm1585_vm11, %v7826_v20, -inf }
0x3693   : > { %7830 = vmax.xlane.f32.xlu0 %v7829_v60 }
0x3697   : > { %7490 = vadd.xlane.f32.xlu0 %v7489_v29 }
0x369b   : > { %7663 = vadd.xlane.f32.xlu0 %v7662_v31 }
0x369f   : > { %7317 = vadd.xlane.f32.xlu0 %v7316_v42  ;;  %v8766_v42 = vld [vmem:[%s12210_s13 + $0x1] ss:$0 sm:$0xff] }
0x3720   : > { %v7831_v32 = vpop.xlane.xlu0 %7830 }
0x3721   : > { %v7832_v33 = vsub.f32 %v7826_v20, %v7831_v32  ;;  %v10004_v20 = vpack.c.bf16 %v8780_v19, %v8779_v18 }
0x3723   : > { %v7833_v34 = vmul.f32 1.442695, %v7832_v33 }
0x3724   : > { %v7491_v28 = vpop.xlane.xlu0 %7490 }
0x3725   : > { %10441 = vpow2.f32 %v7833_v34 }
0x3726   : > { %10443 = vrcp.f32 %v7491_v28 }
0x3728   : > { %v7664_v9 = vpop.xlane.xlu0 %7663 }
0x3729   : > { %10445 = vrcp.f32 %v7664_v9  ;;  %v8781_v9 = vld [vmem:[%s12208_s0 + $0x70] sm:$0xff] }
0x372c   : > { %v7318_v23 = vpop.xlane.xlu0 %7317 }
0x372f   : > { %v10442_v37 = vpop.eup %10441 }
0x3730   : > { %v10444_v40 = vpop.eup %10443  ;;  %9615 = vmatmul.mubr.msk.f32.vlgmr.msra.gmra.mrb[62].mxu0 %vm1585_vm11, %v10442_v37  ;;  %v7835_v25 = vsel %vm1585_vm11, %v10442_v37, 0.0  ;;  %v8782_v37 = vld [vmem:[%s12208_s0 + $0x78] sm:$0xff] }
0x3731   : > { %7836 = vadd.xlane.f32.xlu1 %v7835_v25  ;;  %v7573_v41 = vmul.f32 %v10444_v40, %v7568_v10  ;;  %9625 = vmatprep.mubr.msk.f32.mxu0 %vm10644_vm15, %v10627_v8  ;;  %v10007_v40 = vpack.c.bf16 %v8782_v37, %v8781_v9  ;;  %v8773_v25 = vld [vmem:[%s12213_s27 + $0x1] ss:$0 sm:$0xff] }
0x3732   : > { %9987 = vmatpush3.bf16.msra.mxu0 %v9986_v58 }
0x3733   : > { %v10446_v35 = vpop.eup %10445  ;;  %7921 = vrot.lane.b32.xlu0 %v7573_v41, %s12183_s21  ;;  %9988 = vmatprep.subr.bf16.mxu0 %v10643_v22  ;;  %s12218_s21 = sld [smem:[#allocation42_spill]] }
0x3734   : > { %v7746_v50 = vmul.f32 %v10446_v35, %v7741_v62  ;;  %v10001_v62 = vpack.c.bf16 %v8778_v36, %v8777_v17 }
0x3736   : > { %9990 = vmatpush3.bf16.msra.mxu0 %v9989_v13 }
0x3737   : > { %7925 = vrot.lane.b32.xlu0 %v7746_v50, %s12182_s20  ;;  %9997 = vmatprep.subr.bf16.mxu0 %v10643_v22  ;;  %s12223_s20 = sld [smem:[#allocation55_spill]] }
0x3739   : > { %v8762_v7 = vld [vmem:[%s12218_s21 + $0x1] ss:$0 sm:$0xff] }
0x373d   : > { %s1318_s2 = sand.u32 1, %s12223_s20  }
0x373e   : > { %s8513_s18 = sshll.u32 %s1318_s2, 3  ;;  %s8339_s17 = scalar_lea.sflag [#allocation4], %s1318_s2 }
0x37a5   : > { %v7922_v27 = vpop.permute.xlu0 %7921 }
0x37a9   : > { %v7926_v2 = vpop.permute.xlu0 %7925 }
0x37be   : > { %v7837_v63 = vpop.xlane.xlu1 %7836 }
0x37bf   : > { %10447 = vrcp.f32 %v7837_v63 }
0x37c0   : > { %10449 = vrcp.f32 %v7318_v23  ;;  %v8253_v23 = vld [vmem:[%s12221_s6] sm:$0xff] }
0x37c9   : > { %v10448_v38 = vpop.eup %10447 }
0x37ca   : > { %v10450_v0 = vpop.eup %10449 }
0x37cb   : > { %v7400_v61 = vmul.f32 %v10450_v0, %v11883_v51 }
0x37cd   : > { %v7932_v26 = vsel %vm1499_vm4, %v7400_v61, %v7922_v27  ;;  %v8254_v27 = vld [vmem:[%s12221_s6 + $0x8] sm:$0xff]  ;;  %v8256_v61 = vld [vmem:[%s12221_s6 + $0x18] sm:$0xff] }
0x37ce   : > { %v7933_v4 = vsel %vm2327_vm12, %v7932_v26, %v7926_v2  ;;  %v10010_v0 = vpack.c.bf16 %v8254_v27, %v8253_v23  ;;  %v8255_v2 = vld [vmem:[%s12221_s6 + $0x10] sm:$0xff] }
0x37cf   : > { %v10013_v26 = vpack.c.bf16 %v8256_v61, %v8255_v2 }
0x3803   : > { %v7914_v30 = vpop.f32.mrb[62].mxu0 }
0x3804   : > { %v7919_v43 = vmul.f32 %v10448_v38, %v7914_v30  ;;  %v9616_v44 = vpop.f32.mrb[63].mxu0 }
0x3806   : > { %7929 = vrot.lane.b32.xlu0 %v7919_v43, %s12184_s25  ;;  %s12220_s25 = smov %s12211_s15  ;;  %s1320_s15 = scalar_lea.vmem [#allocation7], %s8513_s18 }
0x3807   : > { %v8767_v33 = vld [vmem:[%s12220_s25 + $0x1] ss:$0 sm:$0xff]  ;;  %s8352_s16 = sshll.u32 %s1320_s15, 4  ;;  %s10645_s25 = smov [#allocation7]   ;;  %s11970_s16 = int_to_ptr.vmem [resolvable:$true] %s8352_s16 }
0x3808   : > { %s10511_s21 = scalar_lea.vmem %s11970_s16, 128 }
0x3809   : > { %p10512_p4 = scmp.ne.s32.totalorder %s11970_s16, %s10511_s21 }
0x380b   : > { %p10513_p6 = pnand %p10512_p4, %p12227_p5 }
0x380d   : > { %p10514_p9 = pneg %p10513_p6 }
0x3878   : > { %v7930_v21 = vpop.permute.xlu0 %7929 }
0x3879   : > { %v7934_v5 = vsel %vm2330_vm13, %v7933_v4, %v7930_v21 }
0x387a   : > { %9626 = vmatmul.mubr.msk.f32.vlgmr.msra.gmra.mrb[64].mxu0 %vm1340_vm1, %v7934_v5 }
0x387b   : > { %9655 = vmatprep.mubr.msk.f32.mxu0 %vm10644_vm15, %v10627_v8  ;;  %9999 = vmatpush3.bf16.msra.mxu0 %v9998_v53 }
0x387c   : > { %10000 = vmatprep.subr.bf16.mxu0 %v10643_v22 }
0x387f   : > { %10002 = vmatpush3.bf16.msra.mxu0 %v10001_v62 }
0x3880   : > { %10003 = vmatprep.subr.bf16.mxu0 %v10643_v22 }
0x3883   : > { %10005 = vmatpush3.bf16.msra.mxu0 %v10004_v20 }
0x3884   : > { %10006 = vmatprep.subr.bf16.mxu0 %v10643_v22 }
0x3887   : > { %10008 = vmatpush3.bf16.msra.mxu0 %v10007_v40 }
0x394d   : > { %v8010_v10 = vpop.f32.mrb[64].mxu0 }
0x394e   : > { %v8011_v48 = vadd.f32 %v8762_v7, %v8010_v10  ;;  %v9627_v51 = vpop.f32.mrb[65].mxu0  ;;  %v8786_v10 = vld [vmem:[%s12222_s12] ss:$0 sm:$0xff]  ;;  %s10515_s12 = sshll.u32 %s10645_s25, 4  ;;  %s10516_s12 = int_to_ptr.vmem [resolvable:$false] %s10515_s12 }
0x394f   : > { %v8787_v51 = vld [vmem:[#allocation2] ss:$0 sm:$0xff]  ;;  %s10517_s20 = scalar_lea.vmem %s10516_s12, 256  ;;  %p10518_p10 = scmp.lt.s32.totalorder %s11970_s16, %s10516_s12 }
0x3950   : > { %v8014_v11 = vadd.f32 %v8011_v48, %v11807_v45  ;;  %v8770_v45 = vld [vmem:[%s12219_s3 + $0x30] sm:$0xff]  ;;  %p10519_p7 = scmp.lt.s32.totalorder %s10517_s20, %s10511_s21 }
0x3951   : > { %v9995_v6 = vpack.c.bf16 %v8771_v46, %v8770_v45 }
0x3952   : > { %v8019_v47 = vsel %vm1340_vm1, %v8014_v11, 0.0  ;;  %p10520_p8 = por %p10519_p7, %p10518_p10 }
0x3953   : > { %8020 = vadd.xlane.f32.xlu0 %v8019_v47  ;;  %9996 = vmatpush3.bf16.msra.mxu1 %v9995_v6 }
0x3954   : > { %10009 = vmatprep.subr.bf16.mxu1 %v10643_v22  ;;  %p10521_p11 = pnand %p10520_p8, %p10514_p9 }
0x39e0   : > { %v8021_v12 = vpop.xlane.xlu0 %8020 }
0x39e1   : > { %v8022_v49 = vmul.f32 0.03125, %v8021_v12 }
0x39e3   : > { %v8023_v3 = vsub.f32 %v8014_v11, %v8022_v49 }
0x39e5   : > { %v8024_v14 = vmul.f32 %v8023_v3, %v8023_v3 }
0x39e7   : > { %v8025_v57 = vsel %vm1340_vm1, %v8024_v14, 0.0 }
0x39e8   : > { %8026 = vadd.xlane.f32.xlu1 %v8025_v57 }
0x3a75   : > { %v8027_v24 = vpop.xlane.xlu1 %8026 }
0x3a76   : > { %v8028_v60 = vmul.f32 0.03125, %v8027_v24 }
0x3a78   : > { %v8029_v29 = vadd.f32 1e-05, %v8028_v60 }
0x3a7a   : > { %10451 = vrsqrt.f32 %v8029_v29 }
0x3a84   : > { %v10452_v31 = vpop.eup %10451 }
0x3a85   : > { %v8031_v32 = vmul.f32 %v10452_v31, %v8023_v3 }
0x3a87   : > { %v8038_v34 = vmul.f32 %v8766_v42, %v8031_v32 }
0x3a89   : > { %v8045_v28 = vadd.f32 %v8767_v33, %v8038_v34 }
0x3a8b   : > { %9637 = vmatmul.mubr.msk.f32.vlgmr.msra.gmra.mrb[70].mxu1 %vm1340_vm1, %v8045_v28 }
0x3a8c   : > { %9666 = vmatprep.mubr.msk.f32.mxu1 %vm10644_vm15, %v10627_v8  ;;  %10011 = vmatpush3.bf16.msra.mxu1 %v10010_v0 }
0x3a8d   : > { %10012 = vmatprep.subr.bf16.mxu1 %v10643_v22  ;;  %v8788_v22 = vld [vmem:[#allocation5] ss:$0 sm:$0xff] }
0x3a90   : > { %10014 = vmatpush3.bf16.msra.mxu1 %v10013_v26 }
0x3b5e   : > { %v8128_v41 = vpop.f32.mrb[70].mxu1 }
0x3b5f   : > { %v8129_v35 = vadd.f32 %v8773_v25, %v8128_v41  ;;  %v9638_v50 = vpop.f32.mrb[71].mxu1 }
0x3b61   : > { %v8132_v54 = vmax.f32 %v8129_v35, 0.0 }
0x3b63   : > { %9656 = vmatmul.mubr.msk.f32.vlgmr.msra.gmra.mrb[66].mxu0 %vm2591_vm14, %v8132_v54 }
0x3c36   : > { %v8219_v39 = vpop.f32.mrb[66].mxu0 }
0x3c37   : > { %v8220_v58 = vadd.f32 %v8784_v55, %v8219_v39  ;;  %v9657_v59 = vpop.f32.mrb[67].mxu0 }
0x3c39   : > { %v8223_v8 = vadd.f32 %v8220_v58, %v8014_v11 }
0x3c3b   : > { %v8226_v13 = vsel %vm1340_vm1, %v8223_v8, 0.0 }
0x3c3c   : > { %8227 = vadd.xlane.f32.xlu1 %v8226_v13 }
0x3cc9   : > { %v8228_v63 = vpop.xlane.xlu1 %8227 }
0x3cca   : > { %v8229_v38 = vmul.f32 0.03125, %v8228_v63 }
0x3ccc   : > { %v8230_v30 = vsub.f32 %v8223_v8, %v8229_v38 }
0x3cce   : > { %v8231_v43 = vmul.f32 %v8230_v30, %v8230_v30 }
0x3cd0   : > { %v8232_v44 = vsel %vm1340_vm1, %v8231_v43, 0.0 }
0x3cd1   : > { %8233 = vadd.xlane.f32.xlu1 %v8232_v44 }
0x3d5e   : > { %v8234_v4 = vpop.xlane.xlu1 %8233 }
0x3d5f   : > { %v8235_v21 = vmul.f32 0.03125, %v8234_v4 }
0x3d61   : > { %v8236_v5 = vadd.f32 1e-05, %v8235_v21 }
0x3d63   : > { %10453 = vrsqrt.f32 %v8236_v5 }
0x3d6d   : > { %v10454_v7 = vpop.eup %10453 }
0x3d6e   : > { %v8238_v48 = vmul.f32 %v10454_v7, %v8230_v30 }
0x3d70   : > { %v8245_v11 = vmul.f32 %v8786_v10, %v8238_v48 }
0x3d72   : > { %v8252_v47 = vadd.f32 %v8787_v51, %v8245_v11 }
0x3d74   : > { %9667 = vmatmul.mubr.msk.f32.vlgmr.msra.gmra.mrb[72].mxu1 %vm1340_vm1, %v8252_v47 }
0x3e47   : > { %v8333_v12 = vpop.f32.mrb[72].mxu1 }
0x3e48   : > { %v8334_v49 = vadd.f32 %v8788_v22, %v8333_v12  ;;  %v9668_v3 = vpop.f32.mrb[73].mxu1 }
0x3e4a   : > { %8337 = vst.msk [vmem:[%s1320_s15] sm:$0xff] %vm2591_vm14, %v8334_v49 }
0x3e4b   : > { %10524 = shalt.err (!%p10521_p11)
}
0x3e4c   : > { %s10525_s4 = scalar_lea.hbm %s11968_s9, 128  ;;  %s10529_s2 = scalar_lea.hbm %s12225_s23, 256 }
0x3e4d   : > { %p10526_p13 = scmp.ne.s32.totalorder %s11968_s9, %s10525_s4  ;;  %p10530_p2 = scmp.lt.u32.totalorder %s11968_s9, %s12225_s23 }
0x3e4e   : > { %p10531_p3 = scmp.lt.u32.totalorder %s10529_s2, %s10525_s4  ;;  %p10533_p4 = scmp.lt.u32.totalorder %s10525_s4, %s11968_s9 }
0x3e4f   : > { %p10527_p1 = pnand %p10526_p13, %p12227_p5 }
0x3e50   : > { %p10532_p12 = por %p10531_p3, %p10530_p2 }
0x3e51   : > { %p10528_p0 = pneg %p10527_p1 }
0x3e52   : > { %p10534_p6 = por %p10533_p4, %p10532_p12 }
0x3e54   : > { %p10535_p9 = pnand %p10534_p6, %p10528_p0 }
0x3e56   : > { %10538 = shalt.err (!%p10535_p9)
}
0x3e57   : > { %10023 = dma.vmem_to_hbm [thread:$0]  (%p12227_p5), %s11970_s16, 128, %s11968_s9, %s8339_s17  }
0x3e58 PF: > { %s12228_s18 = sld [smem:[#allocation57_spill]]  ;;  %s12229_s22 = sld [smem:[#allocation54_spill]] }
0x3e59   : > { %s12230_s15 = sld [smem:[#allocation62_spill]] }
0x3e5e   : > { %p10040_p10 = scmp.ge.s32.totalorder %s12228_s18, 2  ;;  %s8364_s21 = sand.u32 1, %s12229_s22  }
0x3e5f   : > { %p12231_p7 = scmp.ne.s32.totalorder %s12230_s15, 0  ;;  %s8365_s25 = scalar_lea.sflag [#allocation4], %s8364_s21 }
0x3e61   : > { %p10033_p8 = pnand %p10040_p10, %p12231_p7 }
0x3e63   : > { %10564 = dma.done.wait (!%p10033_p8), %s8365_s25, 128  }
0x3e64   : > { %10566 = vsyncadd (!%p10033_p8), %s8365_s25, 4294967168  ;;  %s12232_s22 = sld [smem:[#allocation59_spill]]  ;;  %s12233_s15 = sld [smem:[#allocation55_spill]] }
0x3e65   : > { %s12234_s16 = sld [smem:[#allocation56_spill]]  ;;  %s12235_s18 = sld [smem:[#allocation60_spill]] }
0x3e6a   : > { %p97_p11 = scmp.ge.s32.totalorder %s12232_s22, 4  }
0x3e6c   :  { %99 = sbr.rel (!%p97_p11) target bundleno = 109 (0x6d), region = 315 }
0x3e73   :  { %8370 = vsyncpa [#allocation3], 1 }
0x3e74   :  { %8372 = vsyncpa [#allocation3 + $0x1], 1 }
0x3e75   :  { %8373 = vsyncpa [#allocation6], 1 }
0x3e76   :  { %8374 = vsyncpa [#allocation4], 1 }
0x3e77   :  { %8376 = vsyncpa [#allocation4 + $0x1], 1 }

</bundles_post_ra>
